<compile_context>
chip_gen: v5e
topology: v5e:2x2
jax: 0.10.0
libtpu: 0.0.40
codegen_flags: <defaults>
</compile_context>

<pallas_src>
import functools

import jax
import jax.numpy as jnp
from jax import lax
from jax.experimental import pallas as pl
from jax.experimental.pallas import tpu as pltpu


_VMEM = pl.BlockSpec(memory_space=pltpu.MemorySpace.VMEM)


def _default_vmem_limit():
    """Generation-aware scoped-VMEM budget (fallback is safe on all chips)."""
    try:
        cap = int(pltpu.get_tpu_info().vmem_capacity_bytes)
    except Exception:  # pragma: no cover - conservative fallback
        cap = 64 * 1024 * 1024
    return int(min(cap * 3 // 4, 100 * 1024 * 1024))


_VMEM_LIMIT = _default_vmem_limit()


def _reorder_gates(w):
    """PyTorch gate order (i,f,g,o) along the leading 4H axis -> (i,f,o,g)."""
    h = w.shape[0] // 4
    return jnp.concatenate([w[0:2 * h], w[3 * h:4 * h], w[2 * h:3 * h]], axis=0)


# ----------------------------------------------------------------------------
# Fused bidirectional LSTM layer kernel
# ----------------------------------------------------------------------------
def bilstm_layer_kernel(*args, T, B, H, has_mask):
    """One bidirectional LSTM layer over the whole (time-major flattened) sequence.

    Inputs (refs):
      x_ref:    (T*B, Din) f32   row index = t*B + b, B is a multiple of 8
      mask_ref: (T*B, 1)   f32   (layer 0 only; fused attention-mask multiply)
      wih_ref:  (Din, 8H)  bf16  [W_ih_fwd^T | W_ih_bwd^T], gate order (i,f,o,g)
      b_ref:    (1, 8H)    f32   [b_ih+b_hh fwd | b_ih+b_hh bwd]
      whh_ref:  (2H, 8H)   bf16  blockdiag(W_hh_fwd^T, W_hh_bwd^T)
    Output:
      out_ref:  (T*B, 2H)  f32   [h_fwd | h_bwd] per token
    Scratch:
      gx_scr:   (T*B, 8H)  f32   hoisted input projection for both directions
    """
    if has_mask:
        x_ref, mask_ref, wih_ref, b_ref, whh_ref, out_ref, gx_scr = args
    else:
        x_ref, wih_ref, b_ref, whh_ref, out_ref, gx_scr = args
        mask_ref = None

    four_h = 4 * H
    three_h = 3 * H

    x = x_ref[...]
    if has_mask:
        x = x * mask_ref[...]            # fused attention-mask multiply (layer 0)
    xb = x.astype(jnp.bfloat16)

    # (1) Hoisted input projection: one lane-dense bf16 MXU matmul for BOTH
    #     directions and ALL timesteps, bias folded in, f32 accumulation.
    gx_scr[...] = (jnp.dot(xb, wih_ref[...], preferred_element_type=jnp.float32)
                   + b_ref[...])

    # Hoisted recurrent weights (constant over the whole loop).
    whh = whh_ref[...]                   # (2H, 8H) bf16

    def gate_block(gates, c_prev):
        # Gate order (i, f, o | g): sigmoid on one contiguous 3H slice, tanh on
        # one H slice (+ tanh(c_new)) -> ~5H EUP pushes per direction per step.
        sig = jax.nn.sigmoid(gates[:, 0:three_h])
        g_g = jnp.tanh(gates[:, three_h:four_h])
        i_g = sig[:, 0:H]
        f_g = sig[:, H:2 * H]
        o_g = sig[:, 2 * H:three_h]
        c_new = f_g * c_prev + i_g * g_g
        h_new = o_g * jnp.tanh(c_new)
        return h_new, c_new

    def body(t, carry):
        h_f, c_f, h_b, c_b = carry
        rf = pl.multiple_of(t * B, B)            # fwd rows (time t), 8-aligned
        rb = pl.multiple_of((T - 1 - t) * B, B)  # bwd rows (time T-1-t)

        # (2) One fused block-diagonal recurrent matmul for both directions.
        h_cat = jnp.concatenate([h_f, h_b], axis=1).astype(jnp.bfloat16)
        rec = jnp.dot(h_cat, whh, preferred_element_type=jnp.float32)  # (B, 8H)

        gates_f = gx_scr[pl.ds(rf, B), 0:four_h] + rec[:, 0:four_h]
        gates_b = gx_scr[pl.ds(rb, B), four_h:2 * four_h] + rec[:, four_h:2 * four_h]

        h_f, c_f = gate_block(gates_f, c_f)
        h_b, c_b = gate_block(gates_b, c_b)

        out_ref[pl.ds(rf, B), 0:H] = h_f
        out_ref[pl.ds(rb, B), H:2 * H] = h_b
        return h_f, c_f, h_b, c_b

    zeros = jnp.zeros((B, H), jnp.float32)
    lax.fori_loop(0, T, body, (zeros, zeros, zeros, zeros), unroll=min(T, 8))


def bilstm_layer(x_flat, p_fwd, p_bwd, T, B, hidden_size, mask=None):
    """x_flat: (T*B, Din) f32 time-major flattened (B multiple of 8) -> (T*B, 2H)."""
    H = hidden_size

    wih_both = jnp.concatenate(
        [_reorder_gates(p_fwd["w_ih"]).T, _reorder_gates(p_bwd["w_ih"]).T],
        axis=1).astype(jnp.bfloat16)                                   # (Din, 8H)
    b_both = jnp.concatenate(
        [_reorder_gates(p_fwd["b_ih"] + p_fwd["b_hh"]),
         _reorder_gates(p_bwd["b_ih"] + p_bwd["b_hh"])]).reshape(1, 8 * H)

    whh_cat = jnp.zeros((2 * H, 8 * H), jnp.float32)
    whh_cat = whh_cat.at[0:H, 0:4 * H].set(_reorder_gates(p_fwd["w_hh"]).T)
    whh_cat = whh_cat.at[H:2 * H, 4 * H:8 * H].set(_reorder_gates(p_bwd["w_hh"]).T)
    whh_cat = whh_cat.astype(jnp.bfloat16)                             # (2H, 8H)

    has_mask = mask is not None
    kernel = functools.partial(bilstm_layer_kernel, T=T, B=B, H=H, has_mask=has_mask)
    inputs = [x_flat] + ([mask] if has_mask else []) + [wih_both, b_both, whh_cat]

    return pl.pallas_call(
        kernel,
        out_shape=jax.ShapeDtypeStruct((T * B, 2 * H), jnp.float32),
        in_specs=[_VMEM] * len(inputs),
        out_specs=_VMEM,
        scratch_shapes=[
            pltpu.VMEM((T * B, 8 * H), jnp.float32),   # hoisted gates_x
        ],
        compiler_params=pltpu.CompilerParams(vmem_limit_bytes=_VMEM_LIMIT),
    )(*inputs)


# ----------------------------------------------------------------------------
# Fused head kernel: LayerNorm + classifier + masked CrossEntropy(ignore_index=0)
# Grid over token tiles, fully "parallel" (per-tile loss partials).
# ----------------------------------------------------------------------------
def head_kernel(seq_ref, gamma_ref, beta_ref, wc_ref, bc_ref, labels_ref,
                mask_ref, logits_ref, part_ref):
    """seq_ref: (N_tile, 2H); logits_ref: (N_tile, Lpad); part_ref: (1, 8, 128).

    part_ref[0, 0, 0] = sum of nll over active tokens in this tile
    part_ref[0, 0, 1] = number of active tokens in this tile
    """
    x = seq_ref[...].astype(jnp.float32)

    # LayerNorm (eps = 1e-5, PyTorch default)
    mean = jnp.mean(x, axis=-1, keepdims=True)
    var = jnp.mean(jnp.square(x - mean), axis=-1, keepdims=True)
    y = (x - mean) * lax.rsqrt(var + 1e-5) * gamma_ref[...] + beta_ref[...]

    # Classifier -> lane-dense (N_tile, 128) logits store (pad-class bias -1e9).
    logits = jnp.dot(y, wc_ref[...], preferred_element_type=jnp.float32) + bc_ref[...]
    logits_ref[...] = logits

    # CrossEntropyLoss(ignore_index=0) on tokens with attention_mask == 1.
    labels = labels_ref[...]
    mask = mask_ref[...]
    lmax = jnp.max(logits, axis=-1, keepdims=True)
    lse = jnp.log(jnp.sum(jnp.exp(logits - lmax), axis=-1, keepdims=True)) + lmax
    class_ids = lax.broadcasted_iota(jnp.int32, logits.shape, 1)
    picked = jnp.sum(jnp.where(labels == class_ids, logits, 0.0),
                     axis=-1, keepdims=True)
    nll = lse - picked                                        # (N_tile, 1)

    active = jnp.logical_and(mask == 1, labels != 0).astype(jnp.float32)
    nll_sum = jnp.sum(nll * active)
    cnt = jnp.sum(active)

    sub = lax.broadcasted_iota(jnp.int32, part_ref.shape, 1)
    lane = lax.broadcasted_iota(jnp.int32, part_ref.shape, 2)
    zeros = jnp.zeros(part_ref.shape, jnp.float32)
    part_ref[...] = (jnp.where((sub == 0) & (lane == 0), nll_sum, zeros)
                     + jnp.where((sub == 0) & (lane == 1), cnt, zeros))


def head_pass(seq_flat, gamma, beta, cls_w, cls_b, labels_flat, mask_flat,
              num_labels):
    """seq_flat: (N, 2H); labels/mask: (N,). Returns ((N, Lpad) logits, scalar loss)."""
    N, two_h = seq_flat.shape
    l_pad = max(128, ((num_labels + 127) // 128) * 128)

    # Token tile size: go toward 256 rows (MXU-fill / HBM roofline), but never
    # pad a tiny demo up to 256.
    n_tile = ((N + 7) // 8) * 8 if N <= 256 else 256
    pad = (-N) % n_tile
    if pad:
        seq_flat = jnp.pad(seq_flat, ((0, pad), (0, 0)))
        labels_flat = jnp.pad(labels_flat, (0, pad))
        mask_flat = jnp.pad(mask_flat, (0, pad))
    n_padded = N + pad
    num_tiles = n_padded // n_tile

    wc_pad = jnp.zeros((two_h, l_pad), jnp.float32).at[:, :num_labels].set(cls_w.T)
    bc_pad = jnp.full((1, l_pad), -1e9, jnp.float32).at[0, :num_labels].set(cls_b)

    logits, partials = pl.pallas_call(
        head_kernel,
        out_shape=(jax.ShapeDtypeStruct((n_padded, l_pad), jnp.float32),
                   jax.ShapeDtypeStruct((num_tiles, 8, 128), jnp.float32)),
        grid=(num_tiles,),
        in_specs=[
            pl.BlockSpec((n_tile, two_h), lambda i: (i, 0)),
            pl.BlockSpec((1, two_h), lambda i: (0, 0)),
            pl.BlockSpec((1, two_h), lambda i: (0, 0)),
            pl.BlockSpec((two_h, l_pad), lambda i: (0, 0)),
            pl.BlockSpec((1, l_pad), lambda i: (0, 0)),
            pl.BlockSpec((n_tile, 1), lambda i: (i, 0)),
            pl.BlockSpec((n_tile, 1), lambda i: (i, 0)),
        ],
        out_specs=(
            pl.BlockSpec((n_tile, l_pad), lambda i: (i, 0)),
            pl.BlockSpec((1, 8, 128), lambda i: (i, 0, 0)),
        ),
        compiler_params=pltpu.CompilerParams(
            dimension_semantics=("parallel",),
            vmem_limit_bytes=_VMEM_LIMIT),
    )(seq_flat, gamma.reshape(1, -1), beta.reshape(1, -1), wc_pad, bc_pad,
      labels_flat.reshape(-1, 1).astype(jnp.int32),
      mask_flat.reshape(-1, 1).astype(jnp.int32))

    nll_total = jnp.sum(partials[:, 0, 0])
    cnt_total = jnp.sum(partials[:, 0, 1])
    # NOTE: PyTorch returns NaN when zero tokens are active; we clamp to avoid it.
    loss = nll_total / jnp.maximum(cnt_total, 1.0)
    return logits[:N], loss


# ----------------------------------------------------------------------------
# Full forward
# ----------------------------------------------------------------------------
@jax.jit
def bilstm_for_ner_forward(params, input_ids, attention_mask, labels):
    B, T = input_ids.shape
    H = params["lstm_l0_fwd"]["w_hh"].shape[1]
    L = params["cls_w"].shape[0]

    # Pad batch to a multiple of 8 so every per-timestep slice in the LSTM
    # recurrence is sublane-aligned; padded rows have mask 0 and are dropped.
    B_pad = ((B + 7) // 8) * 8
    pad_b = B_pad - B
    if pad_b:
        input_ids = jnp.pad(input_ids, ((0, pad_b), (0, 0)))
        attention_mask = jnp.pad(attention_mask, ((0, pad_b), (0, 0)))
        labels = jnp.pad(labels, ((0, pad_b), (0, 0)))

    # Time-major flattened token axis (row = t*B_pad + b); only the tiny index /
    # mask / label tensors get transposed, activations stay in this layout.
    ids_tm = input_ids.T.reshape(-1)
    mask_tm = attention_mask.T.reshape(-1).astype(jnp.int32)
    labels_tm = labels.T.reshape(-1).astype(jnp.int32)

    # Embedding lookup (XLA gather glue). SpatialDropout is identity in eval
    # mode. The attention-mask multiply is fused into the layer-0 LSTM kernel.
    x = jnp.take(params["embedding"], ids_tm, axis=0)            # (T*B_pad, E)

    # Two fused bidirectional LSTM layers (inter-layer dropout = identity).
    x = bilstm_layer(x, params["lstm_l0_fwd"], params["lstm_l0_bwd"], T, B_pad, H,
                     mask=mask_tm.astype(jnp.float32).reshape(-1, 1))
    x = bilstm_layer(x, params["lstm_l1_fwd"], params["lstm_l1_bwd"], T, B_pad, H)

    # Fused LayerNorm + classifier + masked CE(ignore_index=0).
    logits_pad, loss = head_pass(
        x, params["ln_gamma"], params["ln_beta"], params["cls_w"],
        params["cls_b"], labels_tm, mask_tm, L)

    logits = jnp.transpose(
        logits_pad.reshape(T, B_pad, -1)[:, :B, :L], (1, 0, 2))
    return loss, logits


# ----------------------------------------------------------------------------
# Deterministic parameter init (PyTorch-style uniform(-1/sqrt(H), 1/sqrt(H)))
# ----------------------------------------------------------------------------
def init_params(key, vocab_size, emb_size, hidden_size, num_labels):
    params = {}
    k = 1.0 / jnp.sqrt(jnp.float32(hidden_size))
    keys = iter(jax.random.split(key, 32))

    params["embedding"] = jax.random.normal(
        next(keys), (vocab_size, emb_size), jnp.float32)

    for layer in range(2):
        d_in = emb_size if layer == 0 else 2 * hidden_size
        for direction in ("fwd", "bwd"):
            params[f"lstm_l{layer}_{direction}"] = {
                "w_ih": jax.random.uniform(next(keys), (4 * hidden_size, d_in),
                                           jnp.float32, -k, k),
                "w_hh": jax.random.uniform(next(keys), (4 * hidden_size, hidden_size),
                                           jnp.float32, -k, k),
                "b_ih": jax.random.uniform(next(keys), (4 * hidden_size,),
                                           jnp.float32, -k, k),
                "b_hh": jax.random.uniform(next(keys), (4 * hidden_size,),
                                           jnp.float32, -k, k),
            }

    params["ln_gamma"] = jnp.ones((2 * hidden_size,), jnp.float32)
    params["ln_beta"] = jnp.zeros((2 * hidden_size,), jnp.float32)
    kc = 1.0 / jnp.sqrt(jnp.float32(2 * hidden_size))
    params["cls_w"] = jax.random.uniform(
        next(keys), (num_labels, 2 * hidden_size), jnp.float32, -kc, kc)
    params["cls_b"] = jax.random.uniform(
        next(keys), (num_labels,), jnp.float32, -kc, kc)
    return params


if __name__ == "__main__":
    VOCAB, EMB, HID, NUM_LABELS = 50, 32, 32, 9
    B, T = 2, 8

    key = jax.random.PRNGKey(0)
    k_param, k_ids, k_lab = jax.random.split(key, 3)

    params = init_params(k_param, VOCAB, EMB, HID, NUM_LABELS)

    input_ids = jax.random.randint(k_ids, (B, T), 1, VOCAB, dtype=jnp.int32)
    labels = jax.random.randint(k_lab, (B, T), 0, NUM_LABELS, dtype=jnp.int32)
    lengths = jnp.array([T, T - 3], dtype=jnp.int32)
    attention_mask = (jnp.arange(T)[None, :] < lengths[:, None]).astype(jnp.int32)

    loss, logits = bilstm_for_ner_forward(params, input_ids, attention_mask, labels)
    jax.block_until_ready((loss, logits))

    assert logits.shape == (B, T, NUM_LABELS)
    assert bool(jnp.isfinite(loss))
    print("KERNEL_OK")
</pallas_src>

<mosaic_0001>
module attributes {stable_mosaic.version = 11 : i64} {
  func.func @bilstm_layer_kernel(%arg0: memref<64x32xf32, #tpu.memory_space<vmem>>, %arg1: memref<64x1xf32, #tpu.memory_space<vmem>>, %arg2: memref<32x256xbf16, #tpu.memory_space<vmem>>, %arg3: memref<1x256xf32, #tpu.memory_space<vmem>>, %arg4: memref<64x256xbf16, #tpu.memory_space<vmem>>, %arg5: memref<64x64xf32, #tpu.memory_space<vmem>>, %arg6: memref<64x256xf32, #tpu.memory_space<vmem>>) attributes {dimension_semantics = [], scalar_prefetch = 0 : i64, scratch_operands = 1 : i64, tpu.core_type = #tpu.core_type<tc>} {
    %c0 = arith.constant 0 : index
    %c0_0 = arith.constant 0 : index
    %0 = vector.load %arg0[%c0, %c0_0] : memref<64x32xf32, #tpu.memory_space<vmem>>, vector<64x32xf32>
    %c0_1 = arith.constant 0 : index
    %c0_2 = arith.constant 0 : index
    %1 = vector.load %arg1[%c0_1, %c0_2] : memref<64x1xf32, #tpu.memory_space<vmem>>, vector<64x1xf32>
    %2 = vector.broadcast %1 : vector<64x1xf32> to vector<64x32xf32>
    %3 = arith.mulf %0, %2 : vector<64x32xf32>
    %4 = arith.truncf %3 : vector<64x32xf32> to vector<64x32xbf16>
    %c0_3 = arith.constant 0 : index
    %c0_4 = arith.constant 0 : index
    %5 = vector.load %arg2[%c0_3, %c0_4] : memref<32x256xbf16, #tpu.memory_space<vmem>>, vector<32x256xbf16>
    %cst = arith.constant dense<0.000000e+00> : vector<64x256xf32>
    %6 = tpu.matmul %4, %5, %cst {dimension_numbers = #tpu.dot_dimension_numbers<[1], [0], [0], [1], [0, 0, 1, 1], [], []>} : vector<64x32xbf16>, vector<32x256xbf16>, vector<64x256xf32> -> vector<64x256xf32>
    %c0_5 = arith.constant 0 : index
    %c0_6 = arith.constant 0 : index
    %7 = vector.load %arg3[%c0_5, %c0_6] : memref<1x256xf32, #tpu.memory_space<vmem>>, vector<1x256xf32>
    %8 = vector.broadcast %7 : vector<1x256xf32> to vector<64x256xf32>
    %9 = arith.addf %6, %8 : vector<64x256xf32>
    %c0_7 = arith.constant 0 : index
    %c0_8 = arith.constant 0 : index
    %10 = vector.load %arg6[%c0_7, %c0_8] : memref<64x256xf32, #tpu.memory_space<vmem>>, vector<64x256xf32>
    tpu.vector_store %arg6[%c0_7, %c0_8], %9 {strides = array<i32>} : memref<64x256xf32, #tpu.memory_space<vmem>>, vector<64x256xf32>,
    %c0_9 = arith.constant 0 : index
    %c0_10 = arith.constant 0 : index
    %11 = vector.load %arg4[%c0_9, %c0_10] : memref<64x256xbf16, #tpu.memory_space<vmem>>, vector<64x256xbf16>
    %cst_11 = arith.constant 0.000000e+00 : f32
    %12 = vector.broadcast %cst_11 : f32 to vector<8x32xf32>
    %c0_i32 = arith.constant 0 : i32
    %c8_i32 = arith.constant 8 : i32
    %13 = arith.muli %c0_i32, %c8_i32 : i32
    %14 = tpu.assume_multiple %13, 8 : i32
    %c7_i32 = arith.constant 7 : i32
    %15 = arith.subi %c7_i32, %c0_i32 : i32
    %c8_i32_12 = arith.constant 8 : i32
    %16 = arith.muli %15, %c8_i32_12 : i32
    %17 = tpu.assume_multiple %16, 8 : i32
    %18 = tpu.concatenate %12, %12 in 1 : vector<8x32xf32>, vector<8x32xf32> -> vector<8x64xf32>
    %19 = arith.truncf %18 : vector<8x64xf32> to vector<8x64xbf16>
    %cst_13 = arith.constant dense<0.000000e+00> : vector<8x256xf32>
    %20 = tpu.matmul %19, %11, %cst_13 {dimension_numbers = #tpu.dot_dimension_numbers<[1], [0], [0], [1], [0, 0, 1, 1], [], []>} : vector<8x64xbf16>, vector<64x256xbf16>, vector<8x256xf32> -> vector<8x256xf32>
    %21 = arith.index_cast %14 : i32 to index
    %c0_14 = arith.constant 0 : index
    %22 = vector.load %arg6[%21, %c0_14] : memref<64x256xf32, #tpu.memory_space<vmem>>, vector<8x128xf32>
    %23 = vector.extract_strided_slice %20 {offsets = [0, 0], sizes = [8, 128], strides = [1, 1]} : vector<8x256xf32> to vector<8x128xf32>
    %24 = arith.addf %22, %23 : vector<8x128xf32>
    %25 = arith.index_cast %17 : i32 to index
    %c128 = arith.constant 128 : index
    %26 = vector.load %arg6[%25, %c128] : memref<64x256xf32, #tpu.memory_space<vmem>>, vector<8x128xf32>
    %27 = vector.extract_strided_slice %20 {offsets = [0, 128], sizes = [8, 128], strides = [1, 1]} : vector<8x256xf32> to vector<8x128xf32>
    %28 = arith.addf %26, %27 : vector<8x128xf32>
    %29 = vector.extract_strided_slice %24 {offsets = [0, 0], sizes = [8, 96], strides = [1, 1]} : vector<8x128xf32> to vector<8x96xf32>
    %30 = arith.negf %29 : vector<8x96xf32>
    %31 = math.exp %30 : vector<8x96xf32>
    %cst_15 = arith.constant 1.000000e+00 : f32
    %32 = vector.broadcast %cst_15 : f32 to vector<8x96xf32>
    %33 = arith.addf %32, %31 : vector<8x96xf32>
    %34 = arith.divf %32, %33 : vector<8x96xf32>
    %35 = vector.extract_strided_slice %24 {offsets = [0, 96], sizes = [8, 32], strides = [1, 1]} : vector<8x128xf32> to vector<8x32xf32>
    %36 = math.tanh %35 : vector<8x32xf32>
    %37 = vector.extract_strided_slice %34 {offsets = [0, 0], sizes = [8, 32], strides = [1, 1]} : vector<8x96xf32> to vector<8x32xf32>
    %38 = vector.extract_strided_slice %34 {offsets = [0, 32], sizes = [8, 32], strides = [1, 1]} : vector<8x96xf32> to vector<8x32xf32>
    %39 = vector.extract_strided_slice %34 {offsets = [0, 64], sizes = [8, 32], strides = [1, 1]} : vector<8x96xf32> to vector<8x32xf32>
    %40 = arith.mulf %38, %12 : vector<8x32xf32>
    %41 = arith.mulf %37, %36 : vector<8x32xf32>
    %42 = arith.addf %40, %41 : vector<8x32xf32>
    %43 = math.tanh %42 : vector<8x32xf32>
    %44 = arith.mulf %39, %43 : vector<8x32xf32>
    %45 = vector.extract_strided_slice %28 {offsets = [0, 0], sizes = [8, 96], strides = [1, 1]} : vector<8x128xf32> to vector<8x96xf32>
    %46 = arith.negf %45 : vector<8x96xf32>
    %47 = math.exp %46 : vector<8x96xf32>
    %cst_16 = arith.constant 1.000000e+00 : f32
    %48 = vector.broadcast %cst_16 : f32 to vector<8x96xf32>
    %49 = arith.addf %48, %47 : vector<8x96xf32>
    %50 = arith.divf %48, %49 : vector<8x96xf32>
    %51 = vector.extract_strided_slice %28 {offsets = [0, 96], sizes = [8, 32], strides = [1, 1]} : vector<8x128xf32> to vector<8x32xf32>
    %52 = math.tanh %51 : vector<8x32xf32>
    %53 = vector.extract_strided_slice %50 {offsets = [0, 0], sizes = [8, 32], strides = [1, 1]} : vector<8x96xf32> to vector<8x32xf32>
    %54 = vector.extract_strided_slice %50 {offsets = [0, 32], sizes = [8, 32], strides = [1, 1]} : vector<8x96xf32> to vector<8x32xf32>
    %55 = vector.extract_strided_slice %50 {offsets = [0, 64], sizes = [8, 32], strides = [1, 1]} : vector<8x96xf32> to vector<8x32xf32>
    %56 = arith.mulf %54, %12 : vector<8x32xf32>
    %57 = arith.mulf %53, %52 : vector<8x32xf32>
    %58 = arith.addf %56, %57 : vector<8x32xf32>
    %59 = math.tanh %58 : vector<8x32xf32>
    %60 = arith.mulf %55, %59 : vector<8x32xf32>
    %61 = arith.index_cast %14 : i32 to index
    %c0_17 = arith.constant 0 : index
    %62 = vector.load %arg5[%61, %c0_17] : memref<64x64xf32, #tpu.memory_space<vmem>>, vector<8x32xf32>
    tpu.vector_store %arg5[%61, %c0_17], %44 {strides = array<i32>} : memref<64x64xf32, #tpu.memory_space<vmem>>, vector<8x32xf32>,
    %63 = arith.index_cast %17 : i32 to index
    %c32 = arith.constant 32 : index
    %64 = vector.load %arg5[%63, %c32] : memref<64x64xf32, #tpu.memory_space<vmem>>, vector<8x32xf32>
    tpu.vector_store %arg5[%63, %c32], %60 {strides = array<i32>} : memref<64x64xf32, #tpu.memory_space<vmem>>, vector<8x32xf32>,
    %c1_i32 = arith.constant 1 : i32
    %c8_i32_18 = arith.constant 8 : i32
    %65 = arith.muli %c1_i32, %c8_i32_18 : i32
    %66 = tpu.assume_multiple %65, 8 : i32
    %c7_i32_19 = arith.constant 7 : i32
    %67 = arith.subi %c7_i32_19, %c1_i32 : i32
    %c8_i32_20 = arith.constant 8 : i32
    %68 = arith.muli %67, %c8_i32_20 : i32
    %69 = tpu.assume_multiple %68, 8 : i32
    %70 = tpu.concatenate %44, %60 in 1 : vector<8x32xf32>, vector<8x32xf32> -> vector<8x64xf32>
    %71 = arith.truncf %70 : vector<8x64xf32> to vector<8x64xbf16>
    %cst_21 = arith.constant dense<0.000000e+00> : vector<8x256xf32>
    %72 = tpu.matmul %71, %11, %cst_21 {dimension_numbers = #tpu.dot_dimension_numbers<[1], [0], [0], [1], [0, 0, 1, 1], [], []>} : vector<8x64xbf16>, vector<64x256xbf16>, vector<8x256xf32> -> vector<8x256xf32>
    %73 = arith.index_cast %66 : i32 to index
    %c0_22 = arith.constant 0 : index
    %74 = vector.load %arg6[%73, %c0_22] : memref<64x256xf32, #tpu.memory_space<vmem>>, vector<8x128xf32>
    %75 = vector.extract_strided_slice %72 {offsets = [0, 0], sizes = [8, 128], strides = [1, 1]} : vector<8x256xf32> to vector<8x128xf32>
    %76 = arith.addf %74, %75 : vector<8x128xf32>
    %77 = arith.index_cast %69 : i32 to index
    %c128_23 = arith.constant 128 : index
    %78 = vector.load %arg6[%77, %c128_23] : memref<64x256xf32, #tpu.memory_space<vmem>>, vector<8x128xf32>
    %79 = vector.extract_strided_slice %72 {offsets = [0, 128], sizes = [8, 128], strides = [1, 1]} : vector<8x256xf32> to vector<8x128xf32>
    %80 = arith.addf %78, %79 : vector<8x128xf32>
    %81 = vector.extract_strided_slice %76 {offsets = [0, 0], sizes = [8, 96], strides = [1, 1]} : vector<8x128xf32> to vector<8x96xf32>
    %82 = arith.negf %81 : vector<8x96xf32>
    %83 = math.exp %82 : vector<8x96xf32>
    %cst_24 = arith.constant 1.000000e+00 : f32
    %84 = vector.broadcast %cst_24 : f32 to vector<8x96xf32>
    %85 = arith.addf %84, %83 : vector<8x96xf32>
    %86 = arith.divf %84, %85 : vector<8x96xf32>
    %87 = vector.extract_strided_slice %76 {offsets = [0, 96], sizes = [8, 32], strides = [1, 1]} : vector<8x128xf32> to vector<8x32xf32>
    %88 = math.tanh %87 : vector<8x32xf32>
    %89 = vector.extract_strided_slice %86 {offsets = [0, 0], sizes = [8, 32], strides = [1, 1]} : vector<8x96xf32> to vector<8x32xf32>
    %90 = vector.extract_strided_slice %86 {offsets = [0, 32], sizes = [8, 32], strides = [1, 1]} : vector<8x96xf32> to vector<8x32xf32>
    %91 = vector.extract_strided_slice %86 {offsets = [0, 64], sizes = [8, 32], strides = [1, 1]} : vector<8x96xf32> to vector<8x32xf32>
    %92 = arith.mulf %90, %42 : vector<8x32xf32>
    %93 = arith.mulf %89, %88 : vector<8x32xf32>
    %94 = arith.addf %92, %93 : vector<8x32xf32>
    %95 = math.tanh %94 : vector<8x32xf32>
    %96 = arith.mulf %91, %95 : vector<8x32xf32>
    %97 = vector.extract_strided_slice %80 {offsets = [0, 0], sizes = [8, 96], strides = [1, 1]} : vector<8x128xf32> to vector<8x96xf32>
    %98 = arith.negf %97 : vector<8x96xf32>
    %99 = math.exp %98 : vector<8x96xf32>
    %cst_25 = arith.constant 1.000000e+00 : f32
    %100 = vector.broadcast %cst_25 : f32 to vector<8x96xf32>
    %101 = arith.addf %100, %99 : vector<8x96xf32>
    %102 = arith.divf %100, %101 : vector<8x96xf32>
    %103 = vector.extract_strided_slice %80 {offsets = [0, 96], sizes = [8, 32], strides = [1, 1]} : vector<8x128xf32> to vector<8x32xf32>
    %104 = math.tanh %103 : vector<8x32xf32>
    %105 = vector.extract_strided_slice %102 {offsets = [0, 0], sizes = [8, 32], strides = [1, 1]} : vector<8x96xf32> to vector<8x32xf32>
    %106 = vector.extract_strided_slice %102 {offsets = [0, 32], sizes = [8, 32], strides = [1, 1]} : vector<8x96xf32> to vector<8x32xf32>
    %107 = vector.extract_strided_slice %102 {offsets = [0, 64], sizes = [8, 32], strides = [1, 1]} : vector<8x96xf32> to vector<8x32xf32>
    %108 = arith.mulf %106, %58 : vector<8x32xf32>
    %109 = arith.mulf %105, %104 : vector<8x32xf32>
    %110 = arith.addf %108, %109 : vector<8x32xf32>
    %111 = math.tanh %110 : vector<8x32xf32>
    %112 = arith.mulf %107, %111 : vector<8x32xf32>
    %113 = arith.index_cast %66 : i32 to index
    %c0_26 = arith.constant 0 : index
    %114 = vector.load %arg5[%113, %c0_26] : memref<64x64xf32, #tpu.memory_space<vmem>>, vector<8x32xf32>
    tpu.vector_store %arg5[%113, %c0_26], %96 {strides = array<i32>} : memref<64x64xf32, #tpu.memory_space<vmem>>, vector<8x32xf32>,
    %115 = arith.index_cast %69 : i32 to index
    %c32_27 = arith.constant 32 : index
    %116 = vector.load %arg5[%115, %c32_27] : memref<64x64xf32, #tpu.memory_space<vmem>>, vector<8x32xf32>
    tpu.vector_store %arg5[%115, %c32_27], %112 {strides = array<i32>} : memref<64x64xf32, #tpu.memory_space<vmem>>, vector<8x32xf32>,
    %c2_i32 = arith.constant 2 : i32
    %c8_i32_28 = arith.constant 8 : i32
    %117 = arith.muli %c2_i32, %c8_i32_28 : i32
    %118 = tpu.assume_multiple %117, 8 : i32
    %c7_i32_29 = arith.constant 7 : i32
    %119 = arith.subi %c7_i32_29, %c2_i32 : i32
    %c8_i32_30 = arith.constant 8 : i32
    %120 = arith.muli %119, %c8_i32_30 : i32
    %121 = tpu.assume_multiple %120, 8 : i32
    %122 = tpu.concatenate %96, %112 in 1 : vector<8x32xf32>, vector<8x32xf32> -> vector<8x64xf32>
    %123 = arith.truncf %122 : vector<8x64xf32> to vector<8x64xbf16>
    %cst_31 = arith.constant dense<0.000000e+00> : vector<8x256xf32>
    %124 = tpu.matmul %123, %11, %cst_31 {dimension_numbers = #tpu.dot_dimension_numbers<[1], [0], [0], [1], [0, 0, 1, 1], [], []>} : vector<8x64xbf16>, vector<64x256xbf16>, vector<8x256xf32> -> vector<8x256xf32>
    %125 = arith.index_cast %118 : i32 to index
    %c0_32 = arith.constant 0 : index
    %126 = vector.load %arg6[%125, %c0_32] : memref<64x256xf32, #tpu.memory_space<vmem>>, vector<8x128xf32>
    %127 = vector.extract_strided_slice %124 {offsets = [0, 0], sizes = [8, 128], strides = [1, 1]} : vector<8x256xf32> to vector<8x128xf32>
    %128 = arith.addf %126, %127 : vector<8x128xf32>
    %129 = arith.index_cast %121 : i32 to index
    %c128_33 = arith.constant 128 : index
    %130 = vector.load %arg6[%129, %c128_33] : memref<64x256xf32, #tpu.memory_space<vmem>>, vector<8x128xf32>
    %131 = vector.extract_strided_slice %124 {offsets = [0, 128], sizes = [8, 128], strides = [1, 1]} : vector<8x256xf32> to vector<8x128xf32>
    %132 = arith.addf %130, %131 : vector<8x128xf32>
    %133 = vector.extract_strided_slice %128 {offsets = [0, 0], sizes = [8, 96], strides = [1, 1]} : vector<8x128xf32> to vector<8x96xf32>
    %134 = arith.negf %133 : vector<8x96xf32>
    %135 = math.exp %134 : vector<8x96xf32>
    %cst_34 = arith.constant 1.000000e+00 : f32
    %136 = vector.broadcast %cst_34 : f32 to vector<8x96xf32>
    %137 = arith.addf %136, %135 : vector<8x96xf32>
    %138 = arith.divf %136, %137 : vector<8x96xf32>
    %139 = vector.extract_strided_slice %128 {offsets = [0, 96], sizes = [8, 32], strides = [1, 1]} : vector<8x128xf32> to vector<8x32xf32>
    %140 = math.tanh %139 : vector<8x32xf32>
    %141 = vector.extract_strided_slice %138 {offsets = [0, 0], sizes = [8, 32], strides = [1, 1]} : vector<8x96xf32> to vector<8x32xf32>
    %142 = vector.extract_strided_slice %138 {offsets = [0, 32], sizes = [8, 32], strides = [1, 1]} : vector<8x96xf32> to vector<8x32xf32>
    %143 = vector.extract_strided_slice %138 {offsets = [0, 64], sizes = [8, 32], strides = [1, 1]} : vector<8x96xf32> to vector<8x32xf32>
    %144 = arith.mulf %142, %94 : vector<8x32xf32>
    %145 = arith.mulf %141, %140 : vector<8x32xf32>
    %146 = arith.addf %144, %145 : vector<8x32xf32>
    %147 = math.tanh %146 : vector<8x32xf32>
    %148 = arith.mulf %143, %147 : vector<8x32xf32>
    %149 = vector.extract_strided_slice %132 {offsets = [0, 0], sizes = [8, 96], strides = [1, 1]} : vector<8x128xf32> to vector<8x96xf32>
    %150 = arith.negf %149 : vector<8x96xf32>
    %151 = math.exp %150 : vector<8x96xf32>
    %cst_35 = arith.constant 1.000000e+00 : f32
    %152 = vector.broadcast %cst_35 : f32 to vector<8x96xf32>
    %153 = arith.addf %152, %151 : vector<8x96xf32>
    %154 = arith.divf %152, %153 : vector<8x96xf32>
    %155 = vector.extract_strided_slice %132 {offsets = [0, 96], sizes = [8, 32], strides = [1, 1]} : vector<8x128xf32> to vector<8x32xf32>
    %156 = math.tanh %155 : vector<8x32xf32>
    %157 = vector.extract_strided_slice %154 {offsets = [0, 0], sizes = [8, 32], strides = [1, 1]} : vector<8x96xf32> to vector<8x32xf32>
    %158 = vector.extract_strided_slice %154 {offsets = [0, 32], sizes = [8, 32], strides = [1, 1]} : vector<8x96xf32> to vector<8x32xf32>
    %159 = vector.extract_strided_slice %154 {offsets = [0, 64], sizes = [8, 32], strides = [1, 1]} : vector<8x96xf32> to vector<8x32xf32>
    %160 = arith.mulf %158, %110 : vector<8x32xf32>
    %161 = arith.mulf %157, %156 : vector<8x32xf32>
    %162 = arith.addf %160, %161 : vector<8x32xf32>
    %163 = math.tanh %162 : vector<8x32xf32>
    %164 = arith.mulf %159, %163 : vector<8x32xf32>
    %165 = arith.index_cast %118 : i32 to index
    %c0_36 = arith.constant 0 : index
    %166 = vector.load %arg5[%165, %c0_36] : memref<64x64xf32, #tpu.memory_space<vmem>>, vector<8x32xf32>
    tpu.vector_store %arg5[%165, %c0_36], %148 {strides = array<i32>} : memref<64x64xf32, #tpu.memory_space<vmem>>, vector<8x32xf32>,
    %167 = arith.index_cast %121 : i32 to index
    %c32_37 = arith.constant 32 : index
    %168 = vector.load %arg5[%167, %c32_37] : memref<64x64xf32, #tpu.memory_space<vmem>>, vector<8x32xf32>
    tpu.vector_store %arg5[%167, %c32_37], %164 {strides = array<i32>} : memref<64x64xf32, #tpu.memory_space<vmem>>, vector<8x32xf32>,
    %c3_i32 = arith.constant 3 : i32
    %c8_i32_38 = arith.constant 8 : i32
    %169 = arith.muli %c3_i32, %c8_i32_38 : i32
    %170 = tpu.assume_multiple %169, 8 : i32
    %c7_i32_39 = arith.constant 7 : i32
    %171 = arith.subi %c7_i32_39, %c3_i32 : i32
    %c8_i32_40 = arith.constant 8 : i32
    %172 = arith.muli %171, %c8_i32_40 : i32
    %173 = tpu.assume_multiple %172, 8 : i32
    %174 = tpu.concatenate %148, %164 in 1 : vector<8x32xf32>, vector<8x32xf32> -> vector<8x64xf32>
    %175 = arith.truncf %174 : vector<8x64xf32> to vector<8x64xbf16>
    %cst_41 = arith.constant dense<0.000000e+00> : vector<8x256xf32>
    %176 = tpu.matmul %175, %11, %cst_41 {dimension_numbers = #tpu.dot_dimension_numbers<[1], [0], [0], [1], [0, 0, 1, 1], [], []>} : vector<8x64xbf16>, vector<64x256xbf16>, vector<8x256xf32> -> vector<8x256xf32>
    %177 = arith.index_cast %170 : i32 to index
    %c0_42 = arith.constant 0 : index
    %178 = vector.load %arg6[%177, %c0_42] : memref<64x256xf32, #tpu.memory_space<vmem>>, vector<8x128xf32>
    %179 = vector.extract_strided_slice %176 {offsets = [0, 0], sizes = [8, 128], strides = [1, 1]} : vector<8x256xf32> to vector<8x128xf32>
    %180 = arith.addf %178, %179 : vector<8x128xf32>
    %181 = arith.index_cast %173 : i32 to index
    %c128_43 = arith.constant 128 : index
    %182 = vector.load %arg6[%181, %c128_43] : memref<64x256xf32, #tpu.memory_space<vmem>>, vector<8x128xf32>
    %183 = vector.extract_strided_slice %176 {offsets = [0, 128], sizes = [8, 128], strides = [1, 1]} : vector<8x256xf32> to vector<8x128xf32>
    %184 = arith.addf %182, %183 : vector<8x128xf32>
    %185 = vector.extract_strided_slice %180 {offsets = [0, 0], sizes = [8, 96], strides = [1, 1]} : vector<8x128xf32> to vector<8x96xf32>
    %186 = arith.negf %185 : vector<8x96xf32>
    %187 = math.exp %186 : vector<8x96xf32>
    %cst_44 = arith.constant 1.000000e+00 : f32
    %188 = vector.broadcast %cst_44 : f32 to vector<8x96xf32>
    %189 = arith.addf %188, %187 : vector<8x96xf32>
    %190 = arith.divf %188, %189 : vector<8x96xf32>
    %191 = vector.extract_strided_slice %180 {offsets = [0, 96], sizes = [8, 32], strides = [1, 1]} : vector<8x128xf32> to vector<8x32xf32>
    %192 = math.tanh %191 : vector<8x32xf32>
    %193 = vector.extract_strided_slice %190 {offsets = [0, 0], sizes = [8, 32], strides = [1, 1]} : vector<8x96xf32> to vector<8x32xf32>
    %194 = vector.extract_strided_slice %190 {offsets = [0, 32], sizes = [8, 32], strides = [1, 1]} : vector<8x96xf32> to vector<8x32xf32>
    %195 = vector.extract_strided_slice %190 {offsets = [0, 64], sizes = [8, 32], strides = [1, 1]} : vector<8x96xf32> to vector<8x32xf32>
    %196 = arith.mulf %194, %146 : vector<8x32xf32>
    %197 = arith.mulf %193, %192 : vector<8x32xf32>
    %198 = arith.addf %196, %197 : vector<8x32xf32>
    %199 = math.tanh %198 : vector<8x32xf32>
    %200 = arith.mulf %195, %199 : vector<8x32xf32>
    %201 = vector.extract_strided_slice %184 {offsets = [0, 0], sizes = [8, 96], strides = [1, 1]} : vector<8x128xf32> to vector<8x96xf32>
    %202 = arith.negf %201 : vector<8x96xf32>
    %203 = math.exp %202 : vector<8x96xf32>
    %cst_45 = arith.constant 1.000000e+00 : f32
    %204 = vector.broadcast %cst_45 : f32 to vector<8x96xf32>
    %205 = arith.addf %204, %203 : vector<8x96xf32>
    %206 = arith.divf %204, %205 : vector<8x96xf32>
    %207 = vector.extract_strided_slice %184 {offsets = [0, 96], sizes = [8, 32], strides = [1, 1]} : vector<8x128xf32> to vector<8x32xf32>
    %208 = math.tanh %207 : vector<8x32xf32>
    %209 = vector.extract_strided_slice %206 {offsets = [0, 0], sizes = [8, 32], strides = [1, 1]} : vector<8x96xf32> to vector<8x32xf32>
    %210 = vector.extract_strided_slice %206 {offsets = [0, 32], sizes = [8, 32], strides = [1, 1]} : vector<8x96xf32> to vector<8x32xf32>
    %211 = vector.extract_strided_slice %206 {offsets = [0, 64], sizes = [8, 32], strides = [1, 1]} : vector<8x96xf32> to vector<8x32xf32>
    %212 = arith.mulf %210, %162 : vector<8x32xf32>
    %213 = arith.mulf %209, %208 : vector<8x32xf32>
    %214 = arith.addf %212, %213 : vector<8x32xf32>
    %215 = math.tanh %214 : vector<8x32xf32>
    %216 = arith.mulf %211, %215 : vector<8x32xf32>
    %217 = arith.index_cast %170 : i32 to index
    %c0_46 = arith.constant 0 : index
    %218 = vector.load %arg5[%217, %c0_46] : memref<64x64xf32, #tpu.memory_space<vmem>>, vector<8x32xf32>
    tpu.vector_store %arg5[%217, %c0_46], %200 {strides = array<i32>} : memref<64x64xf32, #tpu.memory_space<vmem>>, vector<8x32xf32>,
    %219 = arith.index_cast %173 : i32 to index
    %c32_47 = arith.constant 32 : index
    %220 = vector.load %arg5[%219, %c32_47] : memref<64x64xf32, #tpu.memory_space<vmem>>, vector<8x32xf32>
    tpu.vector_store %arg5[%219, %c32_47], %216 {strides = array<i32>} : memref<64x64xf32, #tpu.memory_space<vmem>>, vector<8x32xf32>,
    %c4_i32 = arith.constant 4 : i32
    %c8_i32_48 = arith.constant 8 : i32
    %221 = arith.muli %c4_i32, %c8_i32_48 : i32
    %222 = tpu.assume_multiple %221, 8 : i32
    %c7_i32_49 = arith.constant 7 : i32
    %223 = arith.subi %c7_i32_49, %c4_i32 : i32
    %c8_i32_50 = arith.constant 8 : i32
    %224 = arith.muli %223, %c8_i32_50 : i32
    %225 = tpu.assume_multiple %224, 8 : i32
    %226 = tpu.concatenate %200, %216 in 1 : vector<8x32xf32>, vector<8x32xf32> -> vector<8x64xf32>
    %227 = arith.truncf %226 : vector<8x64xf32> to vector<8x64xbf16>
    %cst_51 = arith.constant dense<0.000000e+00> : vector<8x256xf32>
    %228 = tpu.matmul %227, %11, %cst_51 {dimension_numbers = #tpu.dot_dimension_numbers<[1], [0], [0], [1], [0, 0, 1, 1], [], []>} : vector<8x64xbf16>, vector<64x256xbf16>, vector<8x256xf32> -> vector<8x256xf32>
    %229 = arith.index_cast %222 : i32 to index
    %c0_52 = arith.constant 0 : index
    %230 = vector.load %arg6[%229, %c0_52] : memref<64x256xf32, #tpu.memory_space<vmem>>, vector<8x128xf32>
    %231 = vector.extract_strided_slice %228 {offsets = [0, 0], sizes = [8, 128], strides = [1, 1]} : vector<8x256xf32> to vector<8x128xf32>
    %232 = arith.addf %230, %231 : vector<8x128xf32>
    %233 = arith.index_cast %225 : i32 to index
    %c128_53 = arith.constant 128 : index
    %234 = vector.load %arg6[%233, %c128_53] : memref<64x256xf32, #tpu.memory_space<vmem>>, vector<8x128xf32>
    %235 = vector.extract_strided_slice %228 {offsets = [0, 128], sizes = [8, 128], strides = [1, 1]} : vector<8x256xf32> to vector<8x128xf32>
    %236 = arith.addf %234, %235 : vector<8x128xf32>
    %237 = vector.extract_strided_slice %232 {offsets = [0, 0], sizes = [8, 96], strides = [1, 1]} : vector<8x128xf32> to vector<8x96xf32>
    %238 = arith.negf %237 : vector<8x96xf32>
    %239 = math.exp %238 : vector<8x96xf32>
    %cst_54 = arith.constant 1.000000e+00 : f32
    %240 = vector.broadcast %cst_54 : f32 to vector<8x96xf32>
    %241 = arith.addf %240, %239 : vector<8x96xf32>
    %242 = arith.divf %240, %241 : vector<8x96xf32>
    %243 = vector.extract_strided_slice %232 {offsets = [0, 96], sizes = [8, 32], strides = [1, 1]} : vector<8x128xf32> to vector<8x32xf32>
    %244 = math.tanh %243 : vector<8x32xf32>
    %245 = vector.extract_strided_slice %242 {offsets = [0, 0], sizes = [8, 32], strides = [1, 1]} : vector<8x96xf32> to vector<8x32xf32>
    %246 = vector.extract_strided_slice %242 {offsets = [0, 32], sizes = [8, 32], strides = [1, 1]} : vector<8x96xf32> to vector<8x32xf32>
    %247 = vector.extract_strided_slice %242 {offsets = [0, 64], sizes = [8, 32], strides = [1, 1]} : vector<8x96xf32> to vector<8x32xf32>
    %248 = arith.mulf %246, %198 : vector<8x32xf32>
    %249 = arith.mulf %245, %244 : vector<8x32xf32>
    %250 = arith.addf %248, %249 : vector<8x32xf32>
    %251 = math.tanh %250 : vector<8x32xf32>
    %252 = arith.mulf %247, %251 : vector<8x32xf32>
    %253 = vector.extract_strided_slice %236 {offsets = [0, 0], sizes = [8, 96], strides = [1, 1]} : vector<8x128xf32> to vector<8x96xf32>
    %254 = arith.negf %253 : vector<8x96xf32>
    %255 = math.exp %254 : vector<8x96xf32>
    %cst_55 = arith.constant 1.000000e+00 : f32
    %256 = vector.broadcast %cst_55 : f32 to vector<8x96xf32>
    %257 = arith.addf %256, %255 : vector<8x96xf32>
    %258 = arith.divf %256, %257 : vector<8x96xf32>
    %259 = vector.extract_strided_slice %236 {offsets = [0, 96], sizes = [8, 32], strides = [1, 1]} : vector<8x128xf32> to vector<8x32xf32>
    %260 = math.tanh %259 : vector<8x32xf32>
    %261 = vector.extract_strided_slice %258 {offsets = [0, 0], sizes = [8, 32], strides = [1, 1]} : vector<8x96xf32> to vector<8x32xf32>
    %262 = vector.extract_strided_slice %258 {offsets = [0, 32], sizes = [8, 32], strides = [1, 1]} : vector<8x96xf32> to vector<8x32xf32>
    %263 = vector.extract_strided_slice %258 {offsets = [0, 64], sizes = [8, 32], strides = [1, 1]} : vector<8x96xf32> to vector<8x32xf32>
    %264 = arith.mulf %262, %214 : vector<8x32xf32>
    %265 = arith.mulf %261, %260 : vector<8x32xf32>
    %266 = arith.addf %264, %265 : vector<8x32xf32>
    %267 = math.tanh %266 : vector<8x32xf32>
    %268 = arith.mulf %263, %267 : vector<8x32xf32>
    %269 = arith.index_cast %222 : i32 to index
    %c0_56 = arith.constant 0 : index
    %270 = vector.load %arg5[%269, %c0_56] : memref<64x64xf32, #tpu.memory_space<vmem>>, vector<8x32xf32>
    tpu.vector_store %arg5[%269, %c0_56], %252 {strides = array<i32>} : memref<64x64xf32, #tpu.memory_space<vmem>>, vector<8x32xf32>,
    %271 = arith.index_cast %225 : i32 to index
    %c32_57 = arith.constant 32 : index
    %272 = vector.load %arg5[%271, %c32_57] : memref<64x64xf32, #tpu.memory_space<vmem>>, vector<8x32xf32>
    tpu.vector_store %arg5[%271, %c32_57], %268 {strides = array<i32>} : memref<64x64xf32, #tpu.memory_space<vmem>>, vector<8x32xf32>,
    %c5_i32 = arith.constant 5 : i32
    %c8_i32_58 = arith.constant 8 : i32
    %273 = arith.muli %c5_i32, %c8_i32_58 : i32
    %274 = tpu.assume_multiple %273, 8 : i32
    %c7_i32_59 = arith.constant 7 : i32
    %275 = arith.subi %c7_i32_59, %c5_i32 : i32
    %c8_i32_60 = arith.constant 8 : i32
    %276 = arith.muli %275, %c8_i32_60 : i32
    %277 = tpu.assume_multiple %276, 8 : i32
    %278 = tpu.concatenate %252, %268 in 1 : vector<8x32xf32>, vector<8x32xf32> -> vector<8x64xf32>
    %279 = arith.truncf %278 : vector<8x64xf32> to vector<8x64xbf16>
    %cst_61 = arith.constant dense<0.000000e+00> : vector<8x256xf32>
    %280 = tpu.matmul %279, %11, %cst_61 {dimension_numbers = #tpu.dot_dimension_numbers<[1], [0], [0], [1], [0, 0, 1, 1], [], []>} : vector<8x64xbf16>, vector<64x256xbf16>, vector<8x256xf32> -> vector<8x256xf32>
    %281 = arith.index_cast %274 : i32 to index
    %c0_62 = arith.constant 0 : index
    %282 = vector.load %arg6[%281, %c0_62] : memref<64x256xf32, #tpu.memory_space<vmem>>, vector<8x128xf32>
    %283 = vector.extract_strided_slice %280 {offsets = [0, 0], sizes = [8, 128], strides = [1, 1]} : vector<8x256xf32> to vector<8x128xf32>
    %284 = arith.addf %282, %283 : vector<8x128xf32>
    %285 = arith.index_cast %277 : i32 to index
    %c128_63 = arith.constant 128 : index
    %286 = vector.load %arg6[%285, %c128_63] : memref<64x256xf32, #tpu.memory_space<vmem>>, vector<8x128xf32>
    %287 = vector.extract_strided_slice %280 {offsets = [0, 128], sizes = [8, 128], strides = [1, 1]} : vector<8x256xf32> to vector<8x128xf32>
    %288 = arith.addf %286, %287 : vector<8x128xf32>
    %289 = vector.extract_strided_slice %284 {offsets = [0, 0], sizes = [8, 96], strides = [1, 1]} : vector<8x128xf32> to vector<8x96xf32>
    %290 = arith.negf %289 : vector<8x96xf32>
    %291 = math.exp %290 : vector<8x96xf32>
    %cst_64 = arith.constant 1.000000e+00 : f32
    %292 = vector.broadcast %cst_64 : f32 to vector<8x96xf32>
    %293 = arith.addf %292, %291 : vector<8x96xf32>
    %294 = arith.divf %292, %293 : vector<8x96xf32>
    %295 = vector.extract_strided_slice %284 {offsets = [0, 96], sizes = [8, 32], strides = [1, 1]} : vector<8x128xf32> to vector<8x32xf32>
    %296 = math.tanh %295 : vector<8x32xf32>
    %297 = vector.extract_strided_slice %294 {offsets = [0, 0], sizes = [8, 32], strides = [1, 1]} : vector<8x96xf32> to vector<8x32xf32>
    %298 = vector.extract_strided_slice %294 {offsets = [0, 32], sizes = [8, 32], strides = [1, 1]} : vector<8x96xf32> to vector<8x32xf32>
    %299 = vector.extract_strided_slice %294 {offsets = [0, 64], sizes = [8, 32], strides = [1, 1]} : vector<8x96xf32> to vector<8x32xf32>
    %300 = arith.mulf %298, %250 : vector<8x32xf32>
    %301 = arith.mulf %297, %296 : vector<8x32xf32>
    %302 = arith.addf %300, %301 : vector<8x32xf32>
    %303 = math.tanh %302 : vector<8x32xf32>
    %304 = arith.mulf %299, %303 : vector<8x32xf32>
    %305 = vector.extract_strided_slice %288 {offsets = [0, 0], sizes = [8, 96], strides = [1, 1]} : vector<8x128xf32> to vector<8x96xf32>
    %306 = arith.negf %305 : vector<8x96xf32>
    %307 = math.exp %306 : vector<8x96xf32>
    %cst_65 = arith.constant 1.000000e+00 : f32
    %308 = vector.broadcast %cst_65 : f32 to vector<8x96xf32>
    %309 = arith.addf %308, %307 : vector<8x96xf32>
    %310 = arith.divf %308, %309 : vector<8x96xf32>
    %311 = vector.extract_strided_slice %288 {offsets = [0, 96], sizes = [8, 32], strides = [1, 1]} : vector<8x128xf32> to vector<8x32xf32>
    %312 = math.tanh %311 : vector<8x32xf32>
    %313 = vector.extract_strided_slice %310 {offsets = [0, 0], sizes = [8, 32], strides = [1, 1]} : vector<8x96xf32> to vector<8x32xf32>
    %314 = vector.extract_strided_slice %310 {offsets = [0, 32], sizes = [8, 32], strides = [1, 1]} : vector<8x96xf32> to vector<8x32xf32>
    %315 = vector.extract_strided_slice %310 {offsets = [0, 64], sizes = [8, 32], strides = [1, 1]} : vector<8x96xf32> to vector<8x32xf32>
    %316 = arith.mulf %314, %266 : vector<8x32xf32>
    %317 = arith.mulf %313, %312 : vector<8x32xf32>
    %318 = arith.addf %316, %317 : vector<8x32xf32>
    %319 = math.tanh %318 : vector<8x32xf32>
    %320 = arith.mulf %315, %319 : vector<8x32xf32>
    %321 = arith.index_cast %274 : i32 to index
    %c0_66 = arith.constant 0 : index
    %322 = vector.load %arg5[%321, %c0_66] : memref<64x64xf32, #tpu.memory_space<vmem>>, vector<8x32xf32>
    tpu.vector_store %arg5[%321, %c0_66], %304 {strides = array<i32>} : memref<64x64xf32, #tpu.memory_space<vmem>>, vector<8x32xf32>,
    %323 = arith.index_cast %277 : i32 to index
    %c32_67 = arith.constant 32 : index
    %324 = vector.load %arg5[%323, %c32_67] : memref<64x64xf32, #tpu.memory_space<vmem>>, vector<8x32xf32>
    tpu.vector_store %arg5[%323, %c32_67], %320 {strides = array<i32>} : memref<64x64xf32, #tpu.memory_space<vmem>>, vector<8x32xf32>,
    %c6_i32 = arith.constant 6 : i32
    %c8_i32_68 = arith.constant 8 : i32
    %325 = arith.muli %c6_i32, %c8_i32_68 : i32
    %326 = tpu.assume_multiple %325, 8 : i32
    %c7_i32_69 = arith.constant 7 : i32
    %327 = arith.subi %c7_i32_69, %c6_i32 : i32
    %c8_i32_70 = arith.constant 8 : i32
    %328 = arith.muli %327, %c8_i32_70 : i32
    %329 = tpu.assume_multiple %328, 8 : i32
    %330 = tpu.concatenate %304, %320 in 1 : vector<8x32xf32>, vector<8x32xf32> -> vector<8x64xf32>
    %331 = arith.truncf %330 : vector<8x64xf32> to vector<8x64xbf16>
    %cst_71 = arith.constant dense<0.000000e+00> : vector<8x256xf32>
    %332 = tpu.matmul %331, %11, %cst_71 {dimension_numbers = #tpu.dot_dimension_numbers<[1], [0], [0], [1], [0, 0, 1, 1], [], []>} : vector<8x64xbf16>, vector<64x256xbf16>, vector<8x256xf32> -> vector<8x256xf32>
    %333 = arith.index_cast %326 : i32 to index
    %c0_72 = arith.constant 0 : index
    %334 = vector.load %arg6[%333, %c0_72] : memref<64x256xf32, #tpu.memory_space<vmem>>, vector<8x128xf32>
    %335 = vector.extract_strided_slice %332 {offsets = [0, 0], sizes = [8, 128], strides = [1, 1]} : vector<8x256xf32> to vector<8x128xf32>
    %336 = arith.addf %334, %335 : vector<8x128xf32>
    %337 = arith.index_cast %329 : i32 to index
    %c128_73 = arith.constant 128 : index
    %338 = vector.load %arg6[%337, %c128_73] : memref<64x256xf32, #tpu.memory_space<vmem>>, vector<8x128xf32>
    %339 = vector.extract_strided_slice %332 {offsets = [0, 128], sizes = [8, 128], strides = [1, 1]} : vector<8x256xf32> to vector<8x128xf32>
    %340 = arith.addf %338, %339 : vector<8x128xf32>
    %341 = vector.extract_strided_slice %336 {offsets = [0, 0], sizes = [8, 96], strides = [1, 1]} : vector<8x128xf32> to vector<8x96xf32>
    %342 = arith.negf %341 : vector<8x96xf32>
    %343 = math.exp %342 : vector<8x96xf32>
    %cst_74 = arith.constant 1.000000e+00 : f32
    %344 = vector.broadcast %cst_74 : f32 to vector<8x96xf32>
    %345 = arith.addf %344, %343 : vector<8x96xf32>
    %346 = arith.divf %344, %345 : vector<8x96xf32>
    %347 = vector.extract_strided_slice %336 {offsets = [0, 96], sizes = [8, 32], strides = [1, 1]} : vector<8x128xf32> to vector<8x32xf32>
    %348 = math.tanh %347 : vector<8x32xf32>
    %349 = vector.extract_strided_slice %346 {offsets = [0, 0], sizes = [8, 32], strides = [1, 1]} : vector<8x96xf32> to vector<8x32xf32>
    %350 = vector.extract_strided_slice %346 {offsets = [0, 32], sizes = [8, 32], strides = [1, 1]} : vector<8x96xf32> to vector<8x32xf32>
    %351 = vector.extract_strided_slice %346 {offsets = [0, 64], sizes = [8, 32], strides = [1, 1]} : vector<8x96xf32> to vector<8x32xf32>
    %352 = arith.mulf %350, %302 : vector<8x32xf32>
    %353 = arith.mulf %349, %348 : vector<8x32xf32>
    %354 = arith.addf %352, %353 : vector<8x32xf32>
    %355 = math.tanh %354 : vector<8x32xf32>
    %356 = arith.mulf %351, %355 : vector<8x32xf32>
    %357 = vector.extract_strided_slice %340 {offsets = [0, 0], sizes = [8, 96], strides = [1, 1]} : vector<8x128xf32> to vector<8x96xf32>
    %358 = arith.negf %357 : vector<8x96xf32>
    %359 = math.exp %358 : vector<8x96xf32>
    %cst_75 = arith.constant 1.000000e+00 : f32
    %360 = vector.broadcast %cst_75 : f32 to vector<8x96xf32>
    %361 = arith.addf %360, %359 : vector<8x96xf32>
    %362 = arith.divf %360, %361 : vector<8x96xf32>
    %363 = vector.extract_strided_slice %340 {offsets = [0, 96], sizes = [8, 32], strides = [1, 1]} : vector<8x128xf32> to vector<8x32xf32>
    %364 = math.tanh %363 : vector<8x32xf32>
    %365 = vector.extract_strided_slice %362 {offsets = [0, 0], sizes = [8, 32], strides = [1, 1]} : vector<8x96xf32> to vector<8x32xf32>
    %366 = vector.extract_strided_slice %362 {offsets = [0, 32], sizes = [8, 32], strides = [1, 1]} : vector<8x96xf32> to vector<8x32xf32>
    %367 = vector.extract_strided_slice %362 {offsets = [0, 64], sizes = [8, 32], strides = [1, 1]} : vector<8x96xf32> to vector<8x32xf32>
    %368 = arith.mulf %366, %318 : vector<8x32xf32>
    %369 = arith.mulf %365, %364 : vector<8x32xf32>
    %370 = arith.addf %368, %369 : vector<8x32xf32>
    %371 = math.tanh %370 : vector<8x32xf32>
    %372 = arith.mulf %367, %371 : vector<8x32xf32>
    %373 = arith.index_cast %326 : i32 to index
    %c0_76 = arith.constant 0 : index
    %374 = vector.load %arg5[%373, %c0_76] : memref<64x64xf32, #tpu.memory_space<vmem>>, vector<8x32xf32>
    tpu.vector_store %arg5[%373, %c0_76], %356 {strides = array<i32>} : memref<64x64xf32, #tpu.memory_space<vmem>>, vector<8x32xf32>,
    %375 = arith.index_cast %329 : i32 to index
    %c32_77 = arith.constant 32 : index
    %376 = vector.load %arg5[%375, %c32_77] : memref<64x64xf32, #tpu.memory_space<vmem>>, vector<8x32xf32>
    tpu.vector_store %arg5[%375, %c32_77], %372 {strides = array<i32>} : memref<64x64xf32, #tpu.memory_space<vmem>>, vector<8x32xf32>,
    %c7_i32_78 = arith.constant 7 : i32
    %c8_i32_79 = arith.constant 8 : i32
    %377 = arith.muli %c7_i32_78, %c8_i32_79 : i32
    %378 = tpu.assume_multiple %377, 8 : i32
    %c7_i32_80 = arith.constant 7 : i32
    %379 = arith.subi %c7_i32_80, %c7_i32_78 : i32
    %c8_i32_81 = arith.constant 8 : i32
    %380 = arith.muli %379, %c8_i32_81 : i32
    %381 = tpu.assume_multiple %380, 8 : i32
    %382 = tpu.concatenate %356, %372 in 1 : vector<8x32xf32>, vector<8x32xf32> -> vector<8x64xf32>
    %383 = arith.truncf %382 : vector<8x64xf32> to vector<8x64xbf16>
    %cst_82 = arith.constant dense<0.000000e+00> : vector<8x256xf32>
    %384 = tpu.matmul %383, %11, %cst_82 {dimension_numbers = #tpu.dot_dimension_numbers<[1], [0], [0], [1], [0, 0, 1, 1], [], []>} : vector<8x64xbf16>, vector<64x256xbf16>, vector<8x256xf32> -> vector<8x256xf32>
    %385 = arith.index_cast %378 : i32 to index
    %c0_83 = arith.constant 0 : index
    %386 = vector.load %arg6[%385, %c0_83] : memref<64x256xf32, #tpu.memory_space<vmem>>, vector<8x128xf32>
    %387 = vector.extract_strided_slice %384 {offsets = [0, 0], sizes = [8, 128], strides = [1, 1]} : vector<8x256xf32> to vector<8x128xf32>
    %388 = arith.addf %386, %387 : vector<8x128xf32>
    %389 = arith.index_cast %381 : i32 to index
    %c128_84 = arith.constant 128 : index
    %390 = vector.load %arg6[%389, %c128_84] : memref<64x256xf32, #tpu.memory_space<vmem>>, vector<8x128xf32>
    %391 = vector.extract_strided_slice %384 {offsets = [0, 128], sizes = [8, 128], strides = [1, 1]} : vector<8x256xf32> to vector<8x128xf32>
    %392 = arith.addf %390, %391 : vector<8x128xf32>
    %393 = vector.extract_strided_slice %388 {offsets = [0, 0], sizes = [8, 96], strides = [1, 1]} : vector<8x128xf32> to vector<8x96xf32>
    %394 = arith.negf %393 : vector<8x96xf32>
    %395 = math.exp %394 : vector<8x96xf32>
    %cst_85 = arith.constant 1.000000e+00 : f32
    %396 = vector.broadcast %cst_85 : f32 to vector<8x96xf32>
    %397 = arith.addf %396, %395 : vector<8x96xf32>
    %398 = arith.divf %396, %397 : vector<8x96xf32>
    %399 = vector.extract_strided_slice %388 {offsets = [0, 96], sizes = [8, 32], strides = [1, 1]} : vector<8x128xf32> to vector<8x32xf32>
    %400 = math.tanh %399 : vector<8x32xf32>
    %401 = vector.extract_strided_slice %398 {offsets = [0, 0], sizes = [8, 32], strides = [1, 1]} : vector<8x96xf32> to vector<8x32xf32>
    %402 = vector.extract_strided_slice %398 {offsets = [0, 32], sizes = [8, 32], strides = [1, 1]} : vector<8x96xf32> to vector<8x32xf32>
    %403 = vector.extract_strided_slice %398 {offsets = [0, 64], sizes = [8, 32], strides = [1, 1]} : vector<8x96xf32> to vector<8x32xf32>
    %404 = arith.mulf %402, %354 : vector<8x32xf32>
    %405 = arith.mulf %401, %400 : vector<8x32xf32>
    %406 = arith.addf %404, %405 : vector<8x32xf32>
    %407 = math.tanh %406 : vector<8x32xf32>
    %408 = arith.mulf %403, %407 : vector<8x32xf32>
    %409 = vector.extract_strided_slice %392 {offsets = [0, 0], sizes = [8, 96], strides = [1, 1]} : vector<8x128xf32> to vector<8x96xf32>
    %410 = arith.negf %409 : vector<8x96xf32>
    %411 = math.exp %410 : vector<8x96xf32>
    %cst_86 = arith.constant 1.000000e+00 : f32
    %412 = vector.broadcast %cst_86 : f32 to vector<8x96xf32>
    %413 = arith.addf %412, %411 : vector<8x96xf32>
    %414 = arith.divf %412, %413 : vector<8x96xf32>
    %415 = vector.extract_strided_slice %392 {offsets = [0, 96], sizes = [8, 32], strides = [1, 1]} : vector<8x128xf32> to vector<8x32xf32>
    %416 = math.tanh %415 : vector<8x32xf32>
    %417 = vector.extract_strided_slice %414 {offsets = [0, 0], sizes = [8, 32], strides = [1, 1]} : vector<8x96xf32> to vector<8x32xf32>
    %418 = vector.extract_strided_slice %414 {offsets = [0, 32], sizes = [8, 32], strides = [1, 1]} : vector<8x96xf32> to vector<8x32xf32>
    %419 = vector.extract_strided_slice %414 {offsets = [0, 64], sizes = [8, 32], strides = [1, 1]} : vector<8x96xf32> to vector<8x32xf32>
    %420 = arith.mulf %418, %370 : vector<8x32xf32>
    %421 = arith.mulf %417, %416 : vector<8x32xf32>
    %422 = arith.addf %420, %421 : vector<8x32xf32>
    %423 = math.tanh %422 : vector<8x32xf32>
    %424 = arith.mulf %419, %423 : vector<8x32xf32>
    %425 = arith.index_cast %378 : i32 to index
    %c0_87 = arith.constant 0 : index
    %426 = vector.load %arg5[%425, %c0_87] : memref<64x64xf32, #tpu.memory_space<vmem>>, vector<8x32xf32>
    tpu.vector_store %arg5[%425, %c0_87], %408 {strides = array<i32>} : memref<64x64xf32, #tpu.memory_space<vmem>>, vector<8x32xf32>,
    %427 = arith.index_cast %381 : i32 to index
    %c32_88 = arith.constant 32 : index
    %428 = vector.load %arg5[%427, %c32_88] : memref<64x64xf32, #tpu.memory_space<vmem>>, vector<8x32xf32>
    tpu.vector_store %arg5[%427, %c32_88], %424 {strides = array<i32>} : memref<64x64xf32, #tpu.memory_space<vmem>>, vector<8x32xf32>,
    %c8_i32_89 = arith.constant 8 : i32
    return
  }
}

module attributes {stable_mosaic.version = 11 : i64} {
  func.func @bilstm_layer_kernel(%arg0: memref<64x64xf32, #tpu.memory_space<vmem>>, %arg1: memref<64x256xbf16, #tpu.memory_space<vmem>>, %arg2: memref<1x256xf32, #tpu.memory_space<vmem>>, %arg3: memref<64x256xbf16, #tpu.memory_space<vmem>>, %arg4: memref<64x64xf32, #tpu.memory_space<vmem>>, %arg5: memref<64x256xf32, #tpu.memory_space<vmem>>) attributes {dimension_semantics = [], scalar_prefetch = 0 : i64, scratch_operands = 1 : i64, tpu.core_type = #tpu.core_type<tc>} {
    %c0 = arith.constant 0 : index
    %c0_0 = arith.constant 0 : index
    %0 = vector.load %arg0[%c0, %c0_0] : memref<64x64xf32, #tpu.memory_space<vmem>>, vector<64x64xf32>
    %1 = arith.truncf %0 : vector<64x64xf32> to vector<64x64xbf16>
    %c0_1 = arith.constant 0 : index
    %c0_2 = arith.constant 0 : index
    %2 = vector.load %arg1[%c0_1, %c0_2] : memref<64x256xbf16, #tpu.memory_space<vmem>>, vector<64x256xbf16>
    %cst = arith.constant dense<0.000000e+00> : vector<64x256xf32>
    %3 = tpu.matmul %1, %2, %cst {dimension_numbers = #tpu.dot_dimension_numbers<[1], [0], [0], [1], [0, 0, 1, 1], [], []>} : vector<64x64xbf16>, vector<64x256xbf16>, vector<64x256xf32> -> vector<64x256xf32>
    %c0_3 = arith.constant 0 : index
    %c0_4 = arith.constant 0 : index
    %4 = vector.load %arg2[%c0_3, %c0_4] : memref<1x256xf32, #tpu.memory_space<vmem>>, vector<1x256xf32>
    %5 = vector.broadcast %4 : vector<1x256xf32> to vector<64x256xf32>
    %6 = arith.addf %3, %5 : vector<64x256xf32>
    %c0_5 = arith.constant 0 : index
    %c0_6 = arith.constant 0 : index
    %7 = vector.load %arg5[%c0_5, %c0_6] : memref<64x256xf32, #tpu.memory_space<vmem>>, vector<64x256xf32>
    tpu.vector_store %arg5[%c0_5, %c0_6], %6 {strides = array<i32>} : memref<64x256xf32, #tpu.memory_space<vmem>>, vector<64x256xf32>,
    %c0_7 = arith.constant 0 : index
    %c0_8 = arith.constant 0 : index
    %8 = vector.load %arg3[%c0_7, %c0_8] : memref<64x256xbf16, #tpu.memory_space<vmem>>, vector<64x256xbf16>
    %cst_9 = arith.constant 0.000000e+00 : f32
    %9 = vector.broadcast %cst_9 : f32 to vector<8x32xf32>
    %c0_i32 = arith.constant 0 : i32
    %c8_i32 = arith.constant 8 : i32
    %10 = arith.muli %c0_i32, %c8_i32 : i32
    %11 = tpu.assume_multiple %10, 8 : i32
    %c7_i32 = arith.constant 7 : i32
    %12 = arith.subi %c7_i32, %c0_i32 : i32
    %c8_i32_10 = arith.constant 8 : i32
    %13 = arith.muli %12, %c8_i32_10 : i32
    %14 = tpu.assume_multiple %13, 8 : i32
    %15 = tpu.concatenate %9, %9 in 1 : vector<8x32xf32>, vector<8x32xf32> -> vector<8x64xf32>
    %16 = arith.truncf %15 : vector<8x64xf32> to vector<8x64xbf16>
    %cst_11 = arith.constant dense<0.000000e+00> : vector<8x256xf32>
    %17 = tpu.matmul %16, %8, %cst_11 {dimension_numbers = #tpu.dot_dimension_numbers<[1], [0], [0], [1], [0, 0, 1, 1], [], []>} : vector<8x64xbf16>, vector<64x256xbf16>, vector<8x256xf32> -> vector<8x256xf32>
    %18 = arith.index_cast %11 : i32 to index
    %c0_12 = arith.constant 0 : index
    %19 = vector.load %arg5[%18, %c0_12] : memref<64x256xf32, #tpu.memory_space<vmem>>, vector<8x128xf32>
    %20 = vector.extract_strided_slice %17 {offsets = [0, 0], sizes = [8, 128], strides = [1, 1]} : vector<8x256xf32> to vector<8x128xf32>
    %21 = arith.addf %19, %20 : vector<8x128xf32>
    %22 = arith.index_cast %14 : i32 to index
    %c128 = arith.constant 128 : index
    %23 = vector.load %arg5[%22, %c128] : memref<64x256xf32, #tpu.memory_space<vmem>>, vector<8x128xf32>
    %24 = vector.extract_strided_slice %17 {offsets = [0, 128], sizes = [8, 128], strides = [1, 1]} : vector<8x256xf32> to vector<8x128xf32>
    %25 = arith.addf %23, %24 : vector<8x128xf32>
    %26 = vector.extract_strided_slice %21 {offsets = [0, 0], sizes = [8, 96], strides = [1, 1]} : vector<8x128xf32> to vector<8x96xf32>
    %27 = arith.negf %26 : vector<8x96xf32>
    %28 = math.exp %27 : vector<8x96xf32>
    %cst_13 = arith.constant 1.000000e+00 : f32
    %29 = vector.broadcast %cst_13 : f32 to vector<8x96xf32>
    %30 = arith.addf %29, %28 : vector<8x96xf32>
    %31 = arith.divf %29, %30 : vector<8x96xf32>
    %32 = vector.extract_strided_slice %21 {offsets = [0, 96], sizes = [8, 32], strides = [1, 1]} : vector<8x128xf32> to vector<8x32xf32>
    %33 = math.tanh %32 : vector<8x32xf32>
    %34 = vector.extract_strided_slice %31 {offsets = [0, 0], sizes = [8, 32], strides = [1, 1]} : vector<8x96xf32> to vector<8x32xf32>
    %35 = vector.extract_strided_slice %31 {offsets = [0, 32], sizes = [8, 32], strides = [1, 1]} : vector<8x96xf32> to vector<8x32xf32>
    %36 = vector.extract_strided_slice %31 {offsets = [0, 64], sizes = [8, 32], strides = [1, 1]} : vector<8x96xf32> to vector<8x32xf32>
    %37 = arith.mulf %35, %9 : vector<8x32xf32>
    %38 = arith.mulf %34, %33 : vector<8x32xf32>
    %39 = arith.addf %37, %38 : vector<8x32xf32>
    %40 = math.tanh %39 : vector<8x32xf32>
    %41 = arith.mulf %36, %40 : vector<8x32xf32>
    %42 = vector.extract_strided_slice %25 {offsets = [0, 0], sizes = [8, 96], strides = [1, 1]} : vector<8x128xf32> to vector<8x96xf32>
    %43 = arith.negf %42 : vector<8x96xf32>
    %44 = math.exp %43 : vector<8x96xf32>
    %cst_14 = arith.constant 1.000000e+00 : f32
    %45 = vector.broadcast %cst_14 : f32 to vector<8x96xf32>
    %46 = arith.addf %45, %44 : vector<8x96xf32>
    %47 = arith.divf %45, %46 : vector<8x96xf32>
    %48 = vector.extract_strided_slice %25 {offsets = [0, 96], sizes = [8, 32], strides = [1, 1]} : vector<8x128xf32> to vector<8x32xf32>
    %49 = math.tanh %48 : vector<8x32xf32>
    %50 = vector.extract_strided_slice %47 {offsets = [0, 0], sizes = [8, 32], strides = [1, 1]} : vector<8x96xf32> to vector<8x32xf32>
    %51 = vector.extract_strided_slice %47 {offsets = [0, 32], sizes = [8, 32], strides = [1, 1]} : vector<8x96xf32> to vector<8x32xf32>
    %52 = vector.extract_strided_slice %47 {offsets = [0, 64], sizes = [8, 32], strides = [1, 1]} : vector<8x96xf32> to vector<8x32xf32>
    %53 = arith.mulf %51, %9 : vector<8x32xf32>
    %54 = arith.mulf %50, %49 : vector<8x32xf32>
    %55 = arith.addf %53, %54 : vector<8x32xf32>
    %56 = math.tanh %55 : vector<8x32xf32>
    %57 = arith.mulf %52, %56 : vector<8x32xf32>
    %58 = arith.index_cast %11 : i32 to index
    %c0_15 = arith.constant 0 : index
    %59 = vector.load %arg4[%58, %c0_15] : memref<64x64xf32, #tpu.memory_space<vmem>>, vector<8x32xf32>
    tpu.vector_store %arg4[%58, %c0_15], %41 {strides = array<i32>} : memref<64x64xf32, #tpu.memory_space<vmem>>, vector<8x32xf32>,
    %60 = arith.index_cast %14 : i32 to index
    %c32 = arith.constant 32 : index
    %61 = vector.load %arg4[%60, %c32] : memref<64x64xf32, #tpu.memory_space<vmem>>, vector<8x32xf32>
    tpu.vector_store %arg4[%60, %c32], %57 {strides = array<i32>} : memref<64x64xf32, #tpu.memory_space<vmem>>, vector<8x32xf32>,
    %c1_i32 = arith.constant 1 : i32
    %c8_i32_16 = arith.constant 8 : i32
    %62 = arith.muli %c1_i32, %c8_i32_16 : i32
    %63 = tpu.assume_multiple %62, 8 : i32
    %c7_i32_17 = arith.constant 7 : i32
    %64 = arith.subi %c7_i32_17, %c1_i32 : i32
    %c8_i32_18 = arith.constant 8 : i32
    %65 = arith.muli %64, %c8_i32_18 : i32
    %66 = tpu.assume_multiple %65, 8 : i32
    %67 = tpu.concatenate %41, %57 in 1 : vector<8x32xf32>, vector<8x32xf32> -> vector<8x64xf32>
    %68 = arith.truncf %67 : vector<8x64xf32> to vector<8x64xbf16>
    %cst_19 = arith.constant dense<0.000000e+00> : vector<8x256xf32>
    %69 = tpu.matmul %68, %8, %cst_19 {dimension_numbers = #tpu.dot_dimension_numbers<[1], [0], [0], [1], [0, 0, 1, 1], [], []>} : vector<8x64xbf16>, vector<64x256xbf16>, vector<8x256xf32> -> vector<8x256xf32>
    %70 = arith.index_cast %63 : i32 to index
    %c0_20 = arith.constant 0 : index
    %71 = vector.load %arg5[%70, %c0_20] : memref<64x256xf32, #tpu.memory_space<vmem>>, vector<8x128xf32>
    %72 = vector.extract_strided_slice %69 {offsets = [0, 0], sizes = [8, 128], strides = [1, 1]} : vector<8x256xf32> to vector<8x128xf32>
    %73 = arith.addf %71, %72 : vector<8x128xf32>
    %74 = arith.index_cast %66 : i32 to index
    %c128_21 = arith.constant 128 : index
    %75 = vector.load %arg5[%74, %c128_21] : memref<64x256xf32, #tpu.memory_space<vmem>>, vector<8x128xf32>
    %76 = vector.extract_strided_slice %69 {offsets = [0, 128], sizes = [8, 128], strides = [1, 1]} : vector<8x256xf32> to vector<8x128xf32>
    %77 = arith.addf %75, %76 : vector<8x128xf32>
    %78 = vector.extract_strided_slice %73 {offsets = [0, 0], sizes = [8, 96], strides = [1, 1]} : vector<8x128xf32> to vector<8x96xf32>
    %79 = arith.negf %78 : vector<8x96xf32>
    %80 = math.exp %79 : vector<8x96xf32>
    %cst_22 = arith.constant 1.000000e+00 : f32
    %81 = vector.broadcast %cst_22 : f32 to vector<8x96xf32>
    %82 = arith.addf %81, %80 : vector<8x96xf32>
    %83 = arith.divf %81, %82 : vector<8x96xf32>
    %84 = vector.extract_strided_slice %73 {offsets = [0, 96], sizes = [8, 32], strides = [1, 1]} : vector<8x128xf32> to vector<8x32xf32>
    %85 = math.tanh %84 : vector<8x32xf32>
    %86 = vector.extract_strided_slice %83 {offsets = [0, 0], sizes = [8, 32], strides = [1, 1]} : vector<8x96xf32> to vector<8x32xf32>
    %87 = vector.extract_strided_slice %83 {offsets = [0, 32], sizes = [8, 32], strides = [1, 1]} : vector<8x96xf32> to vector<8x32xf32>
    %88 = vector.extract_strided_slice %83 {offsets = [0, 64], sizes = [8, 32], strides = [1, 1]} : vector<8x96xf32> to vector<8x32xf32>
    %89 = arith.mulf %87, %39 : vector<8x32xf32>
    %90 = arith.mulf %86, %85 : vector<8x32xf32>
    %91 = arith.addf %89, %90 : vector<8x32xf32>
    %92 = math.tanh %91 : vector<8x32xf32>
    %93 = arith.mulf %88, %92 : vector<8x32xf32>
    %94 = vector.extract_strided_slice %77 {offsets = [0, 0], sizes = [8, 96], strides = [1, 1]} : vector<8x128xf32> to vector<8x96xf32>
    %95 = arith.negf %94 : vector<8x96xf32>
    %96 = math.exp %95 : vector<8x96xf32>
    %cst_23 = arith.constant 1.000000e+00 : f32
    %97 = vector.broadcast %cst_23 : f32 to vector<8x96xf32>
    %98 = arith.addf %97, %96 : vector<8x96xf32>
    %99 = arith.divf %97, %98 : vector<8x96xf32>
    %100 = vector.extract_strided_slice %77 {offsets = [0, 96], sizes = [8, 32], strides = [1, 1]} : vector<8x128xf32> to vector<8x32xf32>
    %101 = math.tanh %100 : vector<8x32xf32>
    %102 = vector.extract_strided_slice %99 {offsets = [0, 0], sizes = [8, 32], strides = [1, 1]} : vector<8x96xf32> to vector<8x32xf32>
    %103 = vector.extract_strided_slice %99 {offsets = [0, 32], sizes = [8, 32], strides = [1, 1]} : vector<8x96xf32> to vector<8x32xf32>
    %104 = vector.extract_strided_slice %99 {offsets = [0, 64], sizes = [8, 32], strides = [1, 1]} : vector<8x96xf32> to vector<8x32xf32>
    %105 = arith.mulf %103, %55 : vector<8x32xf32>
    %106 = arith.mulf %102, %101 : vector<8x32xf32>
    %107 = arith.addf %105, %106 : vector<8x32xf32>
    %108 = math.tanh %107 : vector<8x32xf32>
    %109 = arith.mulf %104, %108 : vector<8x32xf32>
    %110 = arith.index_cast %63 : i32 to index
    %c0_24 = arith.constant 0 : index
    %111 = vector.load %arg4[%110, %c0_24] : memref<64x64xf32, #tpu.memory_space<vmem>>, vector<8x32xf32>
    tpu.vector_store %arg4[%110, %c0_24], %93 {strides = array<i32>} : memref<64x64xf32, #tpu.memory_space<vmem>>, vector<8x32xf32>,
    %112 = arith.index_cast %66 : i32 to index
    %c32_25 = arith.constant 32 : index
    %113 = vector.load %arg4[%112, %c32_25] : memref<64x64xf32, #tpu.memory_space<vmem>>, vector<8x32xf32>
    tpu.vector_store %arg4[%112, %c32_25], %109 {strides = array<i32>} : memref<64x64xf32, #tpu.memory_space<vmem>>, vector<8x32xf32>,
    %c2_i32 = arith.constant 2 : i32
    %c8_i32_26 = arith.constant 8 : i32
    %114 = arith.muli %c2_i32, %c8_i32_26 : i32
    %115 = tpu.assume_multiple %114, 8 : i32
    %c7_i32_27 = arith.constant 7 : i32
    %116 = arith.subi %c7_i32_27, %c2_i32 : i32
    %c8_i32_28 = arith.constant 8 : i32
    %117 = arith.muli %116, %c8_i32_28 : i32
    %118 = tpu.assume_multiple %117, 8 : i32
    %119 = tpu.concatenate %93, %109 in 1 : vector<8x32xf32>, vector<8x32xf32> -> vector<8x64xf32>
    %120 = arith.truncf %119 : vector<8x64xf32> to vector<8x64xbf16>
    %cst_29 = arith.constant dense<0.000000e+00> : vector<8x256xf32>
    %121 = tpu.matmul %120, %8, %cst_29 {dimension_numbers = #tpu.dot_dimension_numbers<[1], [0], [0], [1], [0, 0, 1, 1], [], []>} : vector<8x64xbf16>, vector<64x256xbf16>, vector<8x256xf32> -> vector<8x256xf32>
    %122 = arith.index_cast %115 : i32 to index
    %c0_30 = arith.constant 0 : index
    %123 = vector.load %arg5[%122, %c0_30] : memref<64x256xf32, #tpu.memory_space<vmem>>, vector<8x128xf32>
    %124 = vector.extract_strided_slice %121 {offsets = [0, 0], sizes = [8, 128], strides = [1, 1]} : vector<8x256xf32> to vector<8x128xf32>
    %125 = arith.addf %123, %124 : vector<8x128xf32>
    %126 = arith.index_cast %118 : i32 to index
    %c128_31 = arith.constant 128 : index
    %127 = vector.load %arg5[%126, %c128_31] : memref<64x256xf32, #tpu.memory_space<vmem>>, vector<8x128xf32>
    %128 = vector.extract_strided_slice %121 {offsets = [0, 128], sizes = [8, 128], strides = [1, 1]} : vector<8x256xf32> to vector<8x128xf32>
    %129 = arith.addf %127, %128 : vector<8x128xf32>
    %130 = vector.extract_strided_slice %125 {offsets = [0, 0], sizes = [8, 96], strides = [1, 1]} : vector<8x128xf32> to vector<8x96xf32>
    %131 = arith.negf %130 : vector<8x96xf32>
    %132 = math.exp %131 : vector<8x96xf32>
    %cst_32 = arith.constant 1.000000e+00 : f32
    %133 = vector.broadcast %cst_32 : f32 to vector<8x96xf32>
    %134 = arith.addf %133, %132 : vector<8x96xf32>
    %135 = arith.divf %133, %134 : vector<8x96xf32>
    %136 = vector.extract_strided_slice %125 {offsets = [0, 96], sizes = [8, 32], strides = [1, 1]} : vector<8x128xf32> to vector<8x32xf32>
    %137 = math.tanh %136 : vector<8x32xf32>
    %138 = vector.extract_strided_slice %135 {offsets = [0, 0], sizes = [8, 32], strides = [1, 1]} : vector<8x96xf32> to vector<8x32xf32>
    %139 = vector.extract_strided_slice %135 {offsets = [0, 32], sizes = [8, 32], strides = [1, 1]} : vector<8x96xf32> to vector<8x32xf32>
    %140 = vector.extract_strided_slice %135 {offsets = [0, 64], sizes = [8, 32], strides = [1, 1]} : vector<8x96xf32> to vector<8x32xf32>
    %141 = arith.mulf %139, %91 : vector<8x32xf32>
    %142 = arith.mulf %138, %137 : vector<8x32xf32>
    %143 = arith.addf %141, %142 : vector<8x32xf32>
    %144 = math.tanh %143 : vector<8x32xf32>
    %145 = arith.mulf %140, %144 : vector<8x32xf32>
    %146 = vector.extract_strided_slice %129 {offsets = [0, 0], sizes = [8, 96], strides = [1, 1]} : vector<8x128xf32> to vector<8x96xf32>
    %147 = arith.negf %146 : vector<8x96xf32>
    %148 = math.exp %147 : vector<8x96xf32>
    %cst_33 = arith.constant 1.000000e+00 : f32
    %149 = vector.broadcast %cst_33 : f32 to vector<8x96xf32>
    %150 = arith.addf %149, %148 : vector<8x96xf32>
    %151 = arith.divf %149, %150 : vector<8x96xf32>
    %152 = vector.extract_strided_slice %129 {offsets = [0, 96], sizes = [8, 32], strides = [1, 1]} : vector<8x128xf32> to vector<8x32xf32>
    %153 = math.tanh %152 : vector<8x32xf32>
    %154 = vector.extract_strided_slice %151 {offsets = [0, 0], sizes = [8, 32], strides = [1, 1]} : vector<8x96xf32> to vector<8x32xf32>
    %155 = vector.extract_strided_slice %151 {offsets = [0, 32], sizes = [8, 32], strides = [1, 1]} : vector<8x96xf32> to vector<8x32xf32>
    %156 = vector.extract_strided_slice %151 {offsets = [0, 64], sizes = [8, 32], strides = [1, 1]} : vector<8x96xf32> to vector<8x32xf32>
    %157 = arith.mulf %155, %107 : vector<8x32xf32>
    %158 = arith.mulf %154, %153 : vector<8x32xf32>
    %159 = arith.addf %157, %158 : vector<8x32xf32>
    %160 = math.tanh %159 : vector<8x32xf32>
    %161 = arith.mulf %156, %160 : vector<8x32xf32>
    %162 = arith.index_cast %115 : i32 to index
    %c0_34 = arith.constant 0 : index
    %163 = vector.load %arg4[%162, %c0_34] : memref<64x64xf32, #tpu.memory_space<vmem>>, vector<8x32xf32>
    tpu.vector_store %arg4[%162, %c0_34], %145 {strides = array<i32>} : memref<64x64xf32, #tpu.memory_space<vmem>>, vector<8x32xf32>,
    %164 = arith.index_cast %118 : i32 to index
    %c32_35 = arith.constant 32 : index
    %165 = vector.load %arg4[%164, %c32_35] : memref<64x64xf32, #tpu.memory_space<vmem>>, vector<8x32xf32>
    tpu.vector_store %arg4[%164, %c32_35], %161 {strides = array<i32>} : memref<64x64xf32, #tpu.memory_space<vmem>>, vector<8x32xf32>,
    %c3_i32 = arith.constant 3 : i32
    %c8_i32_36 = arith.constant 8 : i32
    %166 = arith.muli %c3_i32, %c8_i32_36 : i32
    %167 = tpu.assume_multiple %166, 8 : i32
    %c7_i32_37 = arith.constant 7 : i32
    %168 = arith.subi %c7_i32_37, %c3_i32 : i32
    %c8_i32_38 = arith.constant 8 : i32
    %169 = arith.muli %168, %c8_i32_38 : i32
    %170 = tpu.assume_multiple %169, 8 : i32
    %171 = tpu.concatenate %145, %161 in 1 : vector<8x32xf32>, vector<8x32xf32> -> vector<8x64xf32>
    %172 = arith.truncf %171 : vector<8x64xf32> to vector<8x64xbf16>
    %cst_39 = arith.constant dense<0.000000e+00> : vector<8x256xf32>
    %173 = tpu.matmul %172, %8, %cst_39 {dimension_numbers = #tpu.dot_dimension_numbers<[1], [0], [0], [1], [0, 0, 1, 1], [], []>} : vector<8x64xbf16>, vector<64x256xbf16>, vector<8x256xf32> -> vector<8x256xf32>
    %174 = arith.index_cast %167 : i32 to index
    %c0_40 = arith.constant 0 : index
    %175 = vector.load %arg5[%174, %c0_40] : memref<64x256xf32, #tpu.memory_space<vmem>>, vector<8x128xf32>
    %176 = vector.extract_strided_slice %173 {offsets = [0, 0], sizes = [8, 128], strides = [1, 1]} : vector<8x256xf32> to vector<8x128xf32>
    %177 = arith.addf %175, %176 : vector<8x128xf32>
    %178 = arith.index_cast %170 : i32 to index
    %c128_41 = arith.constant 128 : index
    %179 = vector.load %arg5[%178, %c128_41] : memref<64x256xf32, #tpu.memory_space<vmem>>, vector<8x128xf32>
    %180 = vector.extract_strided_slice %173 {offsets = [0, 128], sizes = [8, 128], strides = [1, 1]} : vector<8x256xf32> to vector<8x128xf32>
    %181 = arith.addf %179, %180 : vector<8x128xf32>
    %182 = vector.extract_strided_slice %177 {offsets = [0, 0], sizes = [8, 96], strides = [1, 1]} : vector<8x128xf32> to vector<8x96xf32>
    %183 = arith.negf %182 : vector<8x96xf32>
    %184 = math.exp %183 : vector<8x96xf32>
    %cst_42 = arith.constant 1.000000e+00 : f32
    %185 = vector.broadcast %cst_42 : f32 to vector<8x96xf32>
    %186 = arith.addf %185, %184 : vector<8x96xf32>
    %187 = arith.divf %185, %186 : vector<8x96xf32>
    %188 = vector.extract_strided_slice %177 {offsets = [0, 96], sizes = [8, 32], strides = [1, 1]} : vector<8x128xf32> to vector<8x32xf32>
    %189 = math.tanh %188 : vector<8x32xf32>
    %190 = vector.extract_strided_slice %187 {offsets = [0, 0], sizes = [8, 32], strides = [1, 1]} : vector<8x96xf32> to vector<8x32xf32>
    %191 = vector.extract_strided_slice %187 {offsets = [0, 32], sizes = [8, 32], strides = [1, 1]} : vector<8x96xf32> to vector<8x32xf32>
    %192 = vector.extract_strided_slice %187 {offsets = [0, 64], sizes = [8, 32], strides = [1, 1]} : vector<8x96xf32> to vector<8x32xf32>
    %193 = arith.mulf %191, %143 : vector<8x32xf32>
    %194 = arith.mulf %190, %189 : vector<8x32xf32>
    %195 = arith.addf %193, %194 : vector<8x32xf32>
    %196 = math.tanh %195 : vector<8x32xf32>
    %197 = arith.mulf %192, %196 : vector<8x32xf32>
    %198 = vector.extract_strided_slice %181 {offsets = [0, 0], sizes = [8, 96], strides = [1, 1]} : vector<8x128xf32> to vector<8x96xf32>
    %199 = arith.negf %198 : vector<8x96xf32>
    %200 = math.exp %199 : vector<8x96xf32>
    %cst_43 = arith.constant 1.000000e+00 : f32
    %201 = vector.broadcast %cst_43 : f32 to vector<8x96xf32>
    %202 = arith.addf %201, %200 : vector<8x96xf32>
    %203 = arith.divf %201, %202 : vector<8x96xf32>
    %204 = vector.extract_strided_slice %181 {offsets = [0, 96], sizes = [8, 32], strides = [1, 1]} : vector<8x128xf32> to vector<8x32xf32>
    %205 = math.tanh %204 : vector<8x32xf32>
    %206 = vector.extract_strided_slice %203 {offsets = [0, 0], sizes = [8, 32], strides = [1, 1]} : vector<8x96xf32> to vector<8x32xf32>
    %207 = vector.extract_strided_slice %203 {offsets = [0, 32], sizes = [8, 32], strides = [1, 1]} : vector<8x96xf32> to vector<8x32xf32>
    %208 = vector.extract_strided_slice %203 {offsets = [0, 64], sizes = [8, 32], strides = [1, 1]} : vector<8x96xf32> to vector<8x32xf32>
    %209 = arith.mulf %207, %159 : vector<8x32xf32>
    %210 = arith.mulf %206, %205 : vector<8x32xf32>
    %211 = arith.addf %209, %210 : vector<8x32xf32>
    %212 = math.tanh %211 : vector<8x32xf32>
    %213 = arith.mulf %208, %212 : vector<8x32xf32>
    %214 = arith.index_cast %167 : i32 to index
    %c0_44 = arith.constant 0 : index
    %215 = vector.load %arg4[%214, %c0_44] : memref<64x64xf32, #tpu.memory_space<vmem>>, vector<8x32xf32>
    tpu.vector_store %arg4[%214, %c0_44], %197 {strides = array<i32>} : memref<64x64xf32, #tpu.memory_space<vmem>>, vector<8x32xf32>,
    %216 = arith.index_cast %170 : i32 to index
    %c32_45 = arith.constant 32 : index
    %217 = vector.load %arg4[%216, %c32_45] : memref<64x64xf32, #tpu.memory_space<vmem>>, vector<8x32xf32>
    tpu.vector_store %arg4[%216, %c32_45], %213 {strides = array<i32>} : memref<64x64xf32, #tpu.memory_space<vmem>>, vector<8x32xf32>,
    %c4_i32 = arith.constant 4 : i32
    %c8_i32_46 = arith.constant 8 : i32
    %218 = arith.muli %c4_i32, %c8_i32_46 : i32
    %219 = tpu.assume_multiple %218, 8 : i32
    %c7_i32_47 = arith.constant 7 : i32
    %220 = arith.subi %c7_i32_47, %c4_i32 : i32
    %c8_i32_48 = arith.constant 8 : i32
    %221 = arith.muli %220, %c8_i32_48 : i32
    %222 = tpu.assume_multiple %221, 8 : i32
    %223 = tpu.concatenate %197, %213 in 1 : vector<8x32xf32>, vector<8x32xf32> -> vector<8x64xf32>
    %224 = arith.truncf %223 : vector<8x64xf32> to vector<8x64xbf16>
    %cst_49 = arith.constant dense<0.000000e+00> : vector<8x256xf32>
    %225 = tpu.matmul %224, %8, %cst_49 {dimension_numbers = #tpu.dot_dimension_numbers<[1], [0], [0], [1], [0, 0, 1, 1], [], []>} : vector<8x64xbf16>, vector<64x256xbf16>, vector<8x256xf32> -> vector<8x256xf32>
    %226 = arith.index_cast %219 : i32 to index
    %c0_50 = arith.constant 0 : index
    %227 = vector.load %arg5[%226, %c0_50] : memref<64x256xf32, #tpu.memory_space<vmem>>, vector<8x128xf32>
    %228 = vector.extract_strided_slice %225 {offsets = [0, 0], sizes = [8, 128], strides = [1, 1]} : vector<8x256xf32> to vector<8x128xf32>
    %229 = arith.addf %227, %228 : vector<8x128xf32>
    %230 = arith.index_cast %222 : i32 to index
    %c128_51 = arith.constant 128 : index
    %231 = vector.load %arg5[%230, %c128_51] : memref<64x256xf32, #tpu.memory_space<vmem>>, vector<8x128xf32>
    %232 = vector.extract_strided_slice %225 {offsets = [0, 128], sizes = [8, 128], strides = [1, 1]} : vector<8x256xf32> to vector<8x128xf32>
    %233 = arith.addf %231, %232 : vector<8x128xf32>
    %234 = vector.extract_strided_slice %229 {offsets = [0, 0], sizes = [8, 96], strides = [1, 1]} : vector<8x128xf32> to vector<8x96xf32>
    %235 = arith.negf %234 : vector<8x96xf32>
    %236 = math.exp %235 : vector<8x96xf32>
    %cst_52 = arith.constant 1.000000e+00 : f32
    %237 = vector.broadcast %cst_52 : f32 to vector<8x96xf32>
    %238 = arith.addf %237, %236 : vector<8x96xf32>
    %239 = arith.divf %237, %238 : vector<8x96xf32>
    %240 = vector.extract_strided_slice %229 {offsets = [0, 96], sizes = [8, 32], strides = [1, 1]} : vector<8x128xf32> to vector<8x32xf32>
    %241 = math.tanh %240 : vector<8x32xf32>
    %242 = vector.extract_strided_slice %239 {offsets = [0, 0], sizes = [8, 32], strides = [1, 1]} : vector<8x96xf32> to vector<8x32xf32>
    %243 = vector.extract_strided_slice %239 {offsets = [0, 32], sizes = [8, 32], strides = [1, 1]} : vector<8x96xf32> to vector<8x32xf32>
    %244 = vector.extract_strided_slice %239 {offsets = [0, 64], sizes = [8, 32], strides = [1, 1]} : vector<8x96xf32> to vector<8x32xf32>
    %245 = arith.mulf %243, %195 : vector<8x32xf32>
    %246 = arith.mulf %242, %241 : vector<8x32xf32>
    %247 = arith.addf %245, %246 : vector<8x32xf32>
    %248 = math.tanh %247 : vector<8x32xf32>
    %249 = arith.mulf %244, %248 : vector<8x32xf32>
    %250 = vector.extract_strided_slice %233 {offsets = [0, 0], sizes = [8, 96], strides = [1, 1]} : vector<8x128xf32> to vector<8x96xf32>
    %251 = arith.negf %250 : vector<8x96xf32>
    %252 = math.exp %251 : vector<8x96xf32>
    %cst_53 = arith.constant 1.000000e+00 : f32
    %253 = vector.broadcast %cst_53 : f32 to vector<8x96xf32>
    %254 = arith.addf %253, %252 : vector<8x96xf32>
    %255 = arith.divf %253, %254 : vector<8x96xf32>
    %256 = vector.extract_strided_slice %233 {offsets = [0, 96], sizes = [8, 32], strides = [1, 1]} : vector<8x128xf32> to vector<8x32xf32>
    %257 = math.tanh %256 : vector<8x32xf32>
    %258 = vector.extract_strided_slice %255 {offsets = [0, 0], sizes = [8, 32], strides = [1, 1]} : vector<8x96xf32> to vector<8x32xf32>
    %259 = vector.extract_strided_slice %255 {offsets = [0, 32], sizes = [8, 32], strides = [1, 1]} : vector<8x96xf32> to vector<8x32xf32>
    %260 = vector.extract_strided_slice %255 {offsets = [0, 64], sizes = [8, 32], strides = [1, 1]} : vector<8x96xf32> to vector<8x32xf32>
    %261 = arith.mulf %259, %211 : vector<8x32xf32>
    %262 = arith.mulf %258, %257 : vector<8x32xf32>
    %263 = arith.addf %261, %262 : vector<8x32xf32>
    %264 = math.tanh %263 : vector<8x32xf32>
    %265 = arith.mulf %260, %264 : vector<8x32xf32>
    %266 = arith.index_cast %219 : i32 to index
    %c0_54 = arith.constant 0 : index
    %267 = vector.load %arg4[%266, %c0_54] : memref<64x64xf32, #tpu.memory_space<vmem>>, vector<8x32xf32>
    tpu.vector_store %arg4[%266, %c0_54], %249 {strides = array<i32>} : memref<64x64xf32, #tpu.memory_space<vmem>>, vector<8x32xf32>,
    %268 = arith.index_cast %222 : i32 to index
    %c32_55 = arith.constant 32 : index
    %269 = vector.load %arg4[%268, %c32_55] : memref<64x64xf32, #tpu.memory_space<vmem>>, vector<8x32xf32>
    tpu.vector_store %arg4[%268, %c32_55], %265 {strides = array<i32>} : memref<64x64xf32, #tpu.memory_space<vmem>>, vector<8x32xf32>,
    %c5_i32 = arith.constant 5 : i32
    %c8_i32_56 = arith.constant 8 : i32
    %270 = arith.muli %c5_i32, %c8_i32_56 : i32
    %271 = tpu.assume_multiple %270, 8 : i32
    %c7_i32_57 = arith.constant 7 : i32
    %272 = arith.subi %c7_i32_57, %c5_i32 : i32
    %c8_i32_58 = arith.constant 8 : i32
    %273 = arith.muli %272, %c8_i32_58 : i32
    %274 = tpu.assume_multiple %273, 8 : i32
    %275 = tpu.concatenate %249, %265 in 1 : vector<8x32xf32>, vector<8x32xf32> -> vector<8x64xf32>
    %276 = arith.truncf %275 : vector<8x64xf32> to vector<8x64xbf16>
    %cst_59 = arith.constant dense<0.000000e+00> : vector<8x256xf32>
    %277 = tpu.matmul %276, %8, %cst_59 {dimension_numbers = #tpu.dot_dimension_numbers<[1], [0], [0], [1], [0, 0, 1, 1], [], []>} : vector<8x64xbf16>, vector<64x256xbf16>, vector<8x256xf32> -> vector<8x256xf32>
    %278 = arith.index_cast %271 : i32 to index
    %c0_60 = arith.constant 0 : index
    %279 = vector.load %arg5[%278, %c0_60] : memref<64x256xf32, #tpu.memory_space<vmem>>, vector<8x128xf32>
    %280 = vector.extract_strided_slice %277 {offsets = [0, 0], sizes = [8, 128], strides = [1, 1]} : vector<8x256xf32> to vector<8x128xf32>
    %281 = arith.addf %279, %280 : vector<8x128xf32>
    %282 = arith.index_cast %274 : i32 to index
    %c128_61 = arith.constant 128 : index
    %283 = vector.load %arg5[%282, %c128_61] : memref<64x256xf32, #tpu.memory_space<vmem>>, vector<8x128xf32>
    %284 = vector.extract_strided_slice %277 {offsets = [0, 128], sizes = [8, 128], strides = [1, 1]} : vector<8x256xf32> to vector<8x128xf32>
    %285 = arith.addf %283, %284 : vector<8x128xf32>
    %286 = vector.extract_strided_slice %281 {offsets = [0, 0], sizes = [8, 96], strides = [1, 1]} : vector<8x128xf32> to vector<8x96xf32>
    %287 = arith.negf %286 : vector<8x96xf32>
    %288 = math.exp %287 : vector<8x96xf32>
    %cst_62 = arith.constant 1.000000e+00 : f32
    %289 = vector.broadcast %cst_62 : f32 to vector<8x96xf32>
    %290 = arith.addf %289, %288 : vector<8x96xf32>
    %291 = arith.divf %289, %290 : vector<8x96xf32>
    %292 = vector.extract_strided_slice %281 {offsets = [0, 96], sizes = [8, 32], strides = [1, 1]} : vector<8x128xf32> to vector<8x32xf32>
    %293 = math.tanh %292 : vector<8x32xf32>
    %294 = vector.extract_strided_slice %291 {offsets = [0, 0], sizes = [8, 32], strides = [1, 1]} : vector<8x96xf32> to vector<8x32xf32>
    %295 = vector.extract_strided_slice %291 {offsets = [0, 32], sizes = [8, 32], strides = [1, 1]} : vector<8x96xf32> to vector<8x32xf32>
    %296 = vector.extract_strided_slice %291 {offsets = [0, 64], sizes = [8, 32], strides = [1, 1]} : vector<8x96xf32> to vector<8x32xf32>
    %297 = arith.mulf %295, %247 : vector<8x32xf32>
    %298 = arith.mulf %294, %293 : vector<8x32xf32>
    %299 = arith.addf %297, %298 : vector<8x32xf32>
    %300 = math.tanh %299 : vector<8x32xf32>
    %301 = arith.mulf %296, %300 : vector<8x32xf32>
    %302 = vector.extract_strided_slice %285 {offsets = [0, 0], sizes = [8, 96], strides = [1, 1]} : vector<8x128xf32> to vector<8x96xf32>
    %303 = arith.negf %302 : vector<8x96xf32>
    %304 = math.exp %303 : vector<8x96xf32>
    %cst_63 = arith.constant 1.000000e+00 : f32
    %305 = vector.broadcast %cst_63 : f32 to vector<8x96xf32>
    %306 = arith.addf %305, %304 : vector<8x96xf32>
    %307 = arith.divf %305, %306 : vector<8x96xf32>
    %308 = vector.extract_strided_slice %285 {offsets = [0, 96], sizes = [8, 32], strides = [1, 1]} : vector<8x128xf32> to vector<8x32xf32>
    %309 = math.tanh %308 : vector<8x32xf32>
    %310 = vector.extract_strided_slice %307 {offsets = [0, 0], sizes = [8, 32], strides = [1, 1]} : vector<8x96xf32> to vector<8x32xf32>
    %311 = vector.extract_strided_slice %307 {offsets = [0, 32], sizes = [8, 32], strides = [1, 1]} : vector<8x96xf32> to vector<8x32xf32>
    %312 = vector.extract_strided_slice %307 {offsets = [0, 64], sizes = [8, 32], strides = [1, 1]} : vector<8x96xf32> to vector<8x32xf32>
    %313 = arith.mulf %311, %263 : vector<8x32xf32>
    %314 = arith.mulf %310, %309 : vector<8x32xf32>
    %315 = arith.addf %313, %314 : vector<8x32xf32>
    %316 = math.tanh %315 : vector<8x32xf32>
    %317 = arith.mulf %312, %316 : vector<8x32xf32>
    %318 = arith.index_cast %271 : i32 to index
    %c0_64 = arith.constant 0 : index
    %319 = vector.load %arg4[%318, %c0_64] : memref<64x64xf32, #tpu.memory_space<vmem>>, vector<8x32xf32>
    tpu.vector_store %arg4[%318, %c0_64], %301 {strides = array<i32>} : memref<64x64xf32, #tpu.memory_space<vmem>>, vector<8x32xf32>,
    %320 = arith.index_cast %274 : i32 to index
    %c32_65 = arith.constant 32 : index
    %321 = vector.load %arg4[%320, %c32_65] : memref<64x64xf32, #tpu.memory_space<vmem>>, vector<8x32xf32>
    tpu.vector_store %arg4[%320, %c32_65], %317 {strides = array<i32>} : memref<64x64xf32, #tpu.memory_space<vmem>>, vector<8x32xf32>,
    %c6_i32 = arith.constant 6 : i32
    %c8_i32_66 = arith.constant 8 : i32
    %322 = arith.muli %c6_i32, %c8_i32_66 : i32
    %323 = tpu.assume_multiple %322, 8 : i32
    %c7_i32_67 = arith.constant 7 : i32
    %324 = arith.subi %c7_i32_67, %c6_i32 : i32
    %c8_i32_68 = arith.constant 8 : i32
    %325 = arith.muli %324, %c8_i32_68 : i32
    %326 = tpu.assume_multiple %325, 8 : i32
    %327 = tpu.concatenate %301, %317 in 1 : vector<8x32xf32>, vector<8x32xf32> -> vector<8x64xf32>
    %328 = arith.truncf %327 : vector<8x64xf32> to vector<8x64xbf16>
    %cst_69 = arith.constant dense<0.000000e+00> : vector<8x256xf32>
    %329 = tpu.matmul %328, %8, %cst_69 {dimension_numbers = #tpu.dot_dimension_numbers<[1], [0], [0], [1], [0, 0, 1, 1], [], []>} : vector<8x64xbf16>, vector<64x256xbf16>, vector<8x256xf32> -> vector<8x256xf32>
    %330 = arith.index_cast %323 : i32 to index
    %c0_70 = arith.constant 0 : index
    %331 = vector.load %arg5[%330, %c0_70] : memref<64x256xf32, #tpu.memory_space<vmem>>, vector<8x128xf32>
    %332 = vector.extract_strided_slice %329 {offsets = [0, 0], sizes = [8, 128], strides = [1, 1]} : vector<8x256xf32> to vector<8x128xf32>
    %333 = arith.addf %331, %332 : vector<8x128xf32>
    %334 = arith.index_cast %326 : i32 to index
    %c128_71 = arith.constant 128 : index
    %335 = vector.load %arg5[%334, %c128_71] : memref<64x256xf32, #tpu.memory_space<vmem>>, vector<8x128xf32>
    %336 = vector.extract_strided_slice %329 {offsets = [0, 128], sizes = [8, 128], strides = [1, 1]} : vector<8x256xf32> to vector<8x128xf32>
    %337 = arith.addf %335, %336 : vector<8x128xf32>
    %338 = vector.extract_strided_slice %333 {offsets = [0, 0], sizes = [8, 96], strides = [1, 1]} : vector<8x128xf32> to vector<8x96xf32>
    %339 = arith.negf %338 : vector<8x96xf32>
    %340 = math.exp %339 : vector<8x96xf32>
    %cst_72 = arith.constant 1.000000e+00 : f32
    %341 = vector.broadcast %cst_72 : f32 to vector<8x96xf32>
    %342 = arith.addf %341, %340 : vector<8x96xf32>
    %343 = arith.divf %341, %342 : vector<8x96xf32>
    %344 = vector.extract_strided_slice %333 {offsets = [0, 96], sizes = [8, 32], strides = [1, 1]} : vector<8x128xf32> to vector<8x32xf32>
    %345 = math.tanh %344 : vector<8x32xf32>
    %346 = vector.extract_strided_slice %343 {offsets = [0, 0], sizes = [8, 32], strides = [1, 1]} : vector<8x96xf32> to vector<8x32xf32>
    %347 = vector.extract_strided_slice %343 {offsets = [0, 32], sizes = [8, 32], strides = [1, 1]} : vector<8x96xf32> to vector<8x32xf32>
    %348 = vector.extract_strided_slice %343 {offsets = [0, 64], sizes = [8, 32], strides = [1, 1]} : vector<8x96xf32> to vector<8x32xf32>
    %349 = arith.mulf %347, %299 : vector<8x32xf32>
    %350 = arith.mulf %346, %345 : vector<8x32xf32>
    %351 = arith.addf %349, %350 : vector<8x32xf32>
    %352 = math.tanh %351 : vector<8x32xf32>
    %353 = arith.mulf %348, %352 : vector<8x32xf32>
    %354 = vector.extract_strided_slice %337 {offsets = [0, 0], sizes = [8, 96], strides = [1, 1]} : vector<8x128xf32> to vector<8x96xf32>
    %355 = arith.negf %354 : vector<8x96xf32>
    %356 = math.exp %355 : vector<8x96xf32>
    %cst_73 = arith.constant 1.000000e+00 : f32
    %357 = vector.broadcast %cst_73 : f32 to vector<8x96xf32>
    %358 = arith.addf %357, %356 : vector<8x96xf32>
    %359 = arith.divf %357, %358 : vector<8x96xf32>
    %360 = vector.extract_strided_slice %337 {offsets = [0, 96], sizes = [8, 32], strides = [1, 1]} : vector<8x128xf32> to vector<8x32xf32>
    %361 = math.tanh %360 : vector<8x32xf32>
    %362 = vector.extract_strided_slice %359 {offsets = [0, 0], sizes = [8, 32], strides = [1, 1]} : vector<8x96xf32> to vector<8x32xf32>
    %363 = vector.extract_strided_slice %359 {offsets = [0, 32], sizes = [8, 32], strides = [1, 1]} : vector<8x96xf32> to vector<8x32xf32>
    %364 = vector.extract_strided_slice %359 {offsets = [0, 64], sizes = [8, 32], strides = [1, 1]} : vector<8x96xf32> to vector<8x32xf32>
    %365 = arith.mulf %363, %315 : vector<8x32xf32>
    %366 = arith.mulf %362, %361 : vector<8x32xf32>
    %367 = arith.addf %365, %366 : vector<8x32xf32>
    %368 = math.tanh %367 : vector<8x32xf32>
    %369 = arith.mulf %364, %368 : vector<8x32xf32>
    %370 = arith.index_cast %323 : i32 to index
    %c0_74 = arith.constant 0 : index
    %371 = vector.load %arg4[%370, %c0_74] : memref<64x64xf32, #tpu.memory_space<vmem>>, vector<8x32xf32>
    tpu.vector_store %arg4[%370, %c0_74], %353 {strides = array<i32>} : memref<64x64xf32, #tpu.memory_space<vmem>>, vector<8x32xf32>,
    %372 = arith.index_cast %326 : i32 to index
    %c32_75 = arith.constant 32 : index
    %373 = vector.load %arg4[%372, %c32_75] : memref<64x64xf32, #tpu.memory_space<vmem>>, vector<8x32xf32>
    tpu.vector_store %arg4[%372, %c32_75], %369 {strides = array<i32>} : memref<64x64xf32, #tpu.memory_space<vmem>>, vector<8x32xf32>,
    %c7_i32_76 = arith.constant 7 : i32
    %c8_i32_77 = arith.constant 8 : i32
    %374 = arith.muli %c7_i32_76, %c8_i32_77 : i32
    %375 = tpu.assume_multiple %374, 8 : i32
    %c7_i32_78 = arith.constant 7 : i32
    %376 = arith.subi %c7_i32_78, %c7_i32_76 : i32
    %c8_i32_79 = arith.constant 8 : i32
    %377 = arith.muli %376, %c8_i32_79 : i32
    %378 = tpu.assume_multiple %377, 8 : i32
    %379 = tpu.concatenate %353, %369 in 1 : vector<8x32xf32>, vector<8x32xf32> -> vector<8x64xf32>
    %380 = arith.truncf %379 : vector<8x64xf32> to vector<8x64xbf16>
    %cst_80 = arith.constant dense<0.000000e+00> : vector<8x256xf32>
    %381 = tpu.matmul %380, %8, %cst_80 {dimension_numbers = #tpu.dot_dimension_numbers<[1], [0], [0], [1], [0, 0, 1, 1], [], []>} : vector<8x64xbf16>, vector<64x256xbf16>, vector<8x256xf32> -> vector<8x256xf32>
    %382 = arith.index_cast %375 : i32 to index
    %c0_81 = arith.constant 0 : index
    %383 = vector.load %arg5[%382, %c0_81] : memref<64x256xf32, #tpu.memory_space<vmem>>, vector<8x128xf32>
    %384 = vector.extract_strided_slice %381 {offsets = [0, 0], sizes = [8, 128], strides = [1, 1]} : vector<8x256xf32> to vector<8x128xf32>
    %385 = arith.addf %383, %384 : vector<8x128xf32>
    %386 = arith.index_cast %378 : i32 to index
    %c128_82 = arith.constant 128 : index
    %387 = vector.load %arg5[%386, %c128_82] : memref<64x256xf32, #tpu.memory_space<vmem>>, vector<8x128xf32>
    %388 = vector.extract_strided_slice %381 {offsets = [0, 128], sizes = [8, 128], strides = [1, 1]} : vector<8x256xf32> to vector<8x128xf32>
    %389 = arith.addf %387, %388 : vector<8x128xf32>
    %390 = vector.extract_strided_slice %385 {offsets = [0, 0], sizes = [8, 96], strides = [1, 1]} : vector<8x128xf32> to vector<8x96xf32>
    %391 = arith.negf %390 : vector<8x96xf32>
    %392 = math.exp %391 : vector<8x96xf32>
    %cst_83 = arith.constant 1.000000e+00 : f32
    %393 = vector.broadcast %cst_83 : f32 to vector<8x96xf32>
    %394 = arith.addf %393, %392 : vector<8x96xf32>
    %395 = arith.divf %393, %394 : vector<8x96xf32>
    %396 = vector.extract_strided_slice %385 {offsets = [0, 96], sizes = [8, 32], strides = [1, 1]} : vector<8x128xf32> to vector<8x32xf32>
    %397 = math.tanh %396 : vector<8x32xf32>
    %398 = vector.extract_strided_slice %395 {offsets = [0, 0], sizes = [8, 32], strides = [1, 1]} : vector<8x96xf32> to vector<8x32xf32>
    %399 = vector.extract_strided_slice %395 {offsets = [0, 32], sizes = [8, 32], strides = [1, 1]} : vector<8x96xf32> to vector<8x32xf32>
    %400 = vector.extract_strided_slice %395 {offsets = [0, 64], sizes = [8, 32], strides = [1, 1]} : vector<8x96xf32> to vector<8x32xf32>
    %401 = arith.mulf %399, %351 : vector<8x32xf32>
    %402 = arith.mulf %398, %397 : vector<8x32xf32>
    %403 = arith.addf %401, %402 : vector<8x32xf32>
    %404 = math.tanh %403 : vector<8x32xf32>
    %405 = arith.mulf %400, %404 : vector<8x32xf32>
    %406 = vector.extract_strided_slice %389 {offsets = [0, 0], sizes = [8, 96], strides = [1, 1]} : vector<8x128xf32> to vector<8x96xf32>
    %407 = arith.negf %406 : vector<8x96xf32>
    %408 = math.exp %407 : vector<8x96xf32>
    %cst_84 = arith.constant 1.000000e+00 : f32
    %409 = vector.broadcast %cst_84 : f32 to vector<8x96xf32>
    %410 = arith.addf %409, %408 : vector<8x96xf32>
    %411 = arith.divf %409, %410 : vector<8x96xf32>
    %412 = vector.extract_strided_slice %389 {offsets = [0, 96], sizes = [8, 32], strides = [1, 1]} : vector<8x128xf32> to vector<8x32xf32>
    %413 = math.tanh %412 : vector<8x32xf32>
    %414 = vector.extract_strided_slice %411 {offsets = [0, 0], sizes = [8, 32], strides = [1, 1]} : vector<8x96xf32> to vector<8x32xf32>
    %415 = vector.extract_strided_slice %411 {offsets = [0, 32], sizes = [8, 32], strides = [1, 1]} : vector<8x96xf32> to vector<8x32xf32>
    %416 = vector.extract_strided_slice %411 {offsets = [0, 64], sizes = [8, 32], strides = [1, 1]} : vector<8x96xf32> to vector<8x32xf32>
    %417 = arith.mulf %415, %367 : vector<8x32xf32>
    %418 = arith.mulf %414, %413 : vector<8x32xf32>
    %419 = arith.addf %417, %418 : vector<8x32xf32>
    %420 = math.tanh %419 : vector<8x32xf32>
    %421 = arith.mulf %416, %420 : vector<8x32xf32>
    %422 = arith.index_cast %375 : i32 to index
    %c0_85 = arith.constant 0 : index
    %423 = vector.load %arg4[%422, %c0_85] : memref<64x64xf32, #tpu.memory_space<vmem>>, vector<8x32xf32>
    tpu.vector_store %arg4[%422, %c0_85], %405 {strides = array<i32>} : memref<64x64xf32, #tpu.memory_space<vmem>>, vector<8x32xf32>,
    %424 = arith.index_cast %378 : i32 to index
    %c32_86 = arith.constant 32 : index
    %425 = vector.load %arg4[%424, %c32_86] : memref<64x64xf32, #tpu.memory_space<vmem>>, vector<8x32xf32>
    tpu.vector_store %arg4[%424, %c32_86], %421 {strides = array<i32>} : memref<64x64xf32, #tpu.memory_space<vmem>>, vector<8x32xf32>,
    %c8_i32_87 = arith.constant 8 : i32
    return
  }
}

module attributes {stable_mosaic.version = 11 : i64} {
  func.func @head_kernel(%arg0: i32, %arg1: memref<64x64xf32, #tpu.memory_space<vmem>>, %arg2: memref<1x64xf32, #tpu.memory_space<vmem>>, %arg3: memref<1x64xf32, #tpu.memory_space<vmem>>, %arg4: memref<64x128xf32, #tpu.memory_space<vmem>>, %arg5: memref<1x128xf32, #tpu.memory_space<vmem>>, %arg6: memref<64x1xi32, #tpu.memory_space<vmem>>, %arg7: memref<64x1xi32, #tpu.memory_space<vmem>>, %arg8: memref<64x128xf32, #tpu.memory_space<vmem>>, %arg9: memref<1x8x128xf32, #tpu.memory_space<vmem>>) attributes {dimension_semantics = [#tpu.dimension_semantics<parallel>], iteration_bounds = array<i64: 1>, scalar_prefetch = 0 : i64, scratch_operands = 0 : i64, tpu.core_type = #tpu.core_type<tc>, window_params = [{transform_indices = @transform_0, window_bounds = array<i64: 64, 64>}, {pipeline_mode = #tpu.pipeline_mode<synchronous>, transform_indices = @transform_1, window_bounds = array<i64: 1, 64>}, {pipeline_mode = #tpu.pipeline_mode<synchronous>, transform_indices = @transform_2, window_bounds = array<i64: 1, 64>}, {pipeline_mode = #tpu.pipeline_mode<synchronous>, transform_indices = @transform_3, window_bounds = array<i64: 64, 128>}, {pipeline_mode = #tpu.pipeline_mode<synchronous>, transform_indices = @transform_4, window_bounds = array<i64: 1, 128>}, {transform_indices = @transform_5, window_bounds = array<i64: 64, 1>}, {transform_indices = @transform_6, window_bounds = array<i64: 64, 1>}, {transform_indices = @transform_7, window_bounds = array<i64: 64, 128>}, {transform_indices = @transform_8, window_bounds = array<i64: 1, 8, 128>}]} {
    %c0 = arith.constant 0 : index
    %c0_0 = arith.constant 0 : index
    %0 = vector.load %arg1[%c0, %c0_0] : memref<64x64xf32, #tpu.memory_space<vmem>>, vector<64x64xf32>
    %cst = arith.constant dense<0.000000e+00> : vector<64xf32>
    %1 = vector.multi_reduction <add>, %0, %cst [1] : vector<64x64xf32> to vector<64xf32>
    %2 = vector.shape_cast %1 : vector<64xf32> to vector<64x1xf32>
    %cst_1 = arith.constant 6.400000e+01 : f32
    %3 = vector.broadcast %cst_1 : f32 to vector<64x1xf32>
    %4 = arith.divf %2, %3 : vector<64x1xf32>
    %5 = vector.broadcast %4 : vector<64x1xf32> to vector<64x64xf32>
    %6 = arith.subf %0, %5 : vector<64x64xf32>
    %7 = arith.mulf %6, %6 : vector<64x64xf32>
    %cst_2 = arith.constant dense<0.000000e+00> : vector<64xf32>
    %8 = vector.multi_reduction <add>, %7, %cst_2 [1] : vector<64x64xf32> to vector<64xf32>
    %9 = vector.shape_cast %8 : vector<64xf32> to vector<64x1xf32>
    %cst_3 = arith.constant 6.400000e+01 : f32
    %10 = vector.broadcast %cst_3 : f32 to vector<64x1xf32>
    %11 = arith.divf %9, %10 : vector<64x1xf32>
    %12 = vector.broadcast %4 : vector<64x1xf32> to vector<64x64xf32>
    %13 = arith.subf %0, %12 : vector<64x64xf32>
    %cst_4 = arith.constant 9.99999974E-6 : f32
    %14 = vector.broadcast %cst_4 : f32 to vector<64x1xf32>
    %15 = arith.addf %11, %14 : vector<64x1xf32>
    %16 = math.rsqrt %15 : vector<64x1xf32>
    %17 = vector.broadcast %16 : vector<64x1xf32> to vector<64x64xf32>
    %18 = arith.mulf %13, %17 : vector<64x64xf32>
    %c0_5 = arith.constant 0 : index
    %c0_6 = arith.constant 0 : index
    %19 = vector.load %arg2[%c0_5, %c0_6] : memref<1x64xf32, #tpu.memory_space<vmem>>, vector<1x64xf32>
    %20 = vector.broadcast %19 : vector<1x64xf32> to vector<64x64xf32>
    %21 = arith.mulf %18, %20 : vector<64x64xf32>
    %c0_7 = arith.constant 0 : index
    %c0_8 = arith.constant 0 : index
    %22 = vector.load %arg3[%c0_7, %c0_8] : memref<1x64xf32, #tpu.memory_space<vmem>>, vector<1x64xf32>
    %23 = vector.broadcast %22 : vector<1x64xf32> to vector<64x64xf32>
    %24 = arith.addf %21, %23 : vector<64x64xf32>
    %c0_9 = arith.constant 0 : index
    %c0_10 = arith.constant 0 : index
    %25 = vector.load %arg4[%c0_9, %c0_10] : memref<64x128xf32, #tpu.memory_space<vmem>>, vector<64x128xf32>
    %cst_11 = arith.constant dense<0.000000e+00> : vector<64x128xf32>
    %26 = tpu.matmul %24, %25, %cst_11 {dimension_numbers = #tpu.dot_dimension_numbers<[1], [0], [0], [1], [0, 0, 1, 1], [], []>} : vector<64x64xf32>, vector<64x128xf32>, vector<64x128xf32> -> vector<64x128xf32>
    %c0_12 = arith.constant 0 : index
    %c0_13 = arith.constant 0 : index
    %27 = vector.load %arg5[%c0_12, %c0_13] : memref<1x128xf32, #tpu.memory_space<vmem>>, vector<1x128xf32>
    %28 = vector.broadcast %27 : vector<1x128xf32> to vector<64x128xf32>
    %29 = arith.addf %26, %28 : vector<64x128xf32>
    %c0_14 = arith.constant 0 : index
    %c0_15 = arith.constant 0 : index
    %30 = vector.load %arg8[%c0_14, %c0_15] : memref<64x128xf32, #tpu.memory_space<vmem>>, vector<64x128xf32>
    tpu.vector_store %arg8[%c0_14, %c0_15], %29 {strides = array<i32>} : memref<64x128xf32, #tpu.memory_space<vmem>>, vector<64x128xf32>,
    %c0_16 = arith.constant 0 : index
    %c0_17 = arith.constant 0 : index
    %31 = vector.load %arg6[%c0_16, %c0_17] : memref<64x1xi32, #tpu.memory_space<vmem>>, vector<64x1xi32>
    %c0_18 = arith.constant 0 : index
    %c0_19 = arith.constant 0 : index
    %32 = vector.load %arg7[%c0_18, %c0_19] : memref<64x1xi32, #tpu.memory_space<vmem>>, vector<64x1xi32>
    %cst_20 = arith.constant dense<0xFF800000> : vector<64xf32>
    %33 = vector.multi_reduction <maximumf>, %29, %cst_20 [1] : vector<64x128xf32> to vector<64xf32>
    %34 = vector.shape_cast %33 : vector<64xf32> to vector<64x1xf32>
    %35 = vector.broadcast %34 : vector<64x1xf32> to vector<64x128xf32>
    %36 = arith.subf %29, %35 : vector<64x128xf32>
    %37 = math.exp %36 : vector<64x128xf32>
    %cst_21 = arith.constant dense<0.000000e+00> : vector<64xf32>
    %38 = vector.multi_reduction <add>, %37, %cst_21 [1] : vector<64x128xf32> to vector<64xf32>
    %39 = vector.shape_cast %38 : vector<64xf32> to vector<64x1xf32>
    %40 = math.log %39 : vector<64x1xf32>
    %41 = arith.addf %40, %34 : vector<64x1xf32>
    %42 = tpu.iota {dimensions = array<i32: 1>} : vector<64x128xi32>
    %43 = vector.broadcast %31 : vector<64x1xi32> to vector<64x128xi32>
    %44 = arith.cmpi eq, %43, %42 : vector<64x128xi32>
    %cst_22 = arith.constant 0.000000e+00 : f32
    %45 = vector.broadcast %cst_22 : f32 to vector<64x128xf32>
    %46 = arith.select %44, %29, %45 : vector<64x128xi1>, vector<64x128xf32>
    %cst_23 = arith.constant dense<0.000000e+00> : vector<64xf32>
    %47 = vector.multi_reduction <add>, %46, %cst_23 [1] : vector<64x128xf32> to vector<64xf32>
    %48 = vector.shape_cast %47 : vector<64xf32> to vector<64x1xf32>
    %49 = arith.subf %41, %48 : vector<64x1xf32>
    %c1_i32 = arith.constant 1 : i32
    %50 = vector.broadcast %c1_i32 : i32 to vector<64x1xi32>
    %51 = arith.cmpi eq, %32, %50 : vector<64x1xi32>
    %c0_i32 = arith.constant 0 : i32
    %52 = vector.broadcast %c0_i32 : i32 to vector<64x1xi32>
    %53 = arith.cmpi ne, %31, %52 : vector<64x1xi32>
    %54 = arith.andi %51, %53 : vector<64x1xi1>
    %55 = arith.extui %54 : vector<64x1xi1> to vector<64x1xi32>
    %56 = arith.sitofp %55 : vector<64x1xi32> to vector<64x1xf32>
    %57 = arith.mulf %49, %56 : vector<64x1xf32>
    %58 = vector.shape_cast %57 : vector<64x1xf32> to vector<1x64x1xf32>
    %cst_24 = arith.constant dense<0.000000e+00> : vector<1xf32>
    %59 = vector.multi_reduction <add>, %58, %cst_24 [1, 2] : vector<1x64x1xf32> to vector<1xf32>
    %60 = vector.shape_cast %59 : vector<1xf32> to vector<1x1x1xf32>
    %61 = vector.extract %60[0, 0, 0] : f32 from vector<1x1x1xf32>
    %62 = vector.shape_cast %56 : vector<64x1xf32> to vector<1x64x1xf32>
    %cst_25 = arith.constant dense<0.000000e+00> : vector<1xf32>
    %63 = vector.multi_reduction <add>, %62, %cst_25 [1, 2] : vector<1x64x1xf32> to vector<1xf32>
    %64 = vector.shape_cast %63 : vector<1xf32> to vector<1x1x1xf32>
    %65 = vector.extract %64[0, 0, 0] : f32 from vector<1x1x1xf32>
    %66 = tpu.iota {dimensions = array<i32: 1>} : vector<1x8x128xi32>
    %67 = tpu.iota {dimensions = array<i32: 2>} : vector<1x8x128xi32>
    %cst_26 = arith.constant 0.000000e+00 : f32
    %68 = vector.broadcast %cst_26 : f32 to vector<1x8x128xf32>
    %c0_i32_27 = arith.constant 0 : i32
    %69 = vector.broadcast %c0_i32_27 : i32 to vector<1x8x128xi32>
    %70 = arith.cmpi eq, %66, %69 : vector<1x8x128xi32>
    %c0_i32_28 = arith.constant 0 : i32
    %71 = vector.broadcast %c0_i32_28 : i32 to vector<1x8x128xi32>
    %72 = arith.cmpi eq, %67, %71 : vector<1x8x128xi32>
    %73 = arith.andi %70, %72 : vector<1x8x128xi1>
    %74 = vector.broadcast %61 : f32 to vector<1x8x128xf32>
    %75 = arith.select %73, %74, %68 : vector<1x8x128xi1>, vector<1x8x128xf32>
    %c0_i32_29 = arith.constant 0 : i32
    %76 = vector.broadcast %c0_i32_29 : i32 to vector<1x8x128xi32>
    %77 = arith.cmpi eq, %66, %76 : vector<1x8x128xi32>
    %c1_i32_30 = arith.constant 1 : i32
    %78 = vector.broadcast %c1_i32_30 : i32 to vector<1x8x128xi32>
    %79 = arith.cmpi eq, %67, %78 : vector<1x8x128xi32>
    %80 = arith.andi %77, %79 : vector<1x8x128xi1>
    %81 = vector.broadcast %65 : f32 to vector<1x8x128xf32>
    %82 = arith.select %80, %81, %68 : vector<1x8x128xi1>, vector<1x8x128xf32>
    %83 = arith.addf %75, %82 : vector<1x8x128xf32>
    %c0_31 = arith.constant 0 : index
    %c0_32 = arith.constant 0 : index
    %c0_33 = arith.constant 0 : index
    %84 = vector.load %arg9[%c0_31, %c0_32, %c0_33] : memref<1x8x128xf32, #tpu.memory_space<vmem>>, vector<1x8x128xf32>
    tpu.vector_store %arg9[%c0_31, %c0_32, %c0_33], %83 {strides = array<i32>} : memref<1x8x128xf32, #tpu.memory_space<vmem>>, vector<1x8x128xf32>,
    return
  }
  func.func @transform_0(%arg0: i32) -> (i32, i32) {
    %c0_i32 = arith.constant 0 : i32
    %c0_i32_0 = arith.constant 0 : i32
    return %arg0, %c0_i32 : i32, i32
  }
  func.func @transform_1(%arg0: i32) -> (i32, i32) {
    %c0_i32 = arith.constant 0 : i32
    %c0_i32_0 = arith.constant 0 : i32
    %c0_i32_1 = arith.constant 0 : i32
    return %c0_i32, %c0_i32_0 : i32, i32
  }
  func.func @transform_2(%arg0: i32) -> (i32, i32) {
    %c0_i32 = arith.constant 0 : i32
    %c0_i32_0 = arith.constant 0 : i32
    %c0_i32_1 = arith.constant 0 : i32
    return %c0_i32, %c0_i32_0 : i32, i32
  }
  func.func @transform_3(%arg0: i32) -> (i32, i32) {
    %c0_i32 = arith.constant 0 : i32
    %c0_i32_0 = arith.constant 0 : i32
    %c0_i32_1 = arith.constant 0 : i32
    return %c0_i32, %c0_i32_0 : i32, i32
  }
  func.func @transform_4(%arg0: i32) -> (i32, i32) {
    %c0_i32 = arith.constant 0 : i32
    %c0_i32_0 = arith.constant 0 : i32
    %c0_i32_1 = arith.constant 0 : i32
    return %c0_i32, %c0_i32_0 : i32, i32
  }
  func.func @transform_5(%arg0: i32) -> (i32, i32) {
    %c0_i32 = arith.constant 0 : i32
    %c0_i32_0 = arith.constant 0 : i32
    return %arg0, %c0_i32 : i32, i32
  }
  func.func @transform_6(%arg0: i32) -> (i32, i32) {
    %c0_i32 = arith.constant 0 : i32
    %c0_i32_0 = arith.constant 0 : i32
    return %arg0, %c0_i32 : i32, i32
  }
  func.func @transform_7(%arg0: i32) -> (i32, i32) {
    %c0_i32 = arith.constant 0 : i32
    %c0_i32_0 = arith.constant 0 : i32
    return %arg0, %c0_i32 : i32, i32
  }
  func.func @transform_8(%arg0: i32) -> (i32, i32, i32) {
    %c0_i32 = arith.constant 0 : i32
    %c0_i32_0 = arith.constant 0 : i32
    %c0_i32_1 = arith.constant 0 : i32
    return %arg0, %c0_i32, %c0_i32_0 : i32, i32, i32
  }
}

</mosaic_0001>

<bundles_post_ra>
// kernel: bilstm_for_ner_forward.3
= control target key start
LH: loop header
LB: loop body
LE: loop exit
PB: predicated region body
PF: predicated region fallthrough
CT: control target
= control target key end

     0   :  { %v1497_v0 = vmov 0   ;;  %v1498_v32 = vmov 0.0|0.0   ;;  %vm119_vm0 = vcmask 261120   ;;  %s1501_s20 = smov 96   ;;  %vm379_vm9 = vcmask 523520   ;;  %s2000_s1 = inlined_call_operand.vmem [shape: f32[64,1], index: 1, kind: input, shape index: {}]   ;;  %s2001_s4 = inlined_call_operand.vmem [shape: bf16[64,256], index: 4, kind: input, shape index: {}]   ;;  %s2002_s2 = inlined_call_operand.vmem [shape: bf16[32,256], index: 2, kind: input, shape index: {}]   ;;  %s2003_s0 = inlined_call_operand.vmem [shape: f32[64,32], index: 0, kind: input, shape index: {}]   ;;  %s2004_s3 = inlined_call_operand.vmem [shape: f32[1,256], index: 3, kind: input, shape index: {}]   ;;  %s2005_s5 = inlined_call_operand.vmem [shape: f32[64,64], index: 5, kind: output, shape index: {}]  }
   0x1   :  { %1367 = vset.pattern.permute.xlu1 %v1497_v0  ;;  %1366 = vset.pattern.permute.xlu0 %v1497_v0  ;;  %v31_v1 = vld [vmem:[%s2000_s1 + $0x10] sm:$0xff]  ;;  %v29_v2 = vld [vmem:[%s2000_s1] sm:$0xff]  ;;  %v1360_v5 = vld [vmem:[%s2001_s4 + $0x34] sm:$0xf0]  ;;  %vm255_vm10 = vcmask 523264  }
   0x2   :  { %49 = vperm.xlu1 %1367, %v31_v1   ;;  %39 = vperm.xlu0 %1366, %v29_v2   ;;  %v33_v3 = vld [vmem:[%s2000_s1 + $0x20] sm:$0xff]  ;;  %v1299_v4 = vld [vmem:[%s2001_s4 + $0x30] sm:$0xf]  ;;  %v1358_v7 = vld [vmem:[%s2001_s4 + $0x24] sm:$0xf0] }
   0x3   :  { %1368 = vset.pattern.permute.xlu2 %v1497_v0  ;;  %v1291_v6 = vld [vmem:[%s2001_s4 + $0x20] sm:$0xf]  ;;  %v1553_v8 = vor.u32 %v1360_v5, %v1299_v4  ;;  %v32_v9 = vld [vmem:[%s2000_s1 + $0x18] sm:$0xff]  ;;  %v30_v10 = vld [vmem:[%s2000_s1 + $0x8] sm:$0xff] }
   0x4   :  { %59 = vperm.xlu2 %1368, %v33_v3   ;;  %v1562_v11 = vor.u32 %v1358_v7, %v1291_v6  ;;  %v34_v12 = vld [vmem:[%s2000_s1 + $0x28] sm:$0xff]  ;;  %v36_v13 = vld [vmem:[%s2000_s1 + $0x38] sm:$0xff]  ;;  %v35_v14 = vld [vmem:[%s2000_s1 + $0x30] sm:$0xff] }
   0x5   :  { %263 = vmatpush.bf16.msra.mxu2 %v1553_v8  ;;  %v1283_v15 = vld [vmem:[%s2001_s4 + $0x10] sm:$0xf]  ;;  %v1356_v16 = vld [vmem:[%s2001_s4 + $0x14] sm:$0xf0]  ;;  %v1351_v20 = vld [vmem:[%s2002_s2 + $0x14] sm:$0xf] }
   0x6   :  { %v1580_v17 = vor.u32 %v1356_v16, %v1283_v15  ;;  %v1259_v18 = vld [vmem:[%s2002_s2 + $0x10] sm:$0xf]  ;;  %v1352_v19 = vld [vmem:[%s2002_s2 + $0x14] sm:$0xf0]  ;;  %v1261_v22 = vld [vmem:[%s2002_s2 + $0x18] sm:$0xf0] }
   0x7   :  { %v1260_v21 = vor.u32 %v1352_v19, %v1259_v18  ;;  %v1275_v23 = vld [vmem:[%s2001_s4] sm:$0xf]  ;;  %v1354_v24 = vld [vmem:[%s2001_s4 + $0x4] sm:$0xf0]  ;;  %v1264_v25 = vor.u32 %v1351_v20, %v1261_v22  ;;  %v1349_v29 = vld [vmem:[%s2002_s2 + $0x4] sm:$0xf] }
   0x8   :  { %v1601_v26 = vor.u32 %v1354_v24, %v1275_v23  ;;  %v1251_v27 = vld [vmem:[%s2002_s2] sm:$0xf]  ;;  %v1350_v28 = vld [vmem:[%s2002_s2 + $0x4] sm:$0xf0]  ;;  %v1253_v31 = vld [vmem:[%s2002_s2 + $0x8] sm:$0xf0] }
   0x9   :  { %264 = vmatpush.bf16.msra.mxu2 %v1562_v11  ;;  %138 = vmatpush.bf16.msra.mxu0 %v1260_v21  ;;  %v1252_v30 = vor.u32 %v1350_v28, %v1251_v27  ;;  %v1256_v33 = vor.u32 %v1349_v29, %v1253_v31  ;;  %v1359_v34 = vld [vmem:[%s2001_s4 + $0x34] sm:$0xf]  ;;  %v1301_v35 = vld [vmem:[%s2001_s4 + $0x38] sm:$0xf0]  ;;  %v21_v38 = vld [vmem:[%s2003_s0] sm:$0xff] }
   0xa   :  { %54 = vperm.xlu1 %1367, %v32_v9   ;;  %44 = vperm.xlu0 %1366, %v30_v10   ;;  %v1633_v36 = vor.u32 %v1359_v34, %v1301_v35  ;;  %v22_v39 = vld [vmem:[%s2003_s0 + $0x8] sm:$0xff]  ;;  %v1357_v44 = vld [vmem:[%s2001_s4 + $0x24] sm:$0xf]  ;;  %v1355_v48 = vld [vmem:[%s2001_s4 + $0x14] sm:$0xf] }
   0xb   :  { %167 = vmatpush.bf16.msra.mxu1 %v1264_v25  ;;  %v1293_v45 = vld [vmem:[%s2001_s4 + $0x28] sm:$0xf0]  ;;  %v1285_v49 = vld [vmem:[%s2001_s4 + $0x18] sm:$0xf0]  ;;  %v1353_v51 = vld [vmem:[%s2001_s4 + $0x4] sm:$0xf] }
   0xc   :  { %64 = vperm.xlu2 %1368, %v34_v12   ;;  %276 = vmatpush.bf16.msra.mxu3 %v1633_v36  ;;  %v1650_v47 = vor.u32 %v1357_v44, %v1293_v45  ;;  %v1661_v50 = vor.u32 %v1355_v48, %v1285_v49  ;;  %v1277_v52 = vld [vmem:[%s2001_s4 + $0x8] sm:$0xf0]  ;;  %v23_v54 = vld [vmem:[%s2003_s0 + $0x10] sm:$0xff]  ;;  %v24_v55 = vld [vmem:[%s2003_s0 + $0x18] sm:$0xff] }
   0xd   :  { %265 = vmatpush.bf16.msra.mxu2 %v1580_v17  ;;  %139 = vmatpush.bf16.msra.mxu0 %v1252_v30  ;;  %v1672_v53 = vor.u32 %v1353_v51, %v1277_v52  ;;  %v25_v61 = vld [vmem:[%s2003_s0 + $0x20] sm:$0xff]  ;;  %v26_v63 = vld [vmem:[%s2003_s0 + $0x28] sm:$0xff]  ;;  %v28_v4 = vld [vmem:[%s2003_s0 + $0x38] sm:$0xff] }
   0xe   :  { %v27_v6 = vld [vmem:[%s2003_s0 + $0x30] sm:$0xff]  ;;  %s1499_s0 = smov 32  }
   0xf   :  { %168 = vmatpush.bf16.msra.mxu1 %v1256_v33 }
  0x10   :  { %277 = vmatpush.bf16.msra.mxu3 %v1650_v47 }
  0x11   :  { %266 = vmatpush.bf16.msra.mxu2 %v1601_v26  ;;  %771 = vmatpush.bf16.msrb.mxu0 %v1553_v8 }
  0x12   :  { %74 = vperm.xlu1 %1367, %v36_v13   ;;  %69 = vperm.xlu0 %1366, %v35_v14   ;;  %v93_v14 = vld [vmem:[%s2004_s3] sm:$0x3]  ;;  %s1500_s3 = smov 64  }
  0x13   :  { %784 = vmatpush.bf16.msrb.mxu1 %v1633_v36  ;;  %v1719_v15 = vperm.slane %v93_v14, 0  ;;  %v96_v16 = vperm.slane %v93_v14, 1 }
  0x14   :  { %267 = vmatmul.bf16.vlgmr.msra.gmra.mxu2 %v1498_v32  ;;  %278 = vmatpush.bf16.msra.mxu3 %v1661_v50 }
  0x15   :  { %390 = vmatpush.bf16.msrb.mxu2 %v1553_v8  ;;  %772 = vmatpush.bf16.msrb.mxu0 %v1562_v11 }
  0x17   :  { %785 = vmatpush.bf16.msrb.mxu1 %v1650_v47 }
  0x18   :  { %279 = vmatpush.bf16.msra.mxu3 %v1672_v53 }
  0x19   :  { %391 = vmatpush.bf16.msrb.mxu2 %v1562_v11  ;;  %773 = vmatpush.bf16.msrb.mxu0 %v1580_v17 }
  0x1b   :  { %786 = vmatpush.bf16.msrb.mxu1 %v1661_v50  ;;  %280 = vmatmul.bf16.vlgmr.msra.gmra.mxu3 %v1498_v32 }
  0x1c   :  { %403 = vmatpush.bf16.msrb.mxu3 %v1633_v36 }
  0x1d   :  { %392 = vmatpush.bf16.msrb.mxu2 %v1580_v17  ;;  %774 = vmatpush.bf16.msrb.mxu0 %v1601_v26 }
  0x1f   :  { %787 = vmatpush.bf16.msrb.mxu1 %v1672_v53 }
  0x20   :  { %404 = vmatpush.bf16.msrb.mxu3 %v1650_v47 }
  0x21   :  { %393 = vmatpush.bf16.msrb.mxu2 %v1601_v26 }
  0x24   :  { %405 = vmatpush.bf16.msrb.mxu3 %v1661_v50 }
  0x25   :  { %517 = vmatpush.bf16.msra.mxu2 %v1553_v8 }
  0x28   :  { %406 = vmatpush.bf16.msrb.mxu3 %v1672_v53 }
  0x29   :  { %518 = vmatpush.bf16.msra.mxu2 %v1562_v11 }
  0x2c   :  { %530 = vmatpush.bf16.msra.mxu3 %v1633_v36 }
  0x2d   :  { %519 = vmatpush.bf16.msra.mxu2 %v1580_v17 }
  0x30   :  { %531 = vmatpush.bf16.msra.mxu3 %v1650_v47 }
  0x31   :  { %520 = vmatpush.bf16.msra.mxu2 %v1601_v26 }
  0x34   :  { %532 = vmatpush.bf16.msra.mxu3 %v1661_v50 }
  0x38   :  { %533 = vmatpush.bf16.msra.mxu3 %v1672_v53 }
  0x5e   :  { %v60_v59 = vpop.permute.xlu2 %59 }
  0x5f   :  { %v81_v0 = vmul.f32 %v60_v59, %v25_v61 }
  0x66   :  { %v65_v62 = vpop.permute.xlu2 %64 }
  0x67   :  { %v82_v1 = vmul.f32 %v65_v62, %v26_v63 }
  0x69   :  { %v87_v2 = vpack.c.bf16 %v82_v1, %v81_v0 }
  0x74   :  { %v40_v37 = vpop.permute.xlu0 %39  ;;  %v50_v46 = vpop.permute.xlu1 %49 }
  0x75   :  { %v77_v41 = vmul.f32 %v40_v37, %v21_v38  ;;  %v79_v57 = vmul.f32 %v50_v46, %v23_v54 }
  0x7c   :  { %v45_v40 = vpop.permute.xlu0 %44  ;;  %v55_v56 = vpop.permute.xlu1 %54 }
  0x7d   :  { %v78_v42 = vmul.f32 %v45_v40, %v22_v39  ;;  %v80_v58 = vmul.f32 %v55_v56, %v24_v55 }
  0x7f   :  { %v85_v43 = vpack.c.bf16 %v78_v42, %v77_v41  ;;  %v86_v60 = vpack.c.bf16 %v80_v58, %v79_v57 }
  0x81   :  { %1265 = vmatmul.msk.bf16.vlgmr.msra.gmra.mxu0 %vm119_vm0, %v85_v43  ;;  %1269 = vmatmul.msk.bf16.vlgmr.msra.gmra.mxu1 %vm119_vm0, %v85_v43 }
  0x82   :  { %1009 = vmatpush.bf16.msra.mxu0 %v1553_v8  ;;  %1022 = vmatpush.bf16.msra.mxu1 %v1633_v36 }
  0x84   :  { %v75_v3 = vpop.permute.xlu1 %74  ;;  %v70_v5 = vpop.permute.xlu0 %69 }
  0x85   :  { %v84_v7 = vmul.f32 %v75_v3, %v28_v4  ;;  %v83_v9 = vmul.f32 %v70_v5, %v27_v6 }
  0x86   :  { %1010 = vmatpush.bf16.msra.mxu0 %v1562_v11  ;;  %1023 = vmatpush.bf16.msra.mxu1 %v1650_v47 }
  0x87   :  { %v88_v10 = vpack.c.bf16 %v84_v7, %v83_v9 }
  0x8a   :  { %1011 = vmatpush.bf16.msra.mxu0 %v1580_v17  ;;  %1024 = vmatpush.bf16.msra.mxu1 %v1661_v50 }
  0x8e   :  { %1012 = vmatpush.bf16.msra.mxu0 %v1601_v26  ;;  %1025 = vmatpush.bf16.msra.mxu1 %v1672_v53 }
  0x91   :  { %1266 = vmatmul.msk.bf16.gmra.mxu0 %vm119_vm0, %v86_v60  ;;  %1270 = vmatmul.msk.bf16.gmra.mxu1 %vm119_vm0, %v86_v60 }
  0x97   :  { %v268_v12 = vpop.f32.mrf.mxu2 }
  0x9e   :  { %v281_v31 = vpop.f32.mrf.mxu3 }
  0x9f   :  { %v270_v13 = vpop.f32.mrf.mxu2 }
  0xa1   :  { %1267 = vmatmul.msk.bf16.gmra.mxu0 %vm119_vm0, %v87_v2  ;;  %1271 = vmatmul.msk.bf16.gmra.mxu1 %vm119_vm0, %v87_v2 }
  0xa6   :  { %v283_v35 = vpop.f32.mrf.mxu3 }
  0xb1   :  { %1268 = vmatmul.msk.bf16.gmra.mxu0 %vm119_vm0, %v88_v10  ;;  %1272 = vmatmul.msk.bf16.gmra.mxu1 %vm119_vm0, %v88_v10 }
  0xfe   :  { %v141_v18 = vpop.f32.mrf.mxu0  ;;  %v170_v19 = vpop.f32.mrf.mxu1 }
  0xff   :  { %v142_v20 = vadd.f32 %v141_v18, %v1719_v15  ;;  %v1722_v21 = vadd.f32 %v170_v19, %v96_v16 }
 0x101   :  { %v289_v22 = vadd.f32 %v268_v12, %v142_v20 }
 0x103   :  { %1369 = vtanh.f32 %v289_v22  ;;  %v1305_v49 = vmul.f32 -1.442695, %v289_v22 }
 0x105   :  { %1371 = vpow2.f32 %v1305_v49 }
 0x106   :  { %v1724_v23 = vpop.f32.mrf.mxu0  ;;  %v172_v24 = vpop.f32.mrf.mxu1 }
 0x107   :  { %v1726_v25 = vadd.f32 %v172_v24, %v96_v16 }
 0x109   :  { %v1370_v27 = vpop.eup %1369 }
 0x10a   :  { %317 = vrot.lane.b32.xlu2 %v1370_v27, %s1499_s0 }
 0x10b   :  { %v1372_v55 = vpop.eup %1371 }
 0x10c   :  { %v298_v57 = vadd.f32 1.0, %v1372_v55 }
 0x10e   :  { %v1729_v28 = vpop.f32.mrf.mxu0  ;;  %v175_v29 = vpop.f32.mrf.mxu1  ;;  %v310_v63 = vand.u32 2147483648, %v298_v57  ;;  %vm304_vm2 = vweird.f32 %v298_v57  ;;  %v308_v0 = vand.u32 2147483647, %v298_v57 }
 0x10f   :  { %v1731_v30 = vadd.f32 %v175_v29, %v96_v16 }
 0x110   :  { %v311_v2 = vor.u32 1.1754944e-38, %v310_v63  ;;  %vm309_vm4 = vcmp.eq.f32.partialorder %v308_v0, 8.507059e+37 }
 0x116   :  { %v1733_v32 = vpop.f32.mrf.mxu0  ;;  %v177_v33 = vpop.f32.mrf.mxu1 }
 0x117   :  { %v1735_v34 = vadd.f32 %v177_v33, %v96_v16 }
 0x11e   :  { %v1737_v37 = vpop.f32.mrf.mxu0  ;;  %v180_v38 = vpop.f32.mrf.mxu1 }
 0x11f   :  { %v1739_v39 = vadd.f32 %v180_v38, %v96_v16 }
 0x126   :  { %v153_v40 = vpop.f32.mrf.mxu0  ;;  %v182_v41 = vpop.f32.mrf.mxu1 }
 0x127   :  { %v1742_v42 = vadd.f32 %v153_v40, %v1719_v15  ;;  %v1744_v43 = vadd.f32 %v182_v41, %v96_v16 }
 0x12e   :  { %v156_v44 = vpop.f32.mrf.mxu0  ;;  %v185_v45 = vpop.f32.mrf.mxu1 }
 0x12f   :  { %v1747_v46 = vadd.f32 %v156_v44, %v1719_v15  ;;  %v1749_v48 = vadd.f32 %v185_v45, %v96_v16 }
 0x136   :  { %v187_v51 = vpop.f32.mrf.mxu1 }
 0x137   :  { %v188_v52 = vadd.f32 %v187_v51, %v96_v16 }
 0x139   :  { %v294_v54 = vadd.f32 %v281_v31, %v188_v52 }
 0x13b   :  { %1373 = vtanh.f32 %v294_v54  ;;  %v1306_v6 = vmul.f32 -1.442695, %v294_v54 }
 0x13c   :  { %1375 = vrcp.f32 %v298_v57 }
 0x13d   :  { %1377 = vpow2.f32 %v1306_v6 }
 0x141   :  { %v1374_v56 = vpop.eup %1373 }
 0x142   :  { %354 = vrot.lane.b32.xlu0 %v1374_v56, %s1499_s0  ;;  %v1376_v58 = vpop.eup %1375 }
 0x143   :  { %v300_v59 = vmul.f32 %v1376_v58, %v298_v57  ;;  %vm305_vm1 = vweird.f32 %v1376_v58  ;;  %v1378_v7 = vpop.eup %1377 }
 0x144   :  { %vm306_vm3 = vmor %vm304_vm2, %vm305_vm1  ;;  %v335_v9 = vadd.f32 1.0, %v1378_v7 }
 0x145   :  { %v301_v60 = vsub.f32 1.0, %v300_v59  ;;  %v144_v59 = vadd.f32 %v1724_v23, %v1719_v15 }
 0x146   :  { %1379 = vrcp.f32 %v335_v9  ;;  %v347_v18 = vand.u32 2147483648, %v335_v9  ;;  %vm341_vm6 = vweird.f32 %v335_v9  ;;  %v345_v19 = vand.u32 2147483647, %v335_v9 }
 0x147   :  { %v302_v61 = vmul.f32 %v1376_v58, %v301_v60 }
 0x148   :  { %v348_v22 = vor.u32 1.1754944e-38, %v347_v18  ;;  %vm346_vm8 = vcmp.eq.f32.partialorder %v345_v19, 8.507059e+37 }
 0x149   :  { %v303_v62 = vadd.f32 %v1376_v58, %v302_v61 }
 0x14b   :  { %v307_v1 = vsel %vm306_vm3, %v1376_v58, %v303_v62 }
 0x14c   :  { %v312_v4 = vsel %vm309_vm4, %v311_v2, %v307_v1  ;;  %v1380_v10 = vpop.eup %1379 }
 0x14d   :  { %v337_v12 = vmul.f32 %v1380_v10, %v335_v9  ;;  %vm342_vm5 = vweird.f32 %v1380_v10  ;;  %v315_v31 = vmul.f32 0.0, %v312_v4 }
 0x14e   :  { %vm343_vm7 = vmor %vm341_vm6, %vm342_vm5 }
 0x14f   :  { %v338_v13 = vsub.f32 1.0, %v337_v12 }
 0x151   :  { %v339_v14 = vmul.f32 %v1380_v10, %v338_v13 }
 0x153   :  { %v340_v16 = vadd.f32 %v1380_v10, %v339_v14 }
 0x155   :  { %v344_v20 = vsel %vm343_vm7, %v1380_v10, %v340_v16 }
 0x156   :  { %v349_v27 = vsel %vm346_vm8, %v348_v22, %v344_v20 }
 0x157   :  { %v352_v40 = vmul.f32 0.0, %v349_v27 }
 0x164   :  { %v318_v3 = vpop.permute.xlu2 %317 }
 0x165   :  { %v320_v5 = vmul.f32 %v318_v3, %v312_v4 }
 0x167   :  { %322 = vrot.lane.b32.xlu1 %v320_v5, %s1499_s0 }
 0x1b4   :  { %v355_v24 = vpop.permute.xlu0 %354 }
 0x1b5   :  { %v357_v29 = vmul.f32 %v355_v24, %v349_v27 }
 0x1b7   :  { %359 = vrot.lane.b32.xlu2 %v357_v29, %s1499_s0 }
 0x1d9   :  { %v323_v33 = vpop.permute.xlu1 %322 }
 0x1da   :  { %v1754_v35 = vadd.f32 %v323_v33, %v315_v31 }
 0x1dc   :  { %1381 = vtanh.f32 %v1754_v35 }
 0x1e2   :  { %v1382_v38 = vpop.eup %1381 }
 0x1e3   :  { %328 = vrot.lane.b32.xlu0 %v1382_v38, %s1499_s0 }
 0x211   :  { %v360_v41 = vpop.permute.xlu2 %359 }
 0x212   :  { %v1758_v44 = vadd.f32 %v360_v41, %v352_v40 }
 0x214   :  { %1383 = vtanh.f32 %v1758_v44 }
 0x21a   :  { %v1384_v45 = vpop.eup %1383 }
 0x21b   :  { %365 = vrot.lane.b32.xlu1 %v1384_v45, %s1499_s0 }
 0x255   :  { %v329_v49 = vpop.permute.xlu0 %328 }
 0x256   :  { %v331_v51 = vmul.f32 %v329_v49, %v312_v4 }
 0x258   :  { %370 = vrot.lane.b32.xlu2 %v331_v51, %s1500_s3 }
 0x28d   :  { %v366_v52 = vpop.permute.xlu1 %365 }
 0x28e   :  { %v368_v54 = vmul.f32 %v366_v52, %v349_v27 }
 0x290   :  { %375 = vrot.lane.b32.xlu0 %v368_v54, %s1501_s20 }
 0x2b2   :  { %v371_v55 = vpop.permute.xlu2 %370 }
 0x2b3   :  { %373 = vst.msk [vmem:[%s2005_s5] sm:$0xff] %vm119_vm0, %v371_v55 }
 0x302   :  { %v376_v56 = vpop.permute.xlu0 %375 }
 0x303   :  { %1307 = vst.msk [vmem:[%s2005_s5 + $0x38] sm:$0xff] %vm379_vm9, %v376_v56  ;;  %v381_v57 = vsel %vm119_vm0, %v371_v55, %v376_v56 }
 0x304   :  { %v382_v58 = vpack.c.bf16 %v381_v57, %v381_v57 }
 0x306   :  { %1308 = vmatmul.msk.bf16.vlgmr.msrb.gmra.mxu2 %vm255_vm10, %v382_v58  ;;  %1309 = vmatmul.msk.bf16.vlgmr.msrb.gmra.mxu3 %vm255_vm10, %v382_v58 }
 0x307   :  { %657 = vmatpush.bf16.msrb.mxu3 %v1633_v36  ;;  %644 = vmatpush.bf16.msrb.mxu2 %v1553_v8 }
 0x30b   :  { %658 = vmatpush.bf16.msrb.mxu3 %v1650_v47  ;;  %645 = vmatpush.bf16.msrb.mxu2 %v1562_v11 }
 0x30f   :  { %659 = vmatpush.bf16.msrb.mxu3 %v1661_v50  ;;  %646 = vmatpush.bf16.msrb.mxu2 %v1580_v17 }
 0x313   :  { %660 = vmatpush.bf16.msrb.mxu3 %v1672_v53  ;;  %647 = vmatpush.bf16.msrb.mxu2 %v1601_v26 }
 0x389   :  { %v395_v60 = vpop.f32.mrf.mxu2  ;;  %v408_v61 = vpop.f32.mrf.mxu3 }
 0x38a   :  { %v416_v62 = vadd.f32 %v395_v60, %v144_v59  ;;  %v421_v63 = vadd.f32 %v408_v61, %v1749_v48 }
 0x38c   :  { %1385 = vtanh.f32 %v416_v62  ;;  %v1311_v4 = vmul.f32 -1.442695, %v421_v63  ;;  %v1310_v7 = vmul.f32 -1.442695, %v416_v62 }
 0x38d   :  { %1387 = vtanh.f32 %v421_v63 }
 0x38e   :  { %1389 = vpow2.f32 %v1311_v4 }
 0x391   :  { %v397_v0 = vpop.f32.mrf.mxu2  ;;  %v410_v1 = vpop.f32.mrf.mxu3 }
 0x392   :  { %v1386_v2 = vpop.eup %1385 }
 0x393   :  { %v1388_v3 = vpop.eup %1387  ;;  %444 = vrot.lane.b32.xlu1 %v1386_v2, %s1499_s0 }
 0x394   :  { %481 = vrot.lane.b32.xlu2 %v1388_v3, %s1499_s0  ;;  %v1390_v5 = vpop.eup %1389 }
 0x395   :  { %v462_v6 = vadd.f32 1.0, %v1390_v5 }
 0x397   :  { %1391 = vrcp.f32 %v462_v6  ;;  %v474_v16 = vand.u32 2147483648, %v462_v6  ;;  %vm468_vm12 = vweird.f32 %v462_v6  ;;  %v472_v18 = vand.u32 2147483647, %v462_v6 }
 0x398   :  { %1393 = vpow2.f32 %v1310_v7 }
 0x399   :  { %v475_v20 = vor.u32 1.1754944e-38, %v474_v16  ;;  %vm473_vm14 = vcmp.eq.f32.partialorder %v472_v18, 8.507059e+37 }
 0x39d   :  { %v1392_v23 = vpop.eup %1391 }
 0x39e   :  { %v464_v9 = vmul.f32 %v1392_v23, %v462_v6  ;;  %v1394_v10 = vpop.eup %1393  ;;  %vm469_vm11 = vweird.f32 %v1392_v23  ;;  %v147_v6 = vadd.f32 %v1729_v28, %v1719_v15 }
 0x39f   :  { %v425_v13 = vadd.f32 1.0, %v1394_v10  ;;  %vm470_vm13 = vmor %vm468_vm12, %vm469_vm11 }
 0x3a0   :  { %v465_v48 = vsub.f32 1.0, %v464_v9 }
 0x3a1   :  { %1395 = vrcp.f32 %v425_v13  ;;  %v437_v41 = vand.u32 2147483648, %v425_v13  ;;  %vm431_vm1 = vweird.f32 %v425_v13  ;;  %v435_v45 = vand.u32 2147483647, %v425_v13 }
 0x3a2   :  { %v466_v12 = vmul.f32 %v1392_v23, %v465_v48 }
 0x3a3   :  { %v438_v51 = vor.u32 1.1754944e-38, %v437_v41  ;;  %vm436_vm3 = vcmp.eq.f32.partialorder %v435_v45, 8.507059e+37 }
 0x3a4   :  { %v467_v14 = vadd.f32 %v1392_v23, %v466_v12 }
 0x3a6   :  { %v471_v19 = vsel %vm470_vm13, %v1392_v23, %v467_v14 }
 0x3a7   :  { %v476_v24 = vsel %vm473_vm14, %v475_v20, %v471_v19  ;;  %v1396_v27 = vpop.eup %1395 }
 0x3a8   :  { %v427_v31 = vmul.f32 %v1396_v27, %v425_v13  ;;  %vm432_vm15 = vweird.f32 %v1396_v27  ;;  %v479_v56 = vmul.f32 %v476_v24, %v1758_v44 }
 0x3a9   :  { %vm433_vm2 = vmor %vm431_vm1, %vm432_vm15 }
 0x3aa   :  { %v428_v33 = vsub.f32 1.0, %v427_v31 }
 0x3ac   :  { %v429_v38 = vmul.f32 %v1396_v27, %v428_v33 }
 0x3ae   :  { %v430_v40 = vadd.f32 %v1396_v27, %v429_v38 }
 0x3b0   :  { %v434_v49 = vsel %vm433_vm2, %v1396_v27, %v430_v40 }
 0x3b1   :  { %v439_v54 = vsel %vm436_vm3, %v438_v51, %v434_v49 }
 0x3b2   :  { %v442_v60 = vmul.f32 %v439_v54, %v1754_v35 }
 0x3ee   :  { %v482_v22 = vpop.permute.xlu2 %481 }
 0x3ef   :  { %v484_v29 = vmul.f32 %v482_v22, %v476_v24 }
 0x3f1   :  { %486 = vrot.lane.b32.xlu1 %v484_v29, %s1499_s0 }
 0x405   :  { %v445_v52 = vpop.permute.xlu1 %444 }
 0x406   :  { %v447_v55 = vmul.f32 %v445_v52, %v439_v54 }
 0x408   :  { %449 = vrot.lane.b32.xlu0 %v447_v55, %s1499_s0 }
 0x463   :  { %v487_v57 = vpop.permute.xlu1 %486 }
 0x464   :  { %v1791_v58 = vadd.f32 %v487_v57, %v479_v56 }
 0x466   :  { %1397 = vtanh.f32 %v1791_v58 }
 0x46c   :  { %v1398_v59 = vpop.eup %1397 }
 0x46d   :  { %492 = vrot.lane.b32.xlu0 %v1398_v59, %s1499_s0 }
 0x47a   :  { %v450_v61 = vpop.permute.xlu0 %449 }
 0x47b   :  { %v1796_v62 = vadd.f32 %v450_v61, %v442_v60 }
 0x47d   :  { %1399 = vtanh.f32 %v1796_v62 }
 0x483   :  { %v1400_v63 = vpop.eup %1399 }
 0x484   :  { %455 = vrot.lane.b32.xlu2 %v1400_v63, %s1499_s0 }
 0x4de   :  { %v456_v0 = vpop.permute.xlu2 %455 }
 0x4df   :  { %v493_v44 = vpop.permute.xlu0 %492  ;;  %v458_v1 = vmul.f32 %v456_v0, %v439_v54 }
 0x4e0   :  { %v495_v2 = vmul.f32 %v493_v44, %v476_v24 }
 0x4e1   :  { %497 = vrot.lane.b32.xlu1 %v458_v1, %s1500_s3 }
 0x4e2   :  { %503 = vrot.lane.b32.xlu2 %v495_v2, %s1501_s20 }
 0x53c   :  { %v504_v3 = vpop.permute.xlu2 %503 }
 0x53d   :  { %1313 = vst.msk [vmem:[%s2005_s5 + $0x30] sm:$0xff] %vm379_vm9, %v504_v3 }
 0x553   :  { %v498_v35 = vpop.permute.xlu1 %497 }
 0x554   :  { %1312 = vst.msk [vmem:[%s2005_s5 + $0x8] sm:$0xff] %vm119_vm0, %v498_v35  ;;  %v508_v4 = vsel %vm119_vm0, %v498_v35, %v504_v3 }
 0x555   :  { %v509_v5 = vpack.c.bf16 %v508_v4, %v508_v4 }
 0x557   :  { %1314 = vmatmul.msk.bf16.vlgmr.msra.gmra.mxu2 %vm255_vm10, %v509_v5  ;;  %1315 = vmatmul.msk.bf16.vlgmr.msra.gmra.mxu3 %vm255_vm10, %v509_v5 }
 0x558   :  { %890 = vmatpush.bf16.msra.mxu2 %v1553_v8  ;;  %903 = vmatpush.bf16.msra.mxu3 %v1633_v36 }
 0x55c   :  { %891 = vmatpush.bf16.msra.mxu2 %v1562_v11  ;;  %904 = vmatpush.bf16.msra.mxu3 %v1650_v47 }
 0x560   :  { %892 = vmatpush.bf16.msra.mxu2 %v1580_v17  ;;  %905 = vmatpush.bf16.msra.mxu3 %v1661_v50 }
 0x564   :  { %893 = vmatpush.bf16.msra.mxu2 %v1601_v26  ;;  %906 = vmatpush.bf16.msra.mxu3 %v1672_v53 }
 0x5da   :  { %v522_v23 = vpop.f32.mrf.mxu2  ;;  %v535_v7 = vpop.f32.mrf.mxu3 }
 0x5db   :  { %v543_v9 = vadd.f32 %v522_v23, %v147_v6  ;;  %v548_v48 = vadd.f32 %v535_v7, %v1744_v43 }
 0x5dd   :  { %1401 = vtanh.f32 %v543_v9  ;;  %v1316_v16 = vmul.f32 -1.442695, %v543_v9  ;;  %v1317_v18 = vmul.f32 -1.442695, %v548_v48 }
 0x5de   :  { %1403 = vtanh.f32 %v548_v48 }
 0x5df   :  { %1405 = vpow2.f32 %v1316_v16  ;;  %v149_v16 = vadd.f32 %v1733_v32, %v1719_v15 }
 0x5e0   :  { %1407 = vpow2.f32 %v1317_v18 }
 0x5e2   :  { %v524_v10 = vpop.f32.mrf.mxu2  ;;  %v537_v12 = vpop.f32.mrf.mxu3 }
 0x5e3   :  { %v1402_v13 = vpop.eup %1401 }
 0x5e4   :  { %v1404_v14 = vpop.eup %1403  ;;  %571 = vrot.lane.b32.xlu0 %v1402_v13, %s1499_s0 }
 0x5e5   :  { %608 = vrot.lane.b32.xlu1 %v1404_v14, %s1499_s0  ;;  %v1406_v28 = vpop.eup %1405 }
 0x5e6   :  { %v1408_v19 = vpop.eup %1407  ;;  %v552_v20 = vadd.f32 1.0, %v1406_v28 }
 0x5e7   :  { %v589_v22 = vadd.f32 1.0, %v1408_v19 }
 0x5e8   :  { %1409 = vrcp.f32 %v552_v20  ;;  %v564_v49 = vand.u32 2147483648, %v552_v20  ;;  %vm558_vm6 = vweird.f32 %v552_v20  ;;  %v562_v52 = vand.u32 2147483647, %v552_v20 }
 0x5e9   :  { %1411 = vrcp.f32 %v589_v22  ;;  %v601_v51 = vand.u32 2147483648, %v589_v22  ;;  %vm595_vm7 = vweird.f32 %v589_v22  ;;  %v599_v54 = vand.u32 2147483647, %v589_v22 }
 0x5ea   :  { %v565_v57 = vor.u32 1.1754944e-38, %v564_v49  ;;  %vm563_vm12 = vcmp.eq.f32.partialorder %v562_v52, 8.507059e+37 }
 0x5eb   :  { %v602_v59 = vor.u32 1.1754944e-38, %v601_v51  ;;  %vm600_vm13 = vcmp.eq.f32.partialorder %v599_v54, 8.507059e+37 }
 0x5ee   :  { %v1410_v43 = vpop.eup %1409 }
 0x5ef   :  { %v1412_v24 = vpop.eup %1411  ;;  %v554_v27 = vmul.f32 %v1410_v43, %v552_v20  ;;  %vm559_vm4 = vweird.f32 %v1410_v43 }
 0x5f0   :  { %v591_v29 = vmul.f32 %v1412_v24, %v589_v22  ;;  %vm596_vm5 = vweird.f32 %v1412_v24  ;;  %vm560_vm8 = vmor %vm558_vm6, %vm559_vm4 }
 0x5f1   :  { %v555_v31 = vsub.f32 1.0, %v554_v27  ;;  %vm597_vm11 = vmor %vm595_vm7, %vm596_vm5 }
 0x5f2   :  { %v592_v33 = vsub.f32 1.0, %v591_v29 }
 0x5f3   :  { %v556_v38 = vmul.f32 %v1410_v43, %v555_v31 }
 0x5f4   :  { %v593_v40 = vmul.f32 %v1412_v24, %v592_v33 }
 0x5f5   :  { %v557_v41 = vadd.f32 %v1410_v43, %v556_v38 }
 0x5f6   :  { %v594_v45 = vadd.f32 %v1412_v24, %v593_v40 }
 0x5f7   :  { %v561_v55 = vsel %vm560_vm8, %v1410_v43, %v557_v41 }
 0x5f8   :  { %v598_v56 = vsel %vm597_vm11, %v1412_v24, %v594_v45  ;;  %v566_v61 = vsel %vm563_vm12, %v565_v57, %v561_v55 }
 0x5f9   :  { %v603_v0 = vsel %vm600_vm13, %v602_v59, %v598_v56  ;;  %v569_v2 = vmul.f32 %v566_v61, %v1796_v62 }
 0x5fa   :  { %v606_v5 = vmul.f32 %v603_v0, %v1791_v58 }
 0x656   :  { %v572_v60 = vpop.permute.xlu0 %571 }
 0x657   :  { %v609_v63 = vpop.permute.xlu1 %608  ;;  %v574_v44 = vmul.f32 %v572_v60, %v566_v61 }
 0x658   :  { %v611_v1 = vmul.f32 %v609_v63, %v603_v0 }
 0x659   :  { %576 = vrot.lane.b32.xlu2 %v574_v44, %s1499_s0 }
 0x65a   :  { %613 = vrot.lane.b32.xlu0 %v611_v1, %s1499_s0 }
 0x6b3   :  { %v577_v3 = vpop.permute.xlu2 %576 }
 0x6b4   :  { %v1829_v35 = vadd.f32 %v577_v3, %v569_v2 }
 0x6b6   :  { %1413 = vtanh.f32 %v1829_v35 }
 0x6bc   :  { %v1414_v4 = vpop.eup %1413 }
 0x6bd   :  { %582 = vrot.lane.b32.xlu1 %v1414_v4, %s1499_s0 }
 0x6cc   :  { %v614_v6 = vpop.permute.xlu0 %613 }
 0x6cd   :  { %v1834_v23 = vadd.f32 %v614_v6, %v606_v5 }
 0x6cf   :  { %1415 = vtanh.f32 %v1834_v23 }
 0x6d5   :  { %v1416_v7 = vpop.eup %1415 }
 0x6d6   :  { %619 = vrot.lane.b32.xlu2 %v1416_v7, %s1499_s0 }
 0x72f   :  { %v583_v9 = vpop.permute.xlu1 %582 }
 0x730   :  { %v620_v62 = vpop.permute.xlu2 %619  ;;  %v585_v48 = vmul.f32 %v583_v9, %v566_v61 }
 0x731   :  { %v622_v10 = vmul.f32 %v620_v62, %v603_v0 }
 0x732   :  { %624 = vrot.lane.b32.xlu0 %v585_v48, %s1500_s3 }
 0x733   :  { %630 = vrot.lane.b32.xlu1 %v622_v10, %s1501_s20 }
 0x7a4   :  { %v625_v12 = vpop.permute.xlu0 %624 }
 0x7a5   :  { %1318 = vst.msk [vmem:[%s2005_s5 + $0x10] sm:$0xff] %vm119_vm0, %v625_v12  ;;  %v631_v58 = vpop.permute.xlu1 %630 }
 0x7a6   :  { %1319 = vst.msk [vmem:[%s2005_s5 + $0x28] sm:$0xff] %vm379_vm9, %v631_v58  ;;  %v635_v13 = vsel %vm119_vm0, %v625_v12, %v631_v58 }
 0x7a7   :  { %v636_v14 = vpack.c.bf16 %v635_v13, %v635_v13 }
 0x7a9   :  { %1320 = vmatmul.msk.bf16.vlgmr.msrb.gmra.mxu2 %vm255_vm10, %v636_v14  ;;  %1321 = vmatmul.msk.bf16.vlgmr.msrb.gmra.mxu3 %vm255_vm10, %v636_v14  ;;  %v1889_v14 = vpop.f32.mrf.mxu0 }
 0x7aa   :  { %1128 = vmatpush.bf16.msrb.mxu2 %v1553_v8  ;;  %1141 = vmatpush.bf16.msrb.mxu3 %v1633_v36 }
 0x7ae   :  { %1129 = vmatpush.bf16.msrb.mxu2 %v1562_v11  ;;  %1142 = vmatpush.bf16.msrb.mxu3 %v1650_v47 }
 0x7b2   :  { %1130 = vmatpush.bf16.msrb.mxu2 %v1580_v17  ;;  %1143 = vmatpush.bf16.msrb.mxu3 %v1661_v50 }
 0x7b6   :  { %1131 = vmatpush.bf16.msrb.mxu2 %v1601_v26  ;;  %1144 = vmatpush.bf16.msrb.mxu3 %v1672_v53 }
 0x82c   :  { %v649_v18 = vpop.f32.mrf.mxu2  ;;  %v662_v28 = vpop.f32.mrf.mxu3 }
 0x82d   :  { %v670_v8 = vadd.f32 %v649_v18, %v149_v16  ;;  %v675_v36 = vadd.f32 %v662_v28, %v1739_v39  ;;  %v152_v16 = vadd.f32 %v1737_v37, %v1719_v15 }
 0x82f   :  { %1417 = vtanh.f32 %v670_v8  ;;  %v1322_v26 = vmul.f32 -1.442695, %v670_v8  ;;  %v1323_v20 = vmul.f32 -1.442695, %v675_v36 }
 0x830   :  { %1419 = vtanh.f32 %v675_v36 }
 0x831   :  { %1421 = vpow2.f32 %v1322_v26 }
 0x834   :  { %v651_v11 = vpop.f32.mrf.mxu2  ;;  %v664_v47 = vpop.f32.mrf.mxu3 }
 0x835   :  { %v1418_v19 = vpop.eup %1417 }
 0x836   :  { %v1420_v17 = vpop.eup %1419  ;;  %698 = vrot.lane.b32.xlu2 %v1418_v19, %s1499_s0 }
 0x837   :  { %735 = vrot.lane.b32.xlu0 %v1420_v17, %s1499_s0  ;;  %v1422_v50 = vpop.eup %1421 }
 0x838   :  { %v679_v53 = vadd.f32 1.0, %v1422_v50 }
 0x83a   :  { %1423 = vrcp.f32 %v679_v53  ;;  %v691_v31 = vand.u32 2147483648, %v679_v53  ;;  %vm685_vm15 = vweird.f32 %v679_v53  ;;  %v689_v33 = vand.u32 2147483647, %v679_v53 }
 0x83b   :  { %1425 = vpow2.f32 %v1323_v20 }
 0x83c   :  { %v692_v40 = vor.u32 1.1754944e-38, %v691_v31  ;;  %vm690_vm2 = vcmp.eq.f32.partialorder %v689_v33, 8.507059e+37 }
 0x840   :  { %v1424_v32 = vpop.eup %1423 }
 0x841   :  { %v681_v22 = vmul.f32 %v1424_v32, %v679_v53  ;;  %v1426_v24 = vpop.eup %1425  ;;  %vm686_vm14 = vweird.f32 %v1424_v32 }
 0x842   :  { %v716_v27 = vadd.f32 1.0, %v1426_v24  ;;  %vm687_vm1 = vmor %vm685_vm15, %vm686_vm14 }
 0x843   :  { %v682_v39 = vsub.f32 1.0, %v681_v22 }
 0x844   :  { %1427 = vrcp.f32 %v716_v27  ;;  %v728_v57 = vand.u32 2147483648, %v716_v27  ;;  %vm722_vm4 = vweird.f32 %v716_v27  ;;  %v726_v59 = vand.u32 2147483647, %v716_v27 }
 0x845   :  { %v683_v43 = vmul.f32 %v1424_v32, %v682_v39 }
 0x846   :  { %v729_v61 = vor.u32 1.1754944e-38, %v728_v57  ;;  %vm727_vm6 = vcmp.eq.f32.partialorder %v726_v59, 8.507059e+37 }
 0x847   :  { %v684_v29 = vadd.f32 %v1424_v32, %v683_v43 }
 0x849   :  { %v688_v38 = vsel %vm687_vm1, %v1424_v32, %v684_v29 }
 0x84a   :  { %v693_v45 = vsel %vm690_vm2, %v692_v40, %v688_v38  ;;  %v1428_v51 = vpop.eup %1427 }
 0x84b   :  { %v718_v52 = vmul.f32 %v1428_v51, %v716_v27  ;;  %vm723_vm3 = vweird.f32 %v1428_v51  ;;  %v696_v1 = vmul.f32 %v693_v45, %v1829_v35 }
 0x84c   :  { %vm724_vm5 = vmor %vm722_vm4, %vm723_vm3 }
 0x84d   :  { %v719_v54 = vsub.f32 1.0, %v718_v52 }
 0x84f   :  { %v720_v55 = vmul.f32 %v1428_v51, %v719_v54 }
 0x851   :  { %v721_v56 = vadd.f32 %v1428_v51, %v720_v55 }
 0x853   :  { %v725_v60 = vsel %vm724_vm5, %v1428_v51, %v721_v56 }
 0x854   :  { %v730_v0 = vsel %vm727_vm6, %v729_v61, %v725_v60 }
 0x855   :  { %v733_v2 = vmul.f32 %v730_v0, %v1834_v23 }
 0x890   :  { %v699_v41 = vpop.permute.xlu2 %698 }
 0x891   :  { %v701_v49 = vmul.f32 %v699_v41, %v693_v45 }
 0x893   :  { %703 = vrot.lane.b32.xlu1 %v701_v49, %s1499_s0 }
 0x8a9   :  { %v736_v63 = vpop.permute.xlu0 %735 }
 0x8aa   :  { %v738_v44 = vmul.f32 %v736_v63, %v730_v0 }
 0x8ac   :  { %740 = vrot.lane.b32.xlu2 %v738_v44, %s1499_s0 }
 0x905   :  { %v704_v3 = vpop.permute.xlu1 %703 }
 0x906   :  { %v741_v4 = vpop.permute.xlu2 %740  ;;  %v1868_v5 = vadd.f32 %v704_v3, %v696_v1 }
 0x907   :  { %v1870_v6 = vadd.f32 %v741_v4, %v733_v2 }
 0x908   :  { %1429 = vtanh.f32 %v1868_v5 }
 0x909   :  { %1431 = vtanh.f32 %v1870_v6 }
 0x90e   :  { %v1430_v7 = vpop.eup %1429 }
 0x90f   :  { %v1432_v9 = vpop.eup %1431  ;;  %709 = vrot.lane.b32.xlu0 %v1430_v7, %s1499_s0 }
 0x910   :  { %746 = vrot.lane.b32.xlu1 %v1432_v9, %s1499_s0 }
 0x981   :  { %v710_v62 = vpop.permute.xlu0 %709 }
 0x982   :  { %v747_v35 = vpop.permute.xlu1 %746  ;;  %v712_v48 = vmul.f32 %v710_v62, %v693_v45 }
 0x983   :  { %v749_v23 = vmul.f32 %v747_v35, %v730_v0 }
 0x984   :  { %751 = vrot.lane.b32.xlu2 %v712_v48, %s1500_s3 }
 0x985   :  { %757 = vrot.lane.b32.xlu0 %v749_v23, %s1501_s20 }
 0x9de   :  { %v752_v10 = vpop.permute.xlu2 %751 }
 0x9df   :  { %1324 = vst.msk [vmem:[%s2005_s5 + $0x18] sm:$0xff] %vm119_vm0, %v752_v10 }
 0x9f7   :  { %v758_v12 = vpop.permute.xlu0 %757 }
 0x9f8   :  { %1325 = vst.msk [vmem:[%s2005_s5 + $0x20] sm:$0xff] %vm379_vm9, %v758_v12  ;;  %v762_v58 = vsel %vm119_vm0, %v752_v10, %v758_v12 }
 0x9f9   :  { %v763_v13 = vpack.c.bf16 %v762_v58, %v762_v58 }
 0x9fb   :  { %1326 = vmatmul.msk.bf16.vlgmr.msrb.gmra.mxu0 %vm255_vm10, %v763_v13  ;;  %1327 = vmatmul.msk.bf16.vlgmr.msrb.gmra.mxu1 %vm255_vm10, %v763_v13 }
 0xa78   :  { %v776_v18 = vpop.f32.mrf.mxu0  ;;  %v789_v28 = vpop.f32.mrf.mxu1 }
 0xa79   :  { %v794_v8 = vadd.f32 %v776_v18, %v152_v16  ;;  %v796_v36 = vadd.f32 %v789_v28, %v1735_v34 }
 0xa7b   :  { %1433 = vtanh.f32 %v794_v8  ;;  %v1329_v26 = vmul.f32 -1.442695, %v796_v36  ;;  %v1328_v32 = vmul.f32 -1.442695, %v794_v8 }
 0xa7c   :  { %1435 = vtanh.f32 %v796_v36 }
 0xa7d   :  { %1437 = vpow2.f32 %v1329_v26 }
 0xa80   :  { %v778_v11 = vpop.f32.mrf.mxu0  ;;  %v791_v47 = vpop.f32.mrf.mxu1 }
 0xa81   :  { %v1434_v19 = vpop.eup %1433 }
 0xa82   :  { %v1436_v17 = vpop.eup %1435  ;;  %819 = vrot.lane.b32.xlu1 %v1434_v19, %s1499_s0 }
 0xa83   :  { %856 = vrot.lane.b32.xlu2 %v1436_v17, %s1499_s0  ;;  %v1438_v50 = vpop.eup %1437 }
 0xa84   :  { %v837_v53 = vadd.f32 1.0, %v1438_v50 }
 0xa86   :  { %1439 = vrcp.f32 %v837_v53  ;;  %v849_v27 = vand.u32 2147483648, %v837_v53  ;;  %vm843_vm8 = vweird.f32 %v837_v53  ;;  %v847_v29 = vand.u32 2147483647, %v837_v53 }
 0xa87   :  { %1441 = vpow2.f32 %v1328_v32 }
 0xa88   :  { %v850_v33 = vor.u32 1.1754944e-38, %v849_v27  ;;  %vm848_vm12 = vcmp.eq.f32.partialorder %v847_v29, 8.507059e+37 }
 0xa8c   :  { %v1440_v37 = vpop.eup %1439 }
 0xa8d   :  { %v839_v20 = vmul.f32 %v1440_v37, %v837_v53  ;;  %v1442_v22 = vpop.eup %1441  ;;  %vm844_vm7 = vweird.f32 %v1440_v37 }
 0xa8e   :  { %v800_v43 = vadd.f32 1.0, %v1442_v22  ;;  %vm845_vm11 = vmor %vm843_vm8, %vm844_vm7 }
 0xa8f   :  { %v840_v34 = vsub.f32 1.0, %v839_v20 }
 0xa90   :  { %1443 = vrcp.f32 %v800_v43  ;;  %v812_v55 = vand.u32 2147483648, %v800_v43  ;;  %vm806_vm14 = vweird.f32 %v800_v43  ;;  %v810_v56 = vand.u32 2147483647, %v800_v43 }
 0xa91   :  { %v841_v39 = vmul.f32 %v1440_v37, %v840_v34 }
 0xa92   :  { %v813_v59 = vor.u32 1.1754944e-38, %v812_v55  ;;  %vm811_vm1 = vcmp.eq.f32.partialorder %v810_v56, 8.507059e+37 }
 0xa93   :  { %v842_v24 = vadd.f32 %v1440_v37, %v841_v39 }
 0xa95   :  { %v846_v31 = vsel %vm845_vm11, %v1440_v37, %v842_v24 }
 0xa96   :  { %v851_v40 = vsel %vm848_vm12, %v850_v33, %v846_v31  ;;  %v1444_v41 = vpop.eup %1443 }
 0xa97   :  { %v802_v49 = vmul.f32 %v1444_v41, %v800_v43  ;;  %vm807_vm13 = vweird.f32 %v1444_v41  ;;  %v854_v0 = vmul.f32 %v851_v40, %v1870_v6 }
 0xa98   :  { %vm808_vm15 = vmor %vm806_vm14, %vm807_vm13 }
 0xa99   :  { %v803_v51 = vsub.f32 1.0, %v802_v49 }
 0xa9b   :  { %v804_v52 = vmul.f32 %v1444_v41, %v803_v51 }
 0xa9d   :  { %v805_v54 = vadd.f32 %v1444_v41, %v804_v52 }
 0xa9f   :  { %v809_v57 = vsel %vm808_vm15, %v1444_v41, %v805_v54 }
 0xaa0   :  { %v814_v61 = vsel %vm811_vm1, %v813_v59, %v809_v57 }
 0xaa1   :  { %v817_v3 = vmul.f32 %v814_v61, %v1868_v5 }
 0xadd   :  { %v857_v38 = vpop.permute.xlu2 %856 }
 0xade   :  { %v859_v45 = vmul.f32 %v857_v38, %v851_v40 }
 0xae0   :  { %861 = vrot.lane.b32.xlu1 %v859_v45, %s1499_s0 }
 0xaf4   :  { %v820_v60 = vpop.permute.xlu1 %819 }
 0xaf5   :  { %v822_v63 = vmul.f32 %v820_v60, %v814_v61 }
 0xaf7   :  { %824 = vrot.lane.b32.xlu0 %v822_v63, %s1499_s0 }
 0xb52   :  { %v862_v44 = vpop.permute.xlu1 %861 }
 0xb53   :  { %v1899_v1 = vadd.f32 %v862_v44, %v854_v0 }
 0xb55   :  { %1445 = vtanh.f32 %v1899_v1 }
 0xb5b   :  { %v1446_v2 = vpop.eup %1445 }
 0xb5c   :  { %867 = vrot.lane.b32.xlu0 %v1446_v2, %s1499_s0 }
 0xb69   :  { %v825_v4 = vpop.permute.xlu0 %824 }
 0xb6a   :  { %v1904_v7 = vadd.f32 %v825_v4, %v817_v3 }
 0xb6c   :  { %1447 = vtanh.f32 %v1904_v7 }
 0xb72   :  { %v1448_v9 = vpop.eup %1447 }
 0xb73   :  { %830 = vrot.lane.b32.xlu2 %v1448_v9, %s1499_s0 }
 0xbcd   :  { %v831_v62 = vpop.permute.xlu2 %830 }
 0xbce   :  { %v868_v6 = vpop.permute.xlu0 %867  ;;  %v833_v35 = vmul.f32 %v831_v62, %v814_v61 }
 0xbcf   :  { %v870_v48 = vmul.f32 %v868_v6, %v851_v40 }
 0xbd0   :  { %872 = vrot.lane.b32.xlu1 %v833_v35, %s1500_s3 }
 0xbd1   :  { %877 = vrot.lane.b32.xlu2 %v870_v48, %s1501_s20 }
 0xc2b   :  { %v878_v23 = vpop.permute.xlu2 %877 }
 0xc2c   :  { %1331 = vst.msk [vmem:[%s2005_s5 + $0x18] sm:$0xff] %vm379_vm9, %v878_v23 }
 0xc42   :  { %v873_v5 = vpop.permute.xlu1 %872 }
 0xc43   :  { %1330 = vst.msk [vmem:[%s2005_s5 + $0x20] sm:$0xff] %vm119_vm0, %v873_v5  ;;  %v881_v10 = vsel %vm119_vm0, %v873_v5, %v878_v23 }
 0xc44   :  { %v882_v12 = vpack.c.bf16 %v881_v10, %v881_v10 }
 0xc46   :  { %1332 = vmatmul.msk.bf16.vlgmr.msra.gmra.mxu2 %vm255_vm10, %v882_v12  ;;  %1333 = vmatmul.msk.bf16.vlgmr.msra.gmra.mxu3 %vm255_vm10, %v882_v12 }
 0xcc9   :  { %v895_v58 = vpop.f32.mrf.mxu2  ;;  %v908_v13 = vpop.f32.mrf.mxu3 }
 0xcca   :  { %v913_v16 = vadd.f32 %v895_v58, %v1742_v42  ;;  %v915_v18 = vadd.f32 %v908_v13, %v1731_v30 }
 0xccc   :  { %1449 = vtanh.f32 %v913_v16  ;;  %v1334_v47 = vmul.f32 -1.442695, %v913_v16  ;;  %v1335_v19 = vmul.f32 -1.442695, %v915_v18 }
 0xccd   :  { %1451 = vtanh.f32 %v915_v18 }
 0xcce   :  { %1453 = vpow2.f32 %v1334_v47 }
 0xccf   :  { %1455 = vpow2.f32 %v1335_v19 }
 0xcd1   :  { %v897_v28 = vpop.f32.mrf.mxu2  ;;  %v910_v8 = vpop.f32.mrf.mxu3 }
 0xcd2   :  { %v1450_v36 = vpop.eup %1449 }
 0xcd3   :  { %v1452_v11 = vpop.eup %1451  ;;  %938 = vrot.lane.b32.xlu0 %v1450_v36, %s1499_s0 }
 0xcd4   :  { %975 = vrot.lane.b32.xlu1 %v1452_v11, %s1499_s0  ;;  %v1454_v17 = vpop.eup %1453 }
 0xcd5   :  { %v1456_v26 = vpop.eup %1455  ;;  %v919_v50 = vadd.f32 1.0, %v1454_v17 }
 0xcd6   :  { %v956_v42 = vadd.f32 1.0, %v1456_v26 }
 0xcd7   :  { %1457 = vrcp.f32 %v919_v50  ;;  %v931_v27 = vand.u32 2147483648, %v919_v50  ;;  %vm925_vm4 = vweird.f32 %v919_v50  ;;  %v929_v31 = vand.u32 2147483647, %v919_v50 }
 0xcd8   :  { %1459 = vrcp.f32 %v956_v42  ;;  %v968_v29 = vand.u32 2147483648, %v956_v42  ;;  %vm962_vm5 = vweird.f32 %v956_v42  ;;  %v966_v33 = vand.u32 2147483647, %v956_v42 }
 0xcd9   :  { %v932_v41 = vor.u32 1.1754944e-38, %v931_v27  ;;  %vm930_vm8 = vcmp.eq.f32.partialorder %v929_v31, 8.507059e+37 }
 0xcda   :  { %v969_v45 = vor.u32 1.1754944e-38, %v968_v29  ;;  %vm967_vm11 = vcmp.eq.f32.partialorder %v966_v33, 8.507059e+37 }
 0xcdd   :  { %v1458_v30 = vpop.eup %1457 }
 0xcde   :  { %v1460_v53 = vpop.eup %1459  ;;  %v921_v37 = vmul.f32 %v1458_v30, %v919_v50  ;;  %vm926_vm2 = vweird.f32 %v1458_v30 }
 0xcdf   :  { %v958_v32 = vmul.f32 %v1460_v53, %v956_v42  ;;  %vm963_vm3 = vweird.f32 %v1460_v53  ;;  %vm927_vm6 = vmor %vm925_vm4, %vm926_vm2 }
 0xce0   :  { %v922_v20 = vsub.f32 1.0, %v921_v37  ;;  %vm964_vm7 = vmor %vm962_vm5, %vm963_vm3 }
 0xce1   :  { %v959_v34 = vsub.f32 1.0, %v958_v32 }
 0xce2   :  { %v923_v22 = vmul.f32 %v1458_v30, %v922_v20 }
 0xce3   :  { %v960_v39 = vmul.f32 %v1460_v53, %v959_v34 }
 0xce4   :  { %v924_v43 = vadd.f32 %v1458_v30, %v923_v22 }
 0xce5   :  { %v961_v24 = vadd.f32 %v1460_v53, %v960_v39 }
 0xce6   :  { %v928_v38 = vsel %vm927_vm6, %v1458_v30, %v924_v43 }
 0xce7   :  { %v965_v40 = vsel %vm964_vm7, %v1460_v53, %v961_v24  ;;  %v933_v51 = vsel %vm930_vm8, %v932_v41, %v928_v38 }
 0xce8   :  { %v970_v54 = vsel %vm967_vm11, %v969_v45, %v965_v40  ;;  %v936_v57 = vmul.f32 %v933_v51, %v1904_v7 }
 0xce9   :  { %v973_v63 = vmul.f32 %v970_v54, %v1899_v1 }
 0xd45   :  { %v939_v49 = vpop.permute.xlu0 %938 }
 0xd46   :  { %v976_v52 = vpop.permute.xlu1 %975  ;;  %v941_v55 = vmul.f32 %v939_v49, %v933_v51 }
 0xd47   :  { %v978_v56 = vmul.f32 %v976_v52, %v970_v54 }
 0xd48   :  { %943 = vrot.lane.b32.xlu2 %v941_v55, %s1499_s0 }
 0xd49   :  { %980 = vrot.lane.b32.xlu0 %v978_v56, %s1499_s0 }
 0xda2   :  { %v944_v59 = vpop.permute.xlu2 %943 }
 0xda3   :  { %v1928_v60 = vadd.f32 %v944_v59, %v936_v57 }
 0xda5   :  { %1461 = vtanh.f32 %v1928_v60 }
 0xdab   :  { %v1462_v61 = vpop.eup %1461 }
 0xdac   :  { %949 = vrot.lane.b32.xlu1 %v1462_v61, %s1499_s0 }
 0xdbb   :  { %v981_v0 = vpop.permute.xlu0 %980 }
 0xdbc   :  { %v1933_v44 = vadd.f32 %v981_v0, %v973_v63 }
 0xdbe   :  { %1463 = vtanh.f32 %v1933_v44 }
 0xdc4   :  { %v1464_v2 = vpop.eup %1463 }
 0xdc5   :  { %986 = vrot.lane.b32.xlu2 %v1464_v2, %s1499_s0 }
 0xe1e   :  { %v950_v3 = vpop.permute.xlu1 %949 }
 0xe1f   :  { %v987_v4 = vpop.permute.xlu2 %986  ;;  %v952_v7 = vmul.f32 %v950_v3, %v933_v51 }
 0xe20   :  { %v989_v9 = vmul.f32 %v987_v4, %v970_v54  ;;  %v159_v4 = vadd.f32 %v1889_v14, %v1719_v15 }
 0xe21   :  { %991 = vrot.lane.b32.xlu0 %v952_v7, %s1500_s3 }
 0xe22   :  { %996 = vrot.lane.b32.xlu1 %v989_v9, %s1501_s20 }
 0xe93   :  { %v992_v62 = vpop.permute.xlu0 %991 }
 0xe94   :  { %1336 = vst.msk [vmem:[%s2005_s5 + $0x28] sm:$0xff] %vm119_vm0, %v992_v62  ;;  %v997_v1 = vpop.permute.xlu1 %996 }
 0xe95   :  { %1337 = vst.msk [vmem:[%s2005_s5 + $0x10] sm:$0xff] %vm379_vm9, %v997_v1  ;;  %v1000_v6 = vsel %vm119_vm0, %v992_v62, %v997_v1 }
 0xe96   :  { %v1001_v35 = vpack.c.bf16 %v1000_v6, %v1000_v6 }
 0xe98   :  { %1338 = vmatmul.msk.bf16.vlgmr.msra.gmra.mxu0 %vm255_vm10, %v1001_v35  ;;  %1339 = vmatmul.msk.bf16.vlgmr.msra.gmra.mxu1 %vm255_vm10, %v1001_v35 }
 0xf15   :  { %v1014_v48 = vpop.f32.mrf.mxu0  ;;  %v1027_v23 = vpop.f32.mrf.mxu1 }
 0xf16   :  { %v1032_v5 = vadd.f32 %v1014_v48, %v1747_v46  ;;  %v1034_v10 = vadd.f32 %v1027_v23, %v1726_v25 }
 0xf18   :  { %1465 = vtanh.f32 %v1032_v5  ;;  %v1340_v18 = vmul.f32 -1.442695, %v1032_v5  ;;  %v1341_v11 = vmul.f32 -1.442695, %v1034_v10 }
 0xf19   :  { %1467 = vtanh.f32 %v1034_v10 }
 0xf1a   :  { %1469 = vpow2.f32 %v1340_v18 }
 0xf1d   :  { %v1016_v12 = vpop.f32.mrf.mxu0  ;;  %v1029_v58 = vpop.f32.mrf.mxu1 }
 0xf1e   :  { %v1466_v13 = vpop.eup %1465 }
 0xf1f   :  { %v1468_v16 = vpop.eup %1467  ;;  %1057 = vrot.lane.b32.xlu2 %v1466_v13, %s1499_s0 }
 0xf20   :  { %1094 = vrot.lane.b32.xlu0 %v1468_v16, %s1499_s0  ;;  %v1470_v28 = vpop.eup %1469 }
 0xf21   :  { %v1038_v8 = vadd.f32 1.0, %v1470_v28 }
 0xf23   :  { %1471 = vrcp.f32 %v1038_v8  ;;  %v1050_v50 = vand.u32 2147483648, %v1038_v8  ;;  %vm1044_vm13 = vweird.f32 %v1038_v8  ;;  %v1048_v42 = vand.u32 2147483647, %v1038_v8 }
 0xf24   :  { %1473 = vpow2.f32 %v1341_v11 }
 0xf25   :  { %v1051_v53 = vor.u32 1.1754944e-38, %v1050_v50  ;;  %vm1049_vm15 = vcmp.eq.f32.partialorder %v1048_v42, 8.507059e+37 }
 0xf29   :  { %v1472_v36 = vpop.eup %1471 }
 0xf2a   :  { %v1040_v46 = vmul.f32 %v1472_v36, %v1038_v8  ;;  %v1474_v19 = vpop.eup %1473  ;;  %vm1045_vm12 = vweird.f32 %v1472_v36 }
 0xf2b   :  { %v1075_v17 = vadd.f32 1.0, %v1474_v19  ;;  %vm1046_vm14 = vmor %vm1044_vm13, %vm1045_vm12 }
 0xf2c   :  { %v1041_v25 = vsub.f32 1.0, %v1040_v46 }
 0xf2d   :  { %1475 = vrcp.f32 %v1075_v17  ;;  %v1087_v27 = vand.u32 2147483648, %v1075_v17  ;;  %vm1081_vm2 = vweird.f32 %v1075_v17  ;;  %v1085_v29 = vand.u32 2147483647, %v1075_v17 }
 0xf2e   :  { %v1042_v47 = vmul.f32 %v1472_v36, %v1041_v25 }
 0xf2f   :  { %v1088_v33 = vor.u32 1.1754944e-38, %v1087_v27  ;;  %vm1086_vm4 = vcmp.eq.f32.partialorder %v1085_v29, 8.507059e+37 }
 0xf30   :  { %v1043_v26 = vadd.f32 %v1472_v36, %v1042_v47 }
 0xf32   :  { %v1047_v30 = vsel %vm1046_vm14, %v1472_v36, %v1043_v26 }
 0xf33   :  { %v1052_v32 = vsel %vm1049_vm15, %v1051_v53, %v1047_v30  ;;  %v1476_v34 = vpop.eup %1475 }
 0xf34   :  { %v1077_v22 = vmul.f32 %v1476_v34, %v1075_v17  ;;  %vm1082_vm1 = vweird.f32 %v1476_v34  ;;  %v1055_v45 = vmul.f32 %v1052_v32, %v1928_v60 }
 0xf35   :  { %vm1083_vm3 = vmor %vm1081_vm2, %vm1082_vm1 }
 0xf36   :  { %v1078_v39 = vsub.f32 1.0, %v1077_v22 }
 0xf38   :  { %v1079_v43 = vmul.f32 %v1476_v34, %v1078_v39 }
 0xf3a   :  { %v1080_v24 = vadd.f32 %v1476_v34, %v1079_v43 }
 0xf3c   :  { %v1084_v31 = vsel %vm1083_vm3, %v1476_v34, %v1080_v24 }
 0xf3d   :  { %v1089_v40 = vsel %vm1086_vm4, %v1088_v33, %v1084_v31 }
 0xf3e   :  { %v1092_v49 = vmul.f32 %v1089_v40, %v1933_v44 }
 0xf79   :  { %v1058_v37 = vpop.permute.xlu2 %1057 }
 0xf7a   :  { %v1060_v20 = vmul.f32 %v1058_v37, %v1052_v32 }
 0xf7c   :  { %1062 = vrot.lane.b32.xlu1 %v1060_v20, %s1499_s0 }
 0xf92   :  { %v1095_v38 = vpop.permute.xlu0 %1094 }
 0xf93   :  { %v1097_v41 = vmul.f32 %v1095_v38, %v1089_v40 }
 0xf95   :  { %1099 = vrot.lane.b32.xlu2 %v1097_v41, %s1499_s0 }
 0xfee   :  { %v1063_v51 = vpop.permute.xlu1 %1062 }
 0xfef   :  { %v1100_v52 = vpop.permute.xlu2 %1099  ;;  %v1958_v54 = vadd.f32 %v1063_v51, %v1055_v45 }
 0xff0   :  { %v1960_v55 = vadd.f32 %v1100_v52, %v1092_v49 }
 0xff1   :  { %1477 = vtanh.f32 %v1958_v54 }
 0xff2   :  { %1479 = vtanh.f32 %v1960_v55 }
 0xff7   :  { %v1478_v56 = vpop.eup %1477 }
 0xff8   :  { %v1480_v57 = vpop.eup %1479  ;;  %1068 = vrot.lane.b32.xlu0 %v1478_v56, %s1499_s0 }
 0xff9   :  { %1105 = vrot.lane.b32.xlu1 %v1480_v57, %s1499_s0 }
0x106a   :  { %v1069_v59 = vpop.permute.xlu0 %1068 }
0x106b   :  { %v1106_v60 = vpop.permute.xlu1 %1105  ;;  %v1071_v61 = vmul.f32 %v1069_v59, %v1052_v32 }
0x106c   :  { %v1108_v63 = vmul.f32 %v1106_v60, %v1089_v40 }
0x106d   :  { %1110 = vrot.lane.b32.xlu2 %v1071_v61, %s1500_s3 }
0x106e   :  { %1115 = vrot.lane.b32.xlu0 %v1108_v63, %s1501_s20 }
0x10c7   :  { %v1111_v0 = vpop.permute.xlu2 %1110 }
0x10c8   :  { %1342 = vst.msk [vmem:[%s2005_s5 + $0x30] sm:$0xff] %vm119_vm0, %v1111_v0 }
0x10e0   :  { %v1116_v44 = vpop.permute.xlu0 %1115 }
0x10e1   :  { %1343 = vst.msk [vmem:[%s2005_s5 + $0x8] sm:$0xff] %vm379_vm9, %v1116_v44  ;;  %v1119_v2 = vsel %vm119_vm0, %v1111_v0, %v1116_v44 }
0x10e2   :  { %v1120_v3 = vpack.c.bf16 %v1119_v2, %v1119_v2 }
0x10e4   :  { %1344 = vmatmul.msk.bf16.vlgmr.msrb.gmra.mxu2 %vm255_vm10, %v1120_v3  ;;  %1345 = vmatmul.msk.bf16.vlgmr.msrb.gmra.mxu3 %vm255_vm10, %v1120_v3 }
0x1167   :  { %v1133_v7 = vpop.f32.mrf.mxu2  ;;  %v1146_v9 = vpop.f32.mrf.mxu3 }
0x1168   :  { %v1151_v62 = vadd.f32 %v1133_v7, %v159_v4  ;;  %v1153_v1 = vadd.f32 %v1146_v9, %v1722_v21 }
0x116a   :  { %1481 = vtanh.f32 %v1151_v62  ;;  %v1347_v5 = vmul.f32 -1.442695, %v1153_v1  ;;  %v1346_v14 = vmul.f32 -1.442695, %v1151_v62 }
0x116b   :  { %1483 = vtanh.f32 %v1153_v1 }
0x116c   :  { %1485 = vpow2.f32 %v1347_v5 }
0x116f   :  { %v1135_v6 = vpop.f32.mrf.mxu2  ;;  %v1148_v35 = vpop.f32.mrf.mxu3 }
0x1170   :  { %v1482_v48 = vpop.eup %1481 }
0x1171   :  { %v1484_v23 = vpop.eup %1483  ;;  %1176 = vrot.lane.b32.xlu1 %v1482_v48, %s1499_s0 }
0x1172   :  { %1213 = vrot.lane.b32.xlu2 %v1484_v23, %s1499_s0  ;;  %v1486_v10 = vpop.eup %1485 }
0x1173   :  { %v1194_v12 = vadd.f32 1.0, %v1486_v10 }
0x1175   :  { %1487 = vrcp.f32 %v1194_v12  ;;  %v1206_v8 = vand.u32 2147483648, %v1194_v12  ;;  %vm1200_vm5 = vweird.f32 %v1194_v12  ;;  %v1204_v36 = vand.u32 2147483647, %v1194_v12 }
0x1176   :  { %1489 = vpow2.f32 %v1346_v14 }
0x1177   :  { %v1207_v46 = vor.u32 1.1754944e-38, %v1206_v8  ;;  %vm1205_vm7 = vcmp.eq.f32.partialorder %v1204_v36, 8.507059e+37 }
0x117b   :  { %v1488_v15 = vpop.eup %1487 }
0x117c   :  { %v1196_v58 = vmul.f32 %v1488_v15, %v1194_v12  ;;  %v1490_v13 = vpop.eup %1489  ;;  %vm1201_vm10 = vweird.f32 %v1488_v15 }
0x117d   :  { %v1157_v18 = vadd.f32 1.0, %v1490_v13  ;;  %vm1202_vm6 = vmor %vm1200_vm5, %vm1201_vm10 }
0x117e   :  { %v1197_v21 = vsub.f32 1.0, %v1196_v58 }
0x117f   :  { %1491 = vrcp.f32 %v1157_v18  ;;  %v1169_v53 = vand.u32 2147483648, %v1157_v18  ;;  %vm1163_vm11 = vweird.f32 %v1157_v18  ;;  %v1167_v37 = vand.u32 2147483647, %v1157_v18 }
0x1180   :  { %v1198_v16 = vmul.f32 %v1488_v15, %v1197_v21 }
0x1181   :  { %v1170_v20 = vor.u32 1.1754944e-38, %v1169_v53  ;;  %vm1168_vm13 = vcmp.eq.f32.partialorder %v1167_v37, 8.507059e+37 }
0x1182   :  { %v1199_v28 = vadd.f32 %v1488_v15, %v1198_v16 }
0x1184   :  { %v1203_v11 = vsel %vm1202_vm6, %v1488_v15, %v1199_v28 }
0x1185   :  { %v1208_v47 = vsel %vm1205_vm7, %v1207_v46, %v1203_v11  ;;  %v1492_v19 = vpop.eup %1491 }
0x1186   :  { %v1159_v26 = vmul.f32 %v1492_v19, %v1157_v18  ;;  %vm1164_vm8 = vweird.f32 %v1492_v19  ;;  %v1211_v43 = vmul.f32 %v1208_v47, %v1960_v55 }
0x1187   :  { %vm1165_vm12 = vmor %vm1163_vm11, %vm1164_vm8 }
0x1188   :  { %v1160_v50 = vsub.f32 1.0, %v1159_v26 }
0x118a   :  { %v1161_v42 = vmul.f32 %v1492_v19, %v1160_v50 }
0x118c   :  { %v1162_v30 = vadd.f32 %v1492_v19, %v1161_v42 }
0x118e   :  { %v1166_v32 = vsel %vm1165_vm12, %v1492_v19, %v1162_v30 }
0x118f   :  { %v1171_v22 = vsel %vm1168_vm13, %v1170_v20, %v1166_v32 }
0x1190   :  { %v1174_v31 = vmul.f32 %v1171_v22, %v1958_v54 }
0x11cc   :  { %v1214_v25 = vpop.permute.xlu2 %1213 }
0x11cd   :  { %v1216_v17 = vmul.f32 %v1214_v25, %v1208_v47 }
0x11cf   :  { %1218 = vrot.lane.b32.xlu1 %v1216_v17, %s1499_s0 }
0x11e3   :  { %v1177_v34 = vpop.permute.xlu1 %1176 }
0x11e4   :  { %v1179_v39 = vmul.f32 %v1177_v34, %v1171_v22 }
0x11e6   :  { %1181 = vrot.lane.b32.xlu0 %v1179_v39, %s1499_s0 }
0x1241   :  { %v1219_v24 = vpop.permute.xlu1 %1218 }
0x1242   :  { %v1221_v27 = vadd.f32 %v1219_v24, %v1211_v43 }
0x1244   :  { %1493 = vtanh.f32 %v1221_v27 }
0x124a   :  { %v1494_v29 = vpop.eup %1493 }
0x124b   :  { %1224 = vrot.lane.b32.xlu0 %v1494_v29, %s1499_s0 }
0x1258   :  { %v1182_v33 = vpop.permute.xlu0 %1181 }
0x1259   :  { %v1184_v38 = vadd.f32 %v1182_v33, %v1174_v31 }
0x125b   :  { %1495 = vtanh.f32 %v1184_v38 }
0x1261   :  { %v1496_v40 = vpop.eup %1495 }
0x1262   :  { %1187 = vrot.lane.b32.xlu2 %v1496_v40, %s1499_s0 }
0x12bc   :  { %v1188_v41 = vpop.permute.xlu2 %1187 }
0x12bd   :  { %v1225_v45 = vpop.permute.xlu0 %1224  ;;  %v1190_v49 = vmul.f32 %v1188_v41, %v1171_v22 }
0x12be   :  { %v1227_v51 = vmul.f32 %v1225_v45, %v1208_v47 }
0x12bf   :  { %1229 = vrot.lane.b32.xlu1 %v1190_v49, %s1500_s3 }
0x12c0   :  { %1234 = vrot.lane.b32.xlu2 %v1227_v51, %s1501_s20 }
0x131a   :  { %v1235_v52 = vpop.permute.xlu2 %1234 }
0x131b   :  { %1237 = vst.msk [vmem:[%s2005_s5] sm:$0xff] %vm379_vm9, %v1235_v52 }
0x1331   :  { %v1230_v54 = vpop.permute.xlu1 %1229 }
0x1332   :  { %1348 = vst.msk [vmem:[%s2005_s5 + $0x38] sm:$0xff] %vm119_vm0, %v1230_v54 }

// kernel: bilstm_for_ner_forward.4
= control target key start
LH: loop header
LB: loop body
LE: loop exit
PB: predicated region body
PF: predicated region fallthrough
CT: control target
= control target key end

     0   :  { %vm84_vm0 = vcmask 523264   ;;  %v1478_v47 = vmov 0.0|0.0   ;;  %s1481_s17 = smov 96   ;;  %vm337_vm9 = vcmask 261120   ;;  %vm344_vm10 = vcmask 523520   ;;  %s1963_s1 = inlined_call_operand.vmem [shape: bf16[64,256], index: 1, kind: input, shape index: {}]   ;;  %s1964_s3 = inlined_call_operand.vmem [shape: bf16[64,256], index: 3, kind: input, shape index: {}]   ;;  %s1965_s0 = inlined_call_operand.vmem [shape: f32[64,64], index: 0, kind: input, shape index: {}]   ;;  %s1966_s2 = inlined_call_operand.vmem [shape: f32[1,256], index: 2, kind: input, shape index: {}]   ;;  %s1967_s4 = inlined_call_operand.vmem [shape: f32[64,64], index: 4, kind: output, shape index: {}]  }
   0x1   :  { %v1336_v0 = vld [vmem:[%s1963_s1 + $0x34] sm:$0xf]  ;;  %v1242_v1 = vld [vmem:[%s1963_s1 + $0x38] sm:$0xf0]  ;;  %v1280_v2 = vld [vmem:[%s1964_s3 + $0x30] sm:$0xf] }
   0x2   :  { %v1245_v3 = vor.u32 %v1336_v0, %v1242_v1  ;;  %v1345_v4 = vld [vmem:[%s1964_s3 + $0x34] sm:$0xf0]  ;;  %v1240_v5 = vld [vmem:[%s1963_s1 + $0x30] sm:$0xf]  ;;  %v1334_v9 = vld [vmem:[%s1963_s1 + $0x24] sm:$0xf] }
   0x3   :  { %v1337_v6 = vld [vmem:[%s1963_s1 + $0x34] sm:$0xf0]  ;;  %v1525_v7 = vor.u32 %v1345_v4, %v1280_v2  ;;  %v1234_v10 = vld [vmem:[%s1963_s1 + $0x28] sm:$0xf0]  ;;  %v1272_v11 = vld [vmem:[%s1964_s3 + $0x20] sm:$0xf] }
   0x4   :  { %v1241_v8 = vor.u32 %v1337_v6, %v1240_v5  ;;  %130 = vmatpush.bf16.msra.mxu1 %v1245_v3  ;;  %v1237_v12 = vor.u32 %v1334_v9, %v1234_v10  ;;  %v1343_v13 = vld [vmem:[%s1964_s3 + $0x24] sm:$0xf0]  ;;  %v1232_v14 = vld [vmem:[%s1963_s1 + $0x20] sm:$0xf]  ;;  %v1332_v18 = vld [vmem:[%s1963_s1 + $0x14] sm:$0xf] }
   0x5   :  { %v1335_v15 = vld [vmem:[%s1963_s1 + $0x24] sm:$0xf0]  ;;  %227 = vmatpush.bf16.msra.mxu2 %v1525_v7  ;;  %v1546_v16 = vor.u32 %v1343_v13, %v1272_v11  ;;  %v1226_v19 = vld [vmem:[%s1963_s1 + $0x18] sm:$0xf0]  ;;  %v1264_v20 = vld [vmem:[%s1964_s3 + $0x10] sm:$0xf] }
   0x6   :  { %101 = vmatpush.bf16.msra.mxu0 %v1241_v8  ;;  %v1233_v17 = vor.u32 %v1335_v15, %v1232_v14  ;;  %v1341_v21 = vld [vmem:[%s1964_s3 + $0x14] sm:$0xf0]  ;;  %v1224_v22 = vld [vmem:[%s1963_s1 + $0x10] sm:$0xf]  ;;  %v1229_v24 = vor.u32 %v1332_v18, %v1226_v19  ;;  %v1330_v25 = vld [vmem:[%s1963_s1 + $0x4] sm:$0xf] }
   0x7   :  { %v1333_v23 = vld [vmem:[%s1963_s1 + $0x14] sm:$0xf0]  ;;  %v1218_v26 = vld [vmem:[%s1963_s1 + $0x8] sm:$0xf0]  ;;  %v1573_v27 = vor.u32 %v1341_v21, %v1264_v20  ;;  %v1256_v29 = vld [vmem:[%s1964_s3] sm:$0xf] }
   0x8   :  { %131 = vmatpush.bf16.msra.mxu1 %v1237_v12  ;;  %v1225_v28 = vor.u32 %v1333_v23, %v1224_v22  ;;  %v1339_v30 = vld [vmem:[%s1964_s3 + $0x4] sm:$0xf0]  ;;  %v1216_v31 = vld [vmem:[%s1963_s1] sm:$0xf]  ;;  %v1344_v33 = vld [vmem:[%s1964_s3 + $0x34] sm:$0xf]  ;;  %v1221_v36 = vor.u32 %v1330_v25, %v1218_v26 }
   0x9   :  { %228 = vmatpush.bf16.msra.mxu2 %v1546_v16  ;;  %v1331_v32 = vld [vmem:[%s1963_s1 + $0x4] sm:$0xf0]  ;;  %v1282_v34 = vld [vmem:[%s1964_s3 + $0x38] sm:$0xf0]  ;;  %v18_v37 = vld [vmem:[%s1965_s0] sm:$0xff]  ;;  %v1602_v39 = vor.u32 %v1339_v30, %v1256_v29 }
   0xa   :  { %102 = vmatpush.bf16.msra.mxu0 %v1233_v17  ;;  %v1593_v35 = vor.u32 %v1344_v33, %v1282_v34  ;;  %v19_v38 = vld [vmem:[%s1965_s0 + $0x8] sm:$0xff]  ;;  %v1217_v40 = vor.u32 %v1331_v32, %v1216_v31  ;;  %v1342_v42 = vld [vmem:[%s1964_s3 + $0x24] sm:$0xf]  ;;  %v1340_v45 = vld [vmem:[%s1964_s3 + $0x14] sm:$0xf] }
   0xb   :  { %v26_v41 = vpack.c.bf16 %v19_v38, %v18_v37  ;;  %v1274_v43 = vld [vmem:[%s1964_s3 + $0x28] sm:$0xf0]  ;;  %v1266_v46 = vld [vmem:[%s1964_s3 + $0x18] sm:$0xf0]  ;;  %v1338_v49 = vld [vmem:[%s1964_s3 + $0x4] sm:$0xf] }
   0xc   :  { %132 = vmatpush.bf16.msra.mxu1 %v1229_v24  ;;  %240 = vmatpush.bf16.msra.mxu3 %v1593_v35  ;;  %v1615_v44 = vor.u32 %v1342_v42, %v1274_v43  ;;  %v1626_v48 = vor.u32 %v1340_v45, %v1266_v46  ;;  %v1258_v50 = vld [vmem:[%s1964_s3 + $0x8] sm:$0xf0]  ;;  %v20_v52 = vld [vmem:[%s1965_s0 + $0x10] sm:$0xff]  ;;  %v21_v53 = vld [vmem:[%s1965_s0 + $0x18] sm:$0xff] }
   0xd   :  { %229 = vmatpush.bf16.msra.mxu2 %v1573_v27  ;;  %v1638_v51 = vor.u32 %v1338_v49, %v1258_v50  ;;  %v27_v54 = vpack.c.bf16 %v21_v53, %v20_v52  ;;  %v22_v55 = vld [vmem:[%s1965_s0 + $0x20] sm:$0xff]  ;;  %v23_v56 = vld [vmem:[%s1965_s0 + $0x28] sm:$0xff]  ;;  %v24_v58 = vld [vmem:[%s1965_s0 + $0x30] sm:$0xff] }
   0xe   :  { %103 = vmatpush.bf16.msra.mxu0 %v1225_v28  ;;  %v28_v57 = vpack.c.bf16 %v23_v56, %v22_v55  ;;  %v25_v59 = vld [vmem:[%s1965_s0 + $0x38] sm:$0xff]  ;;  %v38_v61 = vld [vmem:[%s1966_s2] sm:$0x3]  ;;  %s1479_s0 = smov 32   ;;  %s1480_s2 = smov 64  }
   0xf   :  { %v29_v60 = vpack.c.bf16 %v25_v59, %v24_v58  ;;  %v41_v62 = vperm.slane %v38_v61, 1  ;;  %v1694_v0 = vperm.slane %v38_v61, 0 }
  0x10   :  { %133 = vmatpush.bf16.msra.mxu1 %v1221_v36  ;;  %241 = vmatpush.bf16.msra.mxu3 %v1615_v44 }
  0x11   :  { %230 = vmatpush.bf16.msra.mxu2 %v1602_v39 }
  0x12   :  { %104 = vmatpush.bf16.msra.mxu0 %v1217_v40 }
  0x13   :  { %1250 = vmatmul.msk.bf16.vlgmr.msra.gmra.mxu1 %vm84_vm0, %v26_v41 }
  0x14   :  { %749 = vmatpush.bf16.msrb.mxu1 %v1593_v35  ;;  %231 = vmatmul.bf16.vlgmr.msra.gmra.mxu2 %v1478_v47 }
  0x15   :  { %355 = vmatpush.bf16.msrb.mxu2 %v1525_v7  ;;  %1246 = vmatmul.msk.bf16.vlgmr.msra.gmra.mxu0 %vm84_vm0, %v26_v41 }
  0x16   :  { %736 = vmatpush.bf16.msrb.mxu0 %v1525_v7  ;;  %242 = vmatpush.bf16.msra.mxu3 %v1626_v48 }
  0x18   :  { %750 = vmatpush.bf16.msrb.mxu1 %v1615_v44 }
  0x19   :  { %356 = vmatpush.bf16.msrb.mxu2 %v1546_v16 }
  0x1a   :  { %737 = vmatpush.bf16.msrb.mxu0 %v1546_v16  ;;  %243 = vmatpush.bf16.msra.mxu3 %v1638_v51 }
  0x1c   :  { %751 = vmatpush.bf16.msrb.mxu1 %v1626_v48 }
  0x1d   :  { %357 = vmatpush.bf16.msrb.mxu2 %v1573_v27  ;;  %244 = vmatmul.bf16.vlgmr.msra.gmra.mxu3 %v1478_v47 }
  0x1e   :  { %738 = vmatpush.bf16.msrb.mxu0 %v1573_v27  ;;  %368 = vmatpush.bf16.msrb.mxu3 %v1593_v35 }
  0x20   :  { %752 = vmatpush.bf16.msrb.mxu1 %v1638_v51 }
  0x21   :  { %358 = vmatpush.bf16.msrb.mxu2 %v1602_v39 }
  0x22   :  { %739 = vmatpush.bf16.msrb.mxu0 %v1602_v39  ;;  %369 = vmatpush.bf16.msrb.mxu3 %v1615_v44 }
  0x23   :  { %1251 = vmatmul.msk.bf16.gmra.mxu1 %vm84_vm0, %v27_v54 }
  0x24   :  { %987 = vmatpush.bf16.msra.mxu1 %v1593_v35 }
  0x25   :  { %482 = vmatpush.bf16.msra.mxu2 %v1525_v7  ;;  %1247 = vmatmul.msk.bf16.gmra.mxu0 %vm84_vm0, %v27_v54 }
  0x26   :  { %974 = vmatpush.bf16.msra.mxu0 %v1525_v7  ;;  %370 = vmatpush.bf16.msrb.mxu3 %v1626_v48 }
  0x28   :  { %988 = vmatpush.bf16.msra.mxu1 %v1615_v44 }
  0x29   :  { %483 = vmatpush.bf16.msra.mxu2 %v1546_v16 }
  0x2a   :  { %975 = vmatpush.bf16.msra.mxu0 %v1546_v16  ;;  %371 = vmatpush.bf16.msrb.mxu3 %v1638_v51 }
  0x2c   :  { %989 = vmatpush.bf16.msra.mxu1 %v1626_v48 }
  0x2d   :  { %484 = vmatpush.bf16.msra.mxu2 %v1573_v27 }
  0x2e   :  { %976 = vmatpush.bf16.msra.mxu0 %v1573_v27  ;;  %495 = vmatpush.bf16.msra.mxu3 %v1593_v35 }
  0x30   :  { %990 = vmatpush.bf16.msra.mxu1 %v1638_v51 }
  0x31   :  { %485 = vmatpush.bf16.msra.mxu2 %v1602_v39 }
  0x32   :  { %977 = vmatpush.bf16.msra.mxu0 %v1602_v39  ;;  %496 = vmatpush.bf16.msra.mxu3 %v1615_v44 }
  0x33   :  { %1252 = vmatmul.msk.bf16.gmra.mxu1 %vm84_vm0, %v28_v57 }
  0x35   :  { %1248 = vmatmul.msk.bf16.gmra.mxu0 %vm84_vm0, %v28_v57 }
  0x36   :  { %497 = vmatpush.bf16.msra.mxu3 %v1626_v48 }
  0x3a   :  { %498 = vmatpush.bf16.msra.mxu3 %v1638_v51 }
  0x43   :  { %1253 = vmatmul.msk.bf16.gmra.mxu1 %vm84_vm0, %v29_v60 }
  0x45   :  { %1249 = vmatmul.msk.bf16.gmra.mxu0 %vm84_vm0, %v29_v60 }
  0x90   :  { %v135_v63 = vpop.f32.mrf.mxu1 }
  0x91   :  { %v1696_v1 = vadd.f32 %v135_v63, %v41_v62 }
  0x92   :  { %v106_v2 = vpop.f32.mrf.mxu0 }
  0x93   :  { %v107_v3 = vadd.f32 %v106_v2, %v1694_v0 }
  0x97   :  { %v232_v4 = vpop.f32.mrf.mxu2 }
  0x98   :  { %v253_v5 = vadd.f32 %v232_v4, %v107_v3  ;;  %v137_v6 = vpop.f32.mrf.mxu1 }
  0x99   :  { %v1699_v8 = vadd.f32 %v137_v6, %v41_v62 }
  0x9a   :  { %1350 = vtanh.f32 %v253_v5  ;;  %v1286_v29 = vmul.f32 -1.442695, %v253_v5 }
  0x9f   :  { %v234_v9 = vpop.f32.mrf.mxu2 }
  0xa0   :  { %v1351_v10 = vpop.eup %1350  ;;  %v140_v11 = vpop.f32.mrf.mxu1 }
  0xa1   :  { %v1701_v12 = vadd.f32 %v140_v11, %v41_v62  ;;  %281 = vrot.lane.b32.xlu0 %v1351_v10, %s1479_s0  ;;  %v245_v13 = vpop.f32.mrf.mxu3 }
  0xa8   :  { %v142_v14 = vpop.f32.mrf.mxu1 }
  0xa9   :  { %v1704_v15 = vadd.f32 %v142_v14, %v41_v62  ;;  %v247_v17 = vpop.f32.mrf.mxu3 }
  0xb0   :  { %v145_v18 = vpop.f32.mrf.mxu1 }
  0xb1   :  { %v1706_v19 = vadd.f32 %v145_v18, %v41_v62 }
  0xb8   :  { %v147_v20 = vpop.f32.mrf.mxu1 }
  0xb9   :  { %v1708_v21 = vadd.f32 %v147_v20, %v41_v62 }
  0xc0   :  { %v150_v22 = vpop.f32.mrf.mxu1 }
  0xc1   :  { %v1710_v23 = vadd.f32 %v150_v22, %v41_v62 }
  0xc8   :  { %v152_v24 = vpop.f32.mrf.mxu1 }
  0xc9   :  { %v153_v25 = vadd.f32 %v152_v24, %v41_v62 }
  0xcb   :  { %v258_v26 = vadd.f32 %v245_v13, %v153_v25 }
  0xcd   :  { %1352 = vtanh.f32 %v258_v26  ;;  %v1287_v47 = vmul.f32 -1.442695, %v258_v26  ;;  %v108_v26 = vpop.f32.mrf.mxu0 }
  0xce   :  { %1354 = vpow2.f32 %v1286_v29 }
  0xd3   :  { %v1353_v28 = vpop.eup %1352 }
  0xd4   :  { %318 = vrot.lane.b32.xlu0 %v1353_v28, %s1479_s0  ;;  %v1355_v30 = vpop.eup %1354  ;;  %v109_v28 = vadd.f32 %v108_v26, %v1694_v0 }
  0xd5   :  { %v262_v31 = vadd.f32 1.0, %v1355_v30 }
  0xd7   :  { %1356 = vrcp.f32 %v262_v31  ;;  %vm268_vm1 = vweird.f32 %v262_v31  ;;  %v274_v37 = vand.u32 2147483648, %v262_v31  ;;  %v272_v40 = vand.u32 2147483647, %v262_v31 }
  0xd8   :  { %1358 = vpow2.f32 %v1287_v47 }
  0xd9   :  { %v275_v41 = vor.u32 1.1754944e-38, %v274_v37  ;;  %vm273_vm4 = vcmp.eq.f32.partialorder %v272_v40, 8.507059e+37 }
  0xdd   :  { %v1357_v32 = vpop.eup %1356 }
  0xde   :  { %v264_v33 = vmul.f32 %v1357_v32, %v262_v31  ;;  %vm269_vm2 = vweird.f32 %v1357_v32  ;;  %v1359_v49 = vpop.eup %1358 }
  0xdf   :  { %vm270_vm3 = vmor %vm268_vm1, %vm269_vm2  ;;  %v299_v50 = vadd.f32 1.0, %v1359_v49 }
  0xe0   :  { %v265_v34 = vsub.f32 1.0, %v264_v33 }
  0xe1   :  { %1360 = vrcp.f32 %v299_v50  ;;  %v311_v57 = vand.u32 2147483648, %v299_v50  ;;  %vm305_vm6 = vweird.f32 %v299_v50  ;;  %v309_v58 = vand.u32 2147483647, %v299_v50 }
  0xe2   :  { %v266_v36 = vmul.f32 %v1357_v32, %v265_v34 }
  0xe3   :  { %v312_v60 = vor.u32 1.1754944e-38, %v311_v57  ;;  %vm310_vm8 = vcmp.eq.f32.partialorder %v309_v58, 8.507059e+37 }
  0xe4   :  { %v267_v38 = vadd.f32 %v1357_v32, %v266_v36 }
  0xe6   :  { %v271_v42 = vsel %vm270_vm3, %v1357_v32, %v267_v38 }
  0xe7   :  { %v276_v45 = vsel %vm273_vm4, %v275_v41, %v271_v42  ;;  %v1361_v52 = vpop.eup %1360 }
  0xe8   :  { %v301_v53 = vmul.f32 %v1361_v52, %v299_v50  ;;  %vm306_vm5 = vweird.f32 %v1361_v52  ;;  %v279_v2 = vmul.f32 0.0, %v276_v45 }
  0xe9   :  { %vm307_vm7 = vmor %vm305_vm6, %vm306_vm5 }
  0xea   :  { %v302_v54 = vsub.f32 1.0, %v301_v53 }
  0xec   :  { %v303_v55 = vmul.f32 %v1361_v52, %v302_v54 }
  0xee   :  { %v304_v56 = vadd.f32 %v1361_v52, %v303_v55 }
  0xf0   :  { %v308_v59 = vsel %vm307_vm7, %v1361_v52, %v304_v56 }
  0xf1   :  { %v313_v61 = vsel %vm310_vm8, %v312_v60, %v308_v59 }
  0xf2   :  { %v316_v6 = vmul.f32 0.0, %v313_v61 }
 0x113   :  { %v282_v43 = vpop.permute.xlu0 %281 }
 0x114   :  { %v284_v46 = vmul.f32 %v282_v43, %v276_v45 }
 0x116   :  { %286 = vrot.lane.b32.xlu1 %v284_v46, %s1479_s0 }
 0x146   :  { %v319_v62 = vpop.permute.xlu0 %318 }
 0x147   :  { %v321_v63 = vmul.f32 %v319_v62, %v313_v61 }
 0x149   :  { %323 = vrot.lane.b32.xlu1 %v321_v63, %s1479_s0 }
 0x188   :  { %v287_v3 = vpop.permute.xlu1 %286 }
 0x189   :  { %v1715_v4 = vadd.f32 %v287_v3, %v279_v2 }
 0x18b   :  { %1362 = vtanh.f32 %v1715_v4 }
 0x191   :  { %v1363_v5 = vpop.eup %1362 }
 0x192   :  { %292 = vrot.lane.b32.xlu2 %v1363_v5, %s1479_s0 }
 0x1bb   :  { %v324_v9 = vpop.permute.xlu1 %323 }
 0x1bc   :  { %v1719_v10 = vadd.f32 %v324_v9, %v316_v6 }
 0x1be   :  { %1364 = vtanh.f32 %v1719_v10 }
 0x1c4   :  { %v1365_v11 = vpop.eup %1364 }
 0x1c5   :  { %329 = vrot.lane.b32.xlu2 %v1365_v11, %s1479_s0 }
 0x1ec   :  { %v293_v13 = vpop.permute.xlu2 %292 }
 0x1ed   :  { %v295_v14 = vmul.f32 %v293_v13, %v276_v45 }
 0x1ef   :  { %334 = vrot.lane.b32.xlu0 %v295_v14, %s1480_s2 }
 0x21f   :  { %v330_v17 = vpop.permute.xlu2 %329 }
 0x220   :  { %v332_v18 = vmul.f32 %v330_v17, %v313_v61 }
 0x222   :  { %340 = vrot.lane.b32.xlu1 %v332_v18, %s1481_s17 }
 0x261   :  { %v335_v20 = vpop.permute.xlu0 %334 }
 0x262   :  { %338 = vst.msk [vmem:[%s1967_s4] sm:$0xff] %vm337_vm9, %v335_v20 }
 0x294   :  { %v341_v22 = vpop.permute.xlu1 %340 }
 0x295   :  { %1288 = vst.msk [vmem:[%s1967_s4 + $0x38] sm:$0xff] %vm344_vm10, %v341_v22  ;;  %v346_v24 = vsel %vm337_vm9, %v335_v20, %v341_v22 }
 0x296   :  { %v347_v25 = vpack.c.bf16 %v346_v24, %v346_v24 }
 0x298   :  { %1289 = vmatmul.msk.bf16.vlgmr.msrb.gmra.mxu2 %vm84_vm0, %v347_v25  ;;  %1290 = vmatmul.msk.bf16.vlgmr.msrb.gmra.mxu3 %vm84_vm0, %v347_v25 }
 0x299   :  { %609 = vmatpush.bf16.msrb.mxu2 %v1525_v7  ;;  %622 = vmatpush.bf16.msrb.mxu3 %v1593_v35 }
 0x29d   :  { %610 = vmatpush.bf16.msrb.mxu2 %v1546_v16  ;;  %623 = vmatpush.bf16.msrb.mxu3 %v1615_v44 }
 0x2a1   :  { %611 = vmatpush.bf16.msrb.mxu2 %v1573_v27  ;;  %624 = vmatpush.bf16.msrb.mxu3 %v1626_v48 }
 0x2a5   :  { %612 = vmatpush.bf16.msrb.mxu2 %v1602_v39  ;;  %625 = vmatpush.bf16.msrb.mxu3 %v1638_v51 }
 0x31b   :  { %v360_v29 = vpop.f32.mrf.mxu2  ;;  %v373_v30 = vpop.f32.mrf.mxu3 }
 0x31c   :  { %v381_v31 = vadd.f32 %v360_v29, %v109_v28  ;;  %v386_v32 = vadd.f32 %v373_v30, %v1710_v23 }
 0x31e   :  { %1366 = vtanh.f32 %v381_v31  ;;  %v1291_v38 = vmul.f32 -1.442695, %v381_v31  ;;  %v1292_v43 = vmul.f32 -1.442695, %v386_v32 }
 0x31f   :  { %1368 = vtanh.f32 %v386_v32 }
 0x320   :  { %1370 = vpow2.f32 %v1291_v38 }
 0x323   :  { %v362_v33 = vpop.f32.mrf.mxu2  ;;  %v375_v34 = vpop.f32.mrf.mxu3 }
 0x324   :  { %v1367_v36 = vpop.eup %1366  ;;  %v111_v34 = vpop.f32.mrf.mxu0 }
 0x325   :  { %v1369_v37 = vpop.eup %1368  ;;  %409 = vrot.lane.b32.xlu2 %v1367_v36, %s1479_s0  ;;  %v112_v36 = vadd.f32 %v111_v34, %v1694_v0 }
 0x326   :  { %446 = vrot.lane.b32.xlu0 %v1369_v37, %s1479_s0  ;;  %v1371_v40 = vpop.eup %1370 }
 0x327   :  { %v390_v41 = vadd.f32 1.0, %v1371_v40 }
 0x329   :  { %1372 = vrcp.f32 %v390_v41  ;;  %v402_v52 = vand.u32 2147483648, %v390_v41  ;;  %vm396_vm12 = vweird.f32 %v390_v41  ;;  %v400_v53 = vand.u32 2147483647, %v390_v41 }
 0x32a   :  { %1374 = vpow2.f32 %v1292_v43 }
 0x32b   :  { %v403_v55 = vor.u32 1.1754944e-38, %v402_v52  ;;  %vm401_vm14 = vcmp.eq.f32.partialorder %v400_v53, 8.507059e+37 }
 0x32f   :  { %v1373_v42 = vpop.eup %1372 }
 0x330   :  { %v392_v45 = vmul.f32 %v1373_v42, %v390_v41  ;;  %v1375_v47 = vpop.eup %1374  ;;  %vm397_vm11 = vweird.f32 %v1373_v42 }
 0x331   :  { %v427_v49 = vadd.f32 1.0, %v1375_v47  ;;  %vm398_vm13 = vmor %vm396_vm12, %vm397_vm11 }
 0x332   :  { %v393_v23 = vsub.f32 1.0, %v392_v45 }
 0x333   :  { %1376 = vrcp.f32 %v427_v49  ;;  %v439_v2 = vand.u32 2147483648, %v427_v49  ;;  %vm433_vm1 = vweird.f32 %v427_v49  ;;  %v437_v3 = vand.u32 2147483647, %v427_v49 }
 0x334   :  { %v394_v46 = vmul.f32 %v1373_v42, %v393_v23 }
 0x335   :  { %v440_v6 = vor.u32 1.1754944e-38, %v439_v2  ;;  %vm438_vm3 = vcmp.eq.f32.partialorder %v437_v3, 8.507059e+37 }
 0x336   :  { %v395_v50 = vadd.f32 %v1373_v42, %v394_v46 }
 0x338   :  { %v399_v54 = vsel %vm398_vm13, %v1373_v42, %v395_v50 }
 0x339   :  { %v404_v57 = vsel %vm401_vm14, %v403_v55, %v399_v54  ;;  %v1377_v59 = vpop.eup %1376 }
 0x33a   :  { %v429_v60 = vmul.f32 %v1377_v59, %v427_v49  ;;  %vm434_vm15 = vweird.f32 %v1377_v59  ;;  %v407_v14 = vmul.f32 %v404_v57, %v1715_v4 }
 0x33b   :  { %vm435_vm2 = vmor %vm433_vm1, %vm434_vm15 }
 0x33c   :  { %v430_v61 = vsub.f32 1.0, %v429_v60 }
 0x33e   :  { %v431_v62 = vmul.f32 %v1377_v59, %v430_v61 }
 0x340   :  { %v432_v63 = vadd.f32 %v1377_v59, %v431_v62 }
 0x342   :  { %v436_v5 = vsel %vm435_vm2, %v1377_v59, %v432_v63 }
 0x343   :  { %v441_v11 = vsel %vm438_vm3, %v440_v6, %v436_v5 }
 0x344   :  { %v444_v17 = vmul.f32 %v441_v11, %v1719_v10 }
 0x37f   :  { %v410_v56 = vpop.permute.xlu2 %409 }
 0x380   :  { %v412_v58 = vmul.f32 %v410_v56, %v404_v57 }
 0x382   :  { %414 = vrot.lane.b32.xlu1 %v412_v58, %s1479_s0 }
 0x398   :  { %v447_v9 = vpop.permute.xlu0 %446 }
 0x399   :  { %v449_v13 = vmul.f32 %v447_v9, %v441_v11 }
 0x39b   :  { %451 = vrot.lane.b32.xlu2 %v449_v13, %s1479_s0 }
 0x3f4   :  { %v415_v18 = vpop.permute.xlu1 %414 }
 0x3f5   :  { %v452_v20 = vpop.permute.xlu2 %451  ;;  %v1752_v22 = vadd.f32 %v415_v18, %v407_v14 }
 0x3f6   :  { %v1754_v24 = vadd.f32 %v452_v20, %v444_v17 }
 0x3f7   :  { %1378 = vtanh.f32 %v1752_v22 }
 0x3f8   :  { %1380 = vtanh.f32 %v1754_v24 }
 0x3fd   :  { %v1379_v25 = vpop.eup %1378 }
 0x3fe   :  { %v1381_v26 = vpop.eup %1380  ;;  %420 = vrot.lane.b32.xlu0 %v1379_v25, %s1479_s0 }
 0x3ff   :  { %457 = vrot.lane.b32.xlu1 %v1381_v26, %s1479_s0 }
 0x470   :  { %v421_v28 = vpop.permute.xlu0 %420 }
 0x471   :  { %v458_v4 = vpop.permute.xlu1 %457  ;;  %v423_v29 = vmul.f32 %v421_v28, %v404_v57 }
 0x472   :  { %v460_v10 = vmul.f32 %v458_v4, %v441_v11 }
 0x473   :  { %462 = vrot.lane.b32.xlu2 %v423_v29, %s1480_s2 }
 0x474   :  { %468 = vrot.lane.b32.xlu0 %v460_v10, %s1481_s17 }
 0x4cd   :  { %v463_v30 = vpop.permute.xlu2 %462 }
 0x4ce   :  { %1293 = vst.msk [vmem:[%s1967_s4 + $0x8] sm:$0xff] %vm337_vm9, %v463_v30 }
 0x4e6   :  { %v469_v31 = vpop.permute.xlu0 %468 }
 0x4e7   :  { %1294 = vst.msk [vmem:[%s1967_s4 + $0x30] sm:$0xff] %vm344_vm10, %v469_v31  ;;  %v473_v32 = vsel %vm337_vm9, %v463_v30, %v469_v31 }
 0x4e8   :  { %v474_v33 = vpack.c.bf16 %v473_v32, %v473_v32 }
 0x4ea   :  { %1295 = vmatmul.msk.bf16.vlgmr.msra.gmra.mxu2 %vm84_vm0, %v474_v33  ;;  %1296 = vmatmul.msk.bf16.vlgmr.msra.gmra.mxu3 %vm84_vm0, %v474_v33 }
 0x4eb   :  { %855 = vmatpush.bf16.msra.mxu2 %v1525_v7  ;;  %868 = vmatpush.bf16.msra.mxu3 %v1593_v35 }
 0x4ef   :  { %856 = vmatpush.bf16.msra.mxu2 %v1546_v16  ;;  %869 = vmatpush.bf16.msra.mxu3 %v1615_v44 }
 0x4f3   :  { %857 = vmatpush.bf16.msra.mxu2 %v1573_v27  ;;  %870 = vmatpush.bf16.msra.mxu3 %v1626_v48 }
 0x4f7   :  { %858 = vmatpush.bf16.msra.mxu2 %v1602_v39  ;;  %871 = vmatpush.bf16.msra.mxu3 %v1638_v51 }
 0x56d   :  { %v487_v37 = vpop.f32.mrf.mxu2  ;;  %v500_v38 = vpop.f32.mrf.mxu3 }
 0x56e   :  { %v508_v40 = vadd.f32 %v487_v37, %v112_v36  ;;  %v513_v41 = vadd.f32 %v500_v38, %v1708_v21 }
 0x570   :  { %1382 = vtanh.f32 %v508_v40  ;;  %v1298_v46 = vmul.f32 -1.442695, %v513_v41  ;;  %v1297_v52 = vmul.f32 -1.442695, %v508_v40 }
 0x571   :  { %1384 = vtanh.f32 %v513_v41 }
 0x572   :  { %1386 = vpow2.f32 %v1298_v46 }
 0x575   :  { %v489_v42 = vpop.f32.mrf.mxu2  ;;  %v502_v43 = vpop.f32.mrf.mxu3 }
 0x576   :  { %v1383_v45 = vpop.eup %1382  ;;  %v113_v42 = vpop.f32.mrf.mxu0 }
 0x577   :  { %v1385_v23 = vpop.eup %1384  ;;  %536 = vrot.lane.b32.xlu1 %v1383_v45, %s1479_s0  ;;  %v114_v43 = vadd.f32 %v113_v42, %v1694_v0 }
 0x578   :  { %573 = vrot.lane.b32.xlu2 %v1385_v23, %s1479_s0  ;;  %v1387_v47 = vpop.eup %1386 }
 0x579   :  { %v554_v49 = vadd.f32 1.0, %v1387_v47 }
 0x57b   :  { %1388 = vrcp.f32 %v554_v49  ;;  %v566_v58 = vand.u32 2147483648, %v554_v49  ;;  %vm560_vm5 = vweird.f32 %v554_v49  ;;  %v564_v59 = vand.u32 2147483647, %v554_v49 }
 0x57c   :  { %1390 = vpow2.f32 %v1297_v52 }
 0x57d   :  { %v567_v61 = vor.u32 1.1754944e-38, %v566_v58  ;;  %vm565_vm7 = vcmp.eq.f32.partialorder %v564_v59, 8.507059e+37 }
 0x581   :  { %v1389_v50 = vpop.eup %1388 }
 0x582   :  { %v556_v53 = vmul.f32 %v1389_v50, %v554_v49  ;;  %v1391_v54 = vpop.eup %1390  ;;  %vm561_vm4 = vweird.f32 %v1389_v50 }
 0x583   :  { %v517_v56 = vadd.f32 1.0, %v1391_v54  ;;  %vm562_vm6 = vmor %vm560_vm5, %vm561_vm4 }
 0x584   :  { %v557_v21 = vsub.f32 1.0, %v556_v53 }
 0x585   :  { %1392 = vrcp.f32 %v517_v56  ;;  %v529_v13 = vand.u32 2147483648, %v517_v56  ;;  %vm523_vm11 = vweird.f32 %v517_v56  ;;  %v527_v14 = vand.u32 2147483647, %v517_v56 }
 0x586   :  { %v558_v55 = vmul.f32 %v1389_v50, %v557_v21 }
 0x587   :  { %v530_v18 = vor.u32 1.1754944e-38, %v529_v13  ;;  %vm528_vm13 = vcmp.eq.f32.partialorder %v527_v14, 8.507059e+37 }
 0x588   :  { %v559_v57 = vadd.f32 %v1389_v50, %v558_v55 }
 0x58a   :  { %v563_v60 = vsel %vm562_vm6, %v1389_v50, %v559_v57 }
 0x58b   :  { %v568_v63 = vsel %vm565_vm7, %v567_v61, %v563_v60  ;;  %v1393_v2 = vpop.eup %1392 }
 0x58c   :  { %v519_v5 = vmul.f32 %v1393_v2, %v517_v56  ;;  %vm524_vm8 = vweird.f32 %v1393_v2  ;;  %v571_v28 = vmul.f32 %v568_v63, %v1754_v24 }
 0x58d   :  { %vm525_vm12 = vmor %vm523_vm11, %vm524_vm8 }
 0x58e   :  { %v520_v6 = vsub.f32 1.0, %v519_v5 }
 0x590   :  { %v521_v9 = vmul.f32 %v1393_v2, %v520_v6 }
 0x592   :  { %v522_v11 = vadd.f32 %v1393_v2, %v521_v9 }
 0x594   :  { %v526_v17 = vsel %vm525_vm12, %v1393_v2, %v522_v11 }
 0x595   :  { %v531_v25 = vsel %vm528_vm13, %v530_v18, %v526_v17 }
 0x596   :  { %v534_v30 = vmul.f32 %v531_v25, %v1752_v22 }
 0x5d2   :  { %v574_v62 = vpop.permute.xlu2 %573 }
 0x5d3   :  { %v576_v3 = vmul.f32 %v574_v62, %v568_v63 }
 0x5d5   :  { %578 = vrot.lane.b32.xlu1 %v576_v3, %s1479_s0 }
 0x5e9   :  { %v537_v20 = vpop.permute.xlu1 %536 }
 0x5ea   :  { %v539_v26 = vmul.f32 %v537_v20, %v531_v25 }
 0x5ec   :  { %541 = vrot.lane.b32.xlu0 %v539_v26, %s1479_s0 }
 0x647   :  { %v579_v4 = vpop.permute.xlu1 %578 }
 0x648   :  { %v1788_v29 = vadd.f32 %v579_v4, %v571_v28 }
 0x64a   :  { %1394 = vtanh.f32 %v1788_v29 }
 0x650   :  { %v1395_v10 = vpop.eup %1394 }
 0x651   :  { %584 = vrot.lane.b32.xlu0 %v1395_v10, %s1479_s0 }
 0x65e   :  { %v542_v31 = vpop.permute.xlu0 %541 }
 0x65f   :  { %v1793_v32 = vadd.f32 %v542_v31, %v534_v30 }
 0x661   :  { %1396 = vtanh.f32 %v1793_v32 }
 0x667   :  { %v1397_v33 = vpop.eup %1396 }
 0x668   :  { %547 = vrot.lane.b32.xlu2 %v1397_v33, %s1479_s0 }
 0x6c2   :  { %v548_v34 = vpop.permute.xlu2 %547 }
 0x6c3   :  { %v585_v24 = vpop.permute.xlu0 %584  ;;  %v550_v36 = vmul.f32 %v548_v34, %v531_v25 }
 0x6c4   :  { %v587_v37 = vmul.f32 %v585_v24, %v568_v63 }
 0x6c5   :  { %589 = vrot.lane.b32.xlu1 %v550_v36, %s1480_s2 }
 0x6c6   :  { %595 = vrot.lane.b32.xlu2 %v587_v37, %s1481_s17 }
 0x720   :  { %v596_v38 = vpop.permute.xlu2 %595 }
 0x721   :  { %1300 = vst.msk [vmem:[%s1967_s4 + $0x28] sm:$0xff] %vm344_vm10, %v596_v38 }
 0x737   :  { %v590_v22 = vpop.permute.xlu1 %589 }
 0x738   :  { %1299 = vst.msk [vmem:[%s1967_s4 + $0x10] sm:$0xff] %vm337_vm9, %v590_v22  ;;  %v600_v40 = vsel %vm337_vm9, %v590_v22, %v596_v38  ;;  %v116_v22 = vpop.f32.mrf.mxu0 }
 0x739   :  { %v601_v41 = vpack.c.bf16 %v600_v40, %v600_v40 }
 0x73b   :  { %1301 = vmatmul.msk.bf16.vlgmr.msrb.gmra.mxu2 %vm84_vm0, %v601_v41  ;;  %1302 = vmatmul.msk.bf16.vlgmr.msrb.gmra.mxu3 %vm84_vm0, %v601_v41 }
 0x73c   :  { %1106 = vmatpush.bf16.msrb.mxu3 %v1593_v35  ;;  %1093 = vmatpush.bf16.msrb.mxu2 %v1525_v7 }
 0x740   :  { %1107 = vmatpush.bf16.msrb.mxu3 %v1615_v44  ;;  %1094 = vmatpush.bf16.msrb.mxu2 %v1546_v16  ;;  %v1847_v40 = vpop.f32.mrf.mxu0 }
 0x744   :  { %1108 = vmatpush.bf16.msrb.mxu3 %v1626_v48  ;;  %1095 = vmatpush.bf16.msrb.mxu2 %v1573_v27 }
 0x748   :  { %1109 = vmatpush.bf16.msrb.mxu3 %v1638_v51  ;;  %1096 = vmatpush.bf16.msrb.mxu2 %v1602_v39  ;;  %v1849_v41 = vpop.f32.mrf.mxu0 }
 0x750   :  { %v1851_v42 = vpop.f32.mrf.mxu0 }
 0x7be   :  { %v614_v45 = vpop.f32.mrf.mxu2  ;;  %v627_v23 = vpop.f32.mrf.mxu3 }
 0x7bf   :  { %v635_v35 = vadd.f32 %v614_v45, %v114_v43  ;;  %v640_v7 = vadd.f32 %v627_v23, %v1706_v19  ;;  %v117_v43 = vadd.f32 %v116_v22, %v1694_v0 }
 0x7c1   :  { %1398 = vtanh.f32 %v635_v35  ;;  %v1303_v27 = vmul.f32 -1.442695, %v635_v35  ;;  %v1304_v39 = vmul.f32 -1.442695, %v640_v7 }
 0x7c2   :  { %1400 = vtanh.f32 %v640_v7 }
 0x7c3   :  { %1402 = vpow2.f32 %v1303_v27 }
 0x7c4   :  { %1404 = vpow2.f32 %v1304_v39 }
 0x7c6   :  { %v616_v44 = vpop.f32.mrf.mxu2  ;;  %v629_v16 = vpop.f32.mrf.mxu3 }
 0x7c7   :  { %v1399_v46 = vpop.eup %1398 }
 0x7c8   :  { %v1401_v48 = vpop.eup %1400  ;;  %663 = vrot.lane.b32.xlu0 %v1399_v46, %s1479_s0 }
 0x7c9   :  { %700 = vrot.lane.b32.xlu1 %v1401_v48, %s1479_s0  ;;  %v1403_v51 = vpop.eup %1402 }
 0x7ca   :  { %v1405_v47 = vpop.eup %1404  ;;  %v644_v49 = vadd.f32 1.0, %v1403_v51 }
 0x7cb   :  { %v681_v50 = vadd.f32 1.0, %v1405_v47 }
 0x7cc   :  { %1406 = vrcp.f32 %v644_v49  ;;  %v656_v60 = vand.u32 2147483648, %v644_v49  ;;  %vm650_vm1 = vweird.f32 %v644_v49  ;;  %v654_v62 = vand.u32 2147483647, %v644_v49 }
 0x7cd   :  { %1408 = vrcp.f32 %v681_v50  ;;  %v693_v61 = vand.u32 2147483648, %v681_v50  ;;  %vm687_vm2 = vweird.f32 %v681_v50  ;;  %v691_v63 = vand.u32 2147483647, %v681_v50 }
 0x7ce   :  { %v657_v5 = vor.u32 1.1754944e-38, %v656_v60  ;;  %vm655_vm5 = vcmp.eq.f32.partialorder %v654_v62, 8.507059e+37 }
 0x7cf   :  { %v694_v6 = vor.u32 1.1754944e-38, %v693_v61  ;;  %vm692_vm6 = vcmp.eq.f32.partialorder %v691_v63, 8.507059e+37 }
 0x7d2   :  { %v1407_v19 = vpop.eup %1406 }
 0x7d3   :  { %v1409_v52 = vpop.eup %1408  ;;  %v646_v53 = vmul.f32 %v1407_v19, %v644_v49  ;;  %vm651_vm14 = vweird.f32 %v1407_v19 }
 0x7d4   :  { %v683_v21 = vmul.f32 %v1409_v52, %v681_v50  ;;  %vm688_vm15 = vweird.f32 %v1409_v52  ;;  %vm652_vm3 = vmor %vm650_vm1, %vm651_vm14 }
 0x7d5   :  { %v647_v54 = vsub.f32 1.0, %v646_v53  ;;  %vm689_vm4 = vmor %vm687_vm2, %vm688_vm15 }
 0x7d6   :  { %v684_v55 = vsub.f32 1.0, %v683_v21 }
 0x7d7   :  { %v648_v56 = vmul.f32 %v1407_v19, %v647_v54 }
 0x7d8   :  { %v685_v57 = vmul.f32 %v1409_v52, %v684_v55 }
 0x7d9   :  { %v649_v58 = vadd.f32 %v1407_v19, %v648_v56 }
 0x7da   :  { %v686_v59 = vadd.f32 %v1409_v52, %v685_v57 }
 0x7db   :  { %v653_v2 = vsel %vm652_vm3, %v1407_v19, %v649_v58 }
 0x7dc   :  { %v690_v3 = vsel %vm689_vm4, %v1409_v52, %v686_v59  ;;  %v658_v11 = vsel %vm655_vm5, %v657_v5, %v653_v2 }
 0x7dd   :  { %v695_v14 = vsel %vm692_vm6, %v694_v6, %v690_v3  ;;  %v661_v20 = vmul.f32 %v658_v11, %v1793_v32 }
 0x7de   :  { %v698_v4 = vmul.f32 %v695_v14, %v1788_v29 }
 0x83a   :  { %v664_v9 = vpop.permute.xlu0 %663 }
 0x83b   :  { %v701_v13 = vpop.permute.xlu1 %700  ;;  %v666_v17 = vmul.f32 %v664_v9, %v658_v11 }
 0x83c   :  { %v703_v18 = vmul.f32 %v701_v13, %v695_v14 }
 0x83d   :  { %668 = vrot.lane.b32.xlu2 %v666_v17, %s1479_s0 }
 0x83e   :  { %705 = vrot.lane.b32.xlu0 %v703_v18, %s1479_s0 }
 0x897   :  { %v669_v25 = vpop.permute.xlu2 %668 }
 0x898   :  { %v1825_v26 = vadd.f32 %v669_v25, %v661_v20 }
 0x89a   :  { %1410 = vtanh.f32 %v1825_v26 }
 0x8a0   :  { %v1411_v28 = vpop.eup %1410 }
 0x8a1   :  { %674 = vrot.lane.b32.xlu1 %v1411_v28, %s1479_s0 }
 0x8b0   :  { %v706_v10 = vpop.permute.xlu0 %705 }
 0x8b1   :  { %v1830_v30 = vadd.f32 %v706_v10, %v698_v4 }
 0x8b3   :  { %1412 = vtanh.f32 %v1830_v30 }
 0x8b9   :  { %v1413_v31 = vpop.eup %1412 }
 0x8ba   :  { %711 = vrot.lane.b32.xlu2 %v1413_v31, %s1479_s0 }
 0x913   :  { %v675_v33 = vpop.permute.xlu1 %674 }
 0x914   :  { %v712_v32 = vpop.permute.xlu2 %711  ;;  %v677_v34 = vmul.f32 %v675_v33, %v658_v11 }
 0x915   :  { %v714_v24 = vmul.f32 %v712_v32, %v695_v14 }
 0x916   :  { %716 = vrot.lane.b32.xlu0 %v677_v34, %s1480_s2 }
 0x917   :  { %722 = vrot.lane.b32.xlu1 %v714_v24, %s1481_s17 }
 0x988   :  { %v717_v36 = vpop.permute.xlu0 %716 }
 0x989   :  { %1305 = vst.msk [vmem:[%s1967_s4 + $0x18] sm:$0xff] %vm337_vm9, %v717_v36  ;;  %v723_v29 = vpop.permute.xlu1 %722 }
 0x98a   :  { %1306 = vst.msk [vmem:[%s1967_s4 + $0x20] sm:$0xff] %vm344_vm10, %v723_v29  ;;  %v727_v37 = vsel %vm337_vm9, %v717_v36, %v723_v29 }
 0x98b   :  { %v728_v38 = vpack.c.bf16 %v727_v37, %v727_v37 }
 0x98d   :  { %1307 = vmatmul.msk.bf16.vlgmr.msrb.gmra.mxu0 %vm84_vm0, %v728_v38  ;;  %1308 = vmatmul.msk.bf16.vlgmr.msrb.gmra.mxu1 %vm84_vm0, %v728_v38  ;;  %v119_v38 = vadd.f32 %v1847_v40, %v1694_v0 }
 0xa0a   :  { %v741_v45 = vpop.f32.mrf.mxu0  ;;  %v754_v23 = vpop.f32.mrf.mxu1 }
 0xa0b   :  { %v759_v35 = vadd.f32 %v741_v45, %v117_v43  ;;  %v761_v7 = vadd.f32 %v754_v23, %v1704_v15 }
 0xa0d   :  { %1414 = vtanh.f32 %v759_v35  ;;  %v1309_v27 = vmul.f32 -1.442695, %v759_v35  ;;  %v1310_v49 = vmul.f32 -1.442695, %v761_v7 }
 0xa0e   :  { %1416 = vtanh.f32 %v761_v7 }
 0xa0f   :  { %1418 = vpow2.f32 %v1309_v27 }
 0xa12   :  { %v743_v44 = vpop.f32.mrf.mxu0  ;;  %v756_v16 = vpop.f32.mrf.mxu1 }
 0xa13   :  { %v1415_v46 = vpop.eup %1414 }
 0xa14   :  { %v1417_v48 = vpop.eup %1416  ;;  %784 = vrot.lane.b32.xlu2 %v1415_v46, %s1479_s0 }
 0xa15   :  { %821 = vrot.lane.b32.xlu0 %v1417_v48, %s1479_s0  ;;  %v1419_v39 = vpop.eup %1418 }
 0xa16   :  { %v765_v51 = vadd.f32 1.0, %v1419_v39 }
 0xa18   :  { %1420 = vrcp.f32 %v765_v51  ;;  %v777_v54 = vand.u32 2147483648, %v765_v51  ;;  %vm771_vm8 = vweird.f32 %v765_v51  ;;  %v775_v55 = vand.u32 2147483647, %v765_v51 }
 0xa19   :  { %1422 = vpow2.f32 %v1310_v49 }
 0xa1a   :  { %v778_v57 = vor.u32 1.1754944e-38, %v777_v54  ;;  %vm776_vm12 = vcmp.eq.f32.partialorder %v775_v55, 8.507059e+37 }
 0xa1e   :  { %v1421_v47 = vpop.eup %1420 }
 0xa1f   :  { %v767_v50 = vmul.f32 %v1421_v47, %v765_v51  ;;  %v1423_v52 = vpop.eup %1422  ;;  %vm772_vm7 = vweird.f32 %v1421_v47 }
 0xa20   :  { %v802_v53 = vadd.f32 1.0, %v1423_v52  ;;  %vm773_vm11 = vmor %vm771_vm8, %vm772_vm7 }
 0xa21   :  { %v768_v15 = vsub.f32 1.0, %v767_v50 }
 0xa22   :  { %1424 = vrcp.f32 %v802_v53  ;;  %v814_v5 = vand.u32 2147483648, %v802_v53  ;;  %vm808_vm14 = vweird.f32 %v802_v53  ;;  %v812_v6 = vand.u32 2147483647, %v802_v53 }
 0xa23   :  { %v769_v19 = vmul.f32 %v1421_v47, %v768_v15 }
 0xa24   :  { %v815_v11 = vor.u32 1.1754944e-38, %v814_v5  ;;  %vm813_vm1 = vcmp.eq.f32.partialorder %v812_v6, 8.507059e+37 }
 0xa25   :  { %v770_v21 = vadd.f32 %v1421_v47, %v769_v19 }
 0xa27   :  { %v774_v56 = vsel %vm773_vm11, %v1421_v47, %v770_v21 }
 0xa28   :  { %v779_v59 = vsel %vm776_vm12, %v778_v57, %v774_v56  ;;  %v1425_v61 = vpop.eup %1424 }
 0xa29   :  { %v804_v62 = vmul.f32 %v1425_v61, %v802_v53  ;;  %vm809_vm13 = vweird.f32 %v1425_v61  ;;  %v782_v18 = vmul.f32 %v779_v59, %v1825_v26 }
 0xa2a   :  { %vm810_vm15 = vmor %vm808_vm14, %vm809_vm13 }
 0xa2b   :  { %v805_v63 = vsub.f32 1.0, %v804_v62 }
 0xa2d   :  { %v806_v2 = vmul.f32 %v1425_v61, %v805_v63 }
 0xa2f   :  { %v807_v3 = vadd.f32 %v1425_v61, %v806_v2 }
 0xa31   :  { %v811_v9 = vsel %vm810_vm15, %v1425_v61, %v807_v3 }
 0xa32   :  { %v816_v14 = vsel %vm813_vm1, %v815_v11, %v811_v9 }
 0xa33   :  { %v819_v20 = vmul.f32 %v816_v14, %v1830_v30 }
 0xa6e   :  { %v785_v58 = vpop.permute.xlu2 %784 }
 0xa6f   :  { %v787_v60 = vmul.f32 %v785_v58, %v779_v59 }
 0xa71   :  { %789 = vrot.lane.b32.xlu1 %v787_v60, %s1479_s0 }
 0xa87   :  { %v822_v13 = vpop.permute.xlu0 %821 }
 0xa88   :  { %v824_v17 = vmul.f32 %v822_v13, %v816_v14 }
 0xa8a   :  { %826 = vrot.lane.b32.xlu2 %v824_v17, %s1479_s0 }
 0xae3   :  { %v790_v25 = vpop.permute.xlu1 %789 }
 0xae4   :  { %v827_v28 = vpop.permute.xlu2 %826  ;;  %v1861_v4 = vadd.f32 %v790_v25, %v782_v18 }
 0xae5   :  { %v1863_v10 = vadd.f32 %v827_v28, %v819_v20 }
 0xae6   :  { %1426 = vtanh.f32 %v1861_v4 }
 0xae7   :  { %1428 = vtanh.f32 %v1863_v10 }
 0xaec   :  { %v1427_v31 = vpop.eup %1426 }
 0xaed   :  { %v1429_v33 = vpop.eup %1428  ;;  %795 = vrot.lane.b32.xlu0 %v1427_v31, %s1479_s0 }
 0xaee   :  { %832 = vrot.lane.b32.xlu1 %v1429_v33, %s1479_s0 }
 0xb5f   :  { %v796_v32 = vpop.permute.xlu0 %795 }
 0xb60   :  { %v833_v26 = vpop.permute.xlu1 %832  ;;  %v798_v34 = vmul.f32 %v796_v32, %v779_v59 }
 0xb61   :  { %v835_v30 = vmul.f32 %v833_v26, %v816_v14 }
 0xb62   :  { %837 = vrot.lane.b32.xlu2 %v798_v34, %s1480_s2 }
 0xb63   :  { %842 = vrot.lane.b32.xlu0 %v835_v30, %s1481_s17 }
 0xbbc   :  { %v838_v24 = vpop.permute.xlu2 %837 }
 0xbbd   :  { %1311 = vst.msk [vmem:[%s1967_s4 + $0x20] sm:$0xff] %vm337_vm9, %v838_v24 }
 0xbd5   :  { %v843_v36 = vpop.permute.xlu0 %842 }
 0xbd6   :  { %1312 = vst.msk [vmem:[%s1967_s4 + $0x18] sm:$0xff] %vm344_vm10, %v843_v36  ;;  %v846_v29 = vsel %vm337_vm9, %v838_v24, %v843_v36  ;;  %v122_v24 = vadd.f32 %v1849_v41, %v1694_v0 }
 0xbd7   :  { %v847_v37 = vpack.c.bf16 %v846_v29, %v846_v29 }
 0xbd9   :  { %1313 = vmatmul.msk.bf16.vlgmr.msra.gmra.mxu2 %vm84_vm0, %v847_v37  ;;  %1314 = vmatmul.msk.bf16.vlgmr.msra.gmra.mxu3 %vm84_vm0, %v847_v37 }
 0xc5c   :  { %v860_v22 = vpop.f32.mrf.mxu2  ;;  %v873_v43 = vpop.f32.mrf.mxu3 }
 0xc5d   :  { %v878_v45 = vadd.f32 %v860_v22, %v119_v38  ;;  %v880_v23 = vadd.f32 %v873_v43, %v1701_v12 }
 0xc5f   :  { %1430 = vtanh.f32 %v878_v45  ;;  %v1316_v46 = vmul.f32 -1.442695, %v880_v23  ;;  %v1315_v39 = vmul.f32 -1.442695, %v878_v45 }
 0xc60   :  { %1432 = vtanh.f32 %v880_v23 }
 0xc61   :  { %1434 = vpow2.f32 %v1316_v46 }
 0xc64   :  { %v862_v35 = vpop.f32.mrf.mxu2  ;;  %v875_v7 = vpop.f32.mrf.mxu3 }
 0xc65   :  { %v1431_v44 = vpop.eup %1430 }
 0xc66   :  { %v1433_v16 = vpop.eup %1432  ;;  %903 = vrot.lane.b32.xlu1 %v1431_v44, %s1479_s0 }
 0xc67   :  { %940 = vrot.lane.b32.xlu2 %v1433_v16, %s1479_s0  ;;  %v1435_v48 = vpop.eup %1434 }
 0xc68   :  { %v921_v27 = vadd.f32 1.0, %v1435_v48 }
 0xc6a   :  { %1436 = vrcp.f32 %v921_v27  ;;  %v933_v19 = vand.u32 2147483648, %v921_v27  ;;  %vm927_vm3 = vweird.f32 %v921_v27  ;;  %v931_v52 = vand.u32 2147483647, %v921_v27 }
 0xc6b   :  { %1438 = vpow2.f32 %v1315_v39 }
 0xc6c   :  { %v934_v21 = vor.u32 1.1754944e-38, %v933_v19  ;;  %vm932_vm5 = vcmp.eq.f32.partialorder %v931_v52, 8.507059e+37 }
 0xc70   :  { %v1437_v40 = vpop.eup %1436 }
 0xc71   :  { %v923_v51 = vmul.f32 %v1437_v40, %v921_v27  ;;  %v1439_v47 = vpop.eup %1438  ;;  %vm928_vm2 = vweird.f32 %v1437_v40 }
 0xc72   :  { %v884_v50 = vadd.f32 1.0, %v1439_v47  ;;  %vm929_vm4 = vmor %vm927_vm3, %vm928_vm2 }
 0xc73   :  { %v924_v12 = vsub.f32 1.0, %v923_v51 }
 0xc74   :  { %1440 = vrcp.f32 %v884_v50  ;;  %v896_v62 = vand.u32 2147483648, %v884_v50  ;;  %vm890_vm7 = vweird.f32 %v884_v50  ;;  %v894_v63 = vand.u32 2147483647, %v884_v50 }
 0xc75   :  { %v925_v49 = vmul.f32 %v1437_v40, %v924_v12 }
 0xc76   :  { %v897_v3 = vor.u32 1.1754944e-38, %v896_v62  ;;  %vm895_vm11 = vcmp.eq.f32.partialorder %v894_v63, 8.507059e+37 }
 0xc77   :  { %v926_v15 = vadd.f32 %v1437_v40, %v925_v49 }
 0xc79   :  { %v930_v53 = vsel %vm929_vm4, %v1437_v40, %v926_v15 }
 0xc7a   :  { %v935_v55 = vsel %vm932_vm5, %v934_v21, %v930_v53  ;;  %v1441_v56 = vpop.eup %1440 }
 0xc7b   :  { %v886_v58 = vmul.f32 %v1441_v56, %v884_v50  ;;  %vm891_vm6 = vweird.f32 %v1441_v56  ;;  %v938_v11 = vmul.f32 %v935_v55, %v1863_v10 }
 0xc7c   :  { %vm892_vm8 = vmor %vm890_vm7, %vm891_vm6 }
 0xc7d   :  { %v887_v59 = vsub.f32 1.0, %v886_v58 }
 0xc7f   :  { %v888_v60 = vmul.f32 %v1441_v56, %v887_v59 }
 0xc81   :  { %v889_v61 = vadd.f32 %v1441_v56, %v888_v60 }
 0xc83   :  { %v893_v2 = vsel %vm892_vm8, %v1441_v56, %v889_v61 }
 0xc84   :  { %v898_v6 = vsel %vm895_vm11, %v897_v3, %v893_v2 }
 0xc85   :  { %v901_v18 = vmul.f32 %v898_v6, %v1861_v4 }
 0xcc1   :  { %v941_v54 = vpop.permute.xlu2 %940 }
 0xcc2   :  { %v943_v57 = vmul.f32 %v941_v54, %v935_v55 }
 0xcc4   :  { %945 = vrot.lane.b32.xlu1 %v943_v57, %s1479_s0 }
 0xcd8   :  { %v904_v5 = vpop.permute.xlu1 %903 }
 0xcd9   :  { %v906_v9 = vmul.f32 %v904_v5, %v898_v6 }
 0xcdb   :  { %908 = vrot.lane.b32.xlu0 %v906_v9, %s1479_s0 }
 0xd36   :  { %v946_v13 = vpop.permute.xlu1 %945 }
 0xd37   :  { %v1890_v14 = vadd.f32 %v946_v13, %v938_v11 }
 0xd39   :  { %1442 = vtanh.f32 %v1890_v14 }
 0xd3f   :  { %v1443_v17 = vpop.eup %1442 }
 0xd40   :  { %951 = vrot.lane.b32.xlu0 %v1443_v17, %s1479_s0 }
 0xd4d   :  { %v909_v20 = vpop.permute.xlu0 %908 }
 0xd4e   :  { %v1895_v25 = vadd.f32 %v909_v20, %v901_v18 }
 0xd50   :  { %1444 = vtanh.f32 %v1895_v25 }
 0xd56   :  { %v1445_v28 = vpop.eup %1444 }
 0xd57   :  { %914 = vrot.lane.b32.xlu2 %v1445_v28, %s1479_s0 }
 0xdb1   :  { %v915_v31 = vpop.permute.xlu2 %914 }
 0xdb2   :  { %v952_v10 = vpop.permute.xlu0 %951  ;;  %v917_v33 = vmul.f32 %v915_v31, %v898_v6 }
 0xdb3   :  { %v954_v32 = vmul.f32 %v952_v10, %v935_v55 }
 0xdb4   :  { %956 = vrot.lane.b32.xlu1 %v917_v33, %s1480_s2  ;;  %v124_v33 = vadd.f32 %v1851_v42, %v1694_v0 }
 0xdb5   :  { %961 = vrot.lane.b32.xlu2 %v954_v32, %s1481_s17 }
 0xe0f   :  { %v962_v26 = vpop.permute.xlu2 %961 }
 0xe10   :  { %1318 = vst.msk [vmem:[%s1967_s4 + $0x10] sm:$0xff] %vm344_vm10, %v962_v26 }
 0xe26   :  { %v957_v4 = vpop.permute.xlu1 %956 }
 0xe27   :  { %1317 = vst.msk [vmem:[%s1967_s4 + $0x28] sm:$0xff] %vm337_vm9, %v957_v4  ;;  %v965_v34 = vsel %vm337_vm9, %v957_v4, %v962_v26 }
 0xe28   :  { %v966_v30 = vpack.c.bf16 %v965_v34, %v965_v34 }
 0xe2a   :  { %1319 = vmatmul.msk.bf16.vlgmr.msra.gmra.mxu0 %vm84_vm0, %v966_v30  ;;  %1320 = vmatmul.msk.bf16.vlgmr.msra.gmra.mxu1 %vm84_vm0, %v966_v30 }
 0xea7   :  { %v979_v36 = vpop.f32.mrf.mxu0  ;;  %v992_v29 = vpop.f32.mrf.mxu1 }
 0xea8   :  { %v997_v37 = vadd.f32 %v979_v36, %v122_v24  ;;  %v999_v38 = vadd.f32 %v992_v29, %v1699_v8 }
 0xeaa   :  { %1446 = vtanh.f32 %v997_v37  ;;  %v1321_v35 = vmul.f32 -1.442695, %v997_v37  ;;  %v1322_v7 = vmul.f32 -1.442695, %v999_v38 }
 0xeab   :  { %1448 = vtanh.f32 %v999_v38 }
 0xeac   :  { %1450 = vpow2.f32 %v1321_v35 }
 0xead   :  { %1452 = vpow2.f32 %v1322_v7 }
 0xeaf   :  { %v981_v22 = vpop.f32.mrf.mxu0  ;;  %v994_v43 = vpop.f32.mrf.mxu1 }
 0xeb0   :  { %v1447_v45 = vpop.eup %1446 }
 0xeb1   :  { %v1449_v23 = vpop.eup %1448  ;;  %1022 = vrot.lane.b32.xlu0 %v1447_v45, %s1479_s0 }
 0xeb2   :  { %1059 = vrot.lane.b32.xlu1 %v1449_v23, %s1479_s0  ;;  %v1451_v41 = vpop.eup %1450 }
 0xeb3   :  { %v1453_v44 = vpop.eup %1452  ;;  %v1003_v16 = vadd.f32 1.0, %v1451_v41 }
 0xeb4   :  { %v1040_v46 = vadd.f32 1.0, %v1453_v44 }
 0xeb5   :  { %1454 = vrcp.f32 %v1003_v16  ;;  %v1015_v15 = vand.u32 2147483648, %v1003_v16  ;;  %vm1009_vm14 = vweird.f32 %v1003_v16  ;;  %v1013_v52 = vand.u32 2147483647, %v1003_v16 }
 0xeb6   :  { %1456 = vrcp.f32 %v1040_v46  ;;  %v1052_v19 = vand.u32 2147483648, %v1040_v46  ;;  %vm1046_vm15 = vweird.f32 %v1040_v46  ;;  %v1050_v53 = vand.u32 2147483647, %v1040_v46 }
 0xeb7   :  { %v1016_v55 = vor.u32 1.1754944e-38, %v1015_v15  ;;  %vm1014_vm3 = vcmp.eq.f32.partialorder %v1013_v52, 8.507059e+37 }
 0xeb8   :  { %v1053_v56 = vor.u32 1.1754944e-38, %v1052_v19  ;;  %vm1051_vm4 = vcmp.eq.f32.partialorder %v1050_v53, 8.507059e+37 }
 0xebb   :  { %v1455_v8 = vpop.eup %1454 }
 0xebc   :  { %v1457_v48 = vpop.eup %1456  ;;  %v1005_v27 = vmul.f32 %v1455_v8, %v1003_v16  ;;  %vm1010_vm12 = vweird.f32 %v1455_v8 }
 0xebd   :  { %v1042_v40 = vmul.f32 %v1457_v48, %v1040_v46  ;;  %vm1047_vm13 = vweird.f32 %v1457_v48  ;;  %vm1011_vm1 = vmor %vm1009_vm14, %vm1010_vm12 }
 0xebe   :  { %v1006_v39 = vsub.f32 1.0, %v1005_v27  ;;  %vm1048_vm2 = vmor %vm1046_vm15, %vm1047_vm13 }
 0xebf   :  { %v1043_v51 = vsub.f32 1.0, %v1042_v40 }
 0xec0   :  { %v1007_v12 = vmul.f32 %v1455_v8, %v1006_v39 }
 0xec1   :  { %v1044_v47 = vmul.f32 %v1457_v48, %v1043_v51 }
 0xec2   :  { %v1008_v49 = vadd.f32 %v1455_v8, %v1007_v12 }
 0xec3   :  { %v1045_v50 = vadd.f32 %v1457_v48, %v1044_v47 }
 0xec4   :  { %v1012_v21 = vsel %vm1011_vm1, %v1455_v8, %v1008_v49 }
 0xec5   :  { %v1049_v54 = vsel %vm1048_vm2, %v1457_v48, %v1045_v50  ;;  %v1017_v58 = vsel %vm1014_vm3, %v1016_v55, %v1012_v21 }
 0xec6   :  { %v1054_v60 = vsel %vm1051_vm4, %v1053_v56, %v1049_v54  ;;  %v1020_v63 = vmul.f32 %v1017_v58, %v1895_v25 }
 0xec7   :  { %v1057_v6 = vmul.f32 %v1054_v60, %v1890_v14 }
 0xf23   :  { %v1023_v57 = vpop.permute.xlu0 %1022 }
 0xf24   :  { %v1060_v59 = vpop.permute.xlu1 %1059  ;;  %v1025_v61 = vmul.f32 %v1023_v57, %v1017_v58 }
 0xf25   :  { %v1062_v62 = vmul.f32 %v1060_v59, %v1054_v60 }
 0xf26   :  { %1027 = vrot.lane.b32.xlu2 %v1025_v61, %s1479_s0 }
 0xf27   :  { %1064 = vrot.lane.b32.xlu0 %v1062_v62, %s1479_s0 }
 0xf80   :  { %v1028_v2 = vpop.permute.xlu2 %1027 }
 0xf81   :  { %v1920_v3 = vadd.f32 %v1028_v2, %v1020_v63 }
 0xf83   :  { %1458 = vtanh.f32 %v1920_v3 }
 0xf89   :  { %v1459_v5 = vpop.eup %1458 }
 0xf8a   :  { %1033 = vrot.lane.b32.xlu1 %v1459_v5, %s1479_s0 }
 0xf99   :  { %v1065_v9 = vpop.permute.xlu0 %1064 }
 0xf9a   :  { %v1925_v11 = vadd.f32 %v1065_v9, %v1057_v6 }
 0xf9c   :  { %1460 = vtanh.f32 %v1925_v11 }
 0xfa2   :  { %v1461_v13 = vpop.eup %1460 }
 0xfa3   :  { %1070 = vrot.lane.b32.xlu2 %v1461_v13, %s1479_s0 }
 0xffc   :  { %v1034_v17 = vpop.permute.xlu1 %1033 }
 0xffd   :  { %v1071_v18 = vpop.permute.xlu2 %1070  ;;  %v1036_v20 = vmul.f32 %v1034_v17, %v1017_v58 }
 0xffe   :  { %v1073_v25 = vmul.f32 %v1071_v18, %v1054_v60 }
 0xfff   :  { %1075 = vrot.lane.b32.xlu0 %v1036_v20, %s1480_s2 }
0x1000   :  { %1080 = vrot.lane.b32.xlu1 %v1073_v25, %s1481_s17 }
0x1071   :  { %v1076_v28 = vpop.permute.xlu0 %1075 }
0x1072   :  { %1323 = vst.msk [vmem:[%s1967_s4 + $0x30] sm:$0xff] %vm337_vm9, %v1076_v28  ;;  %v1081_v14 = vpop.permute.xlu1 %1080 }
0x1073   :  { %1324 = vst.msk [vmem:[%s1967_s4 + $0x8] sm:$0xff] %vm344_vm10, %v1081_v14  ;;  %v1084_v31 = vsel %vm337_vm9, %v1076_v28, %v1081_v14 }
0x1074   :  { %v1085_v10 = vpack.c.bf16 %v1084_v31, %v1084_v31 }
0x1076   :  { %1325 = vmatmul.msk.bf16.vlgmr.msrb.gmra.mxu2 %vm84_vm0, %v1085_v10  ;;  %1326 = vmatmul.msk.bf16.vlgmr.msrb.gmra.mxu3 %vm84_vm0, %v1085_v10 }
0x10f9   :  { %v1098_v32 = vpop.f32.mrf.mxu2  ;;  %v1111_v26 = vpop.f32.mrf.mxu3 }
0x10fa   :  { %v1116_v4 = vadd.f32 %v1098_v32, %v124_v33  ;;  %v1118_v34 = vadd.f32 %v1111_v26, %v1696_v1 }
0x10fc   :  { %1462 = vtanh.f32 %v1116_v4  ;;  %v1327_v37 = vmul.f32 -1.442695, %v1116_v4  ;;  %v1328_v42 = vmul.f32 -1.442695, %v1118_v34 }
0x10fd   :  { %1464 = vtanh.f32 %v1118_v34 }
0x10fe   :  { %1466 = vpow2.f32 %v1327_v37 }
0x1101   :  { %v1100_v30 = vpop.f32.mrf.mxu2  ;;  %v1113_v24 = vpop.f32.mrf.mxu3 }
0x1102   :  { %v1463_v36 = vpop.eup %1462 }
0x1103   :  { %v1465_v29 = vpop.eup %1464  ;;  %1141 = vrot.lane.b32.xlu2 %v1463_v36, %s1479_s0 }
0x1104   :  { %1178 = vrot.lane.b32.xlu0 %v1465_v29, %s1479_s0  ;;  %v1467_v38 = vpop.eup %1466 }
0x1105   :  { %v1122_v22 = vadd.f32 1.0, %v1467_v38 }
0x1107   :  { %1468 = vrcp.f32 %v1122_v22  ;;  %v1134_v41 = vand.u32 2147483648, %v1122_v22  ;;  %vm1128_vm5 = vweird.f32 %v1122_v22  ;;  %v1132_v44 = vand.u32 2147483647, %v1122_v22 }
0x1108   :  { %1470 = vpow2.f32 %v1328_v42 }
0x1109   :  { %v1135_v46 = vor.u32 1.1754944e-38, %v1134_v41  ;;  %vm1133_vm7 = vcmp.eq.f32.partialorder %v1132_v44, 8.507059e+37 }
0x110d   :  { %v1469_v0 = vpop.eup %1468 }
0x110e   :  { %v1124_v43 = vmul.f32 %v1469_v0, %v1122_v22  ;;  %v1471_v23 = vpop.eup %1470  ;;  %vm1129_vm0 = vweird.f32 %v1469_v0 }
0x110f   :  { %v1159_v35 = vadd.f32 1.0, %v1471_v23  ;;  %vm1130_vm6 = vmor %vm1128_vm5, %vm1129_vm0 }
0x1110   :  { %v1125_v1 = vsub.f32 1.0, %v1124_v43 }
0x1111   :  { %1472 = vrcp.f32 %v1159_v35  ;;  %v1171_v49 = vand.u32 2147483648, %v1159_v35  ;;  %vm1165_vm11 = vweird.f32 %v1159_v35  ;;  %v1169_v50 = vand.u32 2147483647, %v1159_v35 }
0x1112   :  { %v1126_v45 = vmul.f32 %v1469_v0, %v1125_v1 }
0x1113   :  { %v1172_v19 = vor.u32 1.1754944e-38, %v1171_v49  ;;  %vm1170_vm13 = vcmp.eq.f32.partialorder %v1169_v50, 8.507059e+37 }
0x1114   :  { %v1127_v7 = vadd.f32 %v1469_v0, %v1126_v45 }
0x1116   :  { %v1131_v16 = vsel %vm1130_vm6, %v1469_v0, %v1127_v7 }
0x1117   :  { %v1136_v48 = vsel %vm1133_vm7, %v1135_v46, %v1131_v16  ;;  %v1473_v40 = vpop.eup %1472 }
0x1118   :  { %v1161_v39 = vmul.f32 %v1473_v40, %v1159_v35  ;;  %vm1166_vm8 = vweird.f32 %v1473_v40  ;;  %v1139_v54 = vmul.f32 %v1136_v48, %v1920_v3 }
0x1119   :  { %vm1167_vm12 = vmor %vm1165_vm11, %vm1166_vm8 }
0x111a   :  { %v1162_v51 = vsub.f32 1.0, %v1161_v39 }
0x111c   :  { %v1163_v12 = vmul.f32 %v1473_v40, %v1162_v51 }
0x111e   :  { %v1164_v47 = vadd.f32 %v1473_v40, %v1163_v12 }
0x1120   :  { %v1168_v15 = vsel %vm1167_vm12, %v1473_v40, %v1164_v47 }
0x1121   :  { %v1173_v53 = vsel %vm1170_vm13, %v1172_v19, %v1168_v15 }
0x1122   :  { %v1176_v55 = vmul.f32 %v1173_v53, %v1925_v11 }
0x115d   :  { %v1142_v8 = vpop.permute.xlu2 %1141 }
0x115e   :  { %v1144_v27 = vmul.f32 %v1142_v8, %v1136_v48 }
0x1160   :  { %1146 = vrot.lane.b32.xlu1 %v1144_v27, %s1479_s0 }
0x1176   :  { %v1179_v52 = vpop.permute.xlu0 %1178 }
0x1177   :  { %v1181_v21 = vmul.f32 %v1179_v52, %v1173_v53 }
0x1179   :  { %1183 = vrot.lane.b32.xlu2 %v1181_v21, %s1479_s0 }
0x11d2   :  { %v1147_v56 = vpop.permute.xlu1 %1146 }
0x11d3   :  { %v1184_v57 = vpop.permute.xlu2 %1183  ;;  %v1149_v58 = vadd.f32 %v1147_v56, %v1139_v54 }
0x11d4   :  { %v1186_v59 = vadd.f32 %v1184_v57, %v1176_v55 }
0x11d5   :  { %1474 = vtanh.f32 %v1149_v58 }
0x11d6   :  { %1476 = vtanh.f32 %v1186_v59 }
0x11db   :  { %v1475_v60 = vpop.eup %1474 }
0x11dc   :  { %v1477_v61 = vpop.eup %1476  ;;  %1152 = vrot.lane.b32.xlu0 %v1475_v60, %s1479_s0 }
0x11dd   :  { %1189 = vrot.lane.b32.xlu1 %v1477_v61, %s1479_s0 }
0x124e   :  { %v1153_v62 = vpop.permute.xlu0 %1152 }
0x124f   :  { %v1190_v63 = vpop.permute.xlu1 %1189  ;;  %v1155_v2 = vmul.f32 %v1153_v62, %v1136_v48 }
0x1250   :  { %v1192_v5 = vmul.f32 %v1190_v63, %v1173_v53 }
0x1251   :  { %1194 = vrot.lane.b32.xlu2 %v1155_v2, %s1480_s2 }
0x1252   :  { %1199 = vrot.lane.b32.xlu0 %v1192_v5, %s1481_s17 }
0x12ab   :  { %v1195_v3 = vpop.permute.xlu2 %1194 }
0x12ac   :  { %1329 = vst.msk [vmem:[%s1967_s4 + $0x38] sm:$0xff] %vm337_vm9, %v1195_v3 }
0x12c4   :  { %v1200_v6 = vpop.permute.xlu0 %1199 }
0x12c5   :  { %1202 = vst.msk [vmem:[%s1967_s4] sm:$0xff] %vm344_vm10, %v1200_v6 }

// kernel: bilstm_for_ner_forward.5
= control target key start
LH: loop header
LB: loop body
LE: loop exit
PB: predicated region body
PF: predicated region fallthrough
CT: control target
= control target key end

     0   :  { %vm36_vm0 = vcmask 523264   ;;  %v712_v16 = vmov 64.0   ;;  %s1227_s0 = inlined_call_operand.vmem [shape: f32[64,64], index: 0, kind: input, shape index: {}]   ;;  %s1228_s1 = inlined_call_operand.vmem [shape: f32[1,64], index: 1, kind: input, shape index: {}]   ;;  %s1229_s2 = inlined_call_operand.vmem [shape: f32[1,64], index: 2, kind: input, shape index: {}]   ;;  %s1230_s4 = inlined_call_operand.vmem [shape: f32[1,128], index: 4, kind: input, shape index: {}]   ;;  %s1231_s3 = inlined_call_operand.vmem [shape: f32[64,128], index: 3, kind: input, shape index: {}]   ;;  %s1232_s5 = inlined_call_operand.vmem [shape: s32[64,1], index: 5, kind: input, shape index: {}]   ;;  %s1233_s7 = inlined_call_operand.vmem [shape: f32[64,128], index: 7, kind: output, shape index: {0}]   ;;  %s1234_s6 = inlined_call_operand.vmem [shape: s32[64,1], index: 6, kind: input, shape index: {}]   ;;  %s1235_s8 = inlined_call_operand.vmem [shape: f32[1,8,128], index: 8, kind: output, shape index: {1}]  }
   0x1   :  { %v30_v0 = vld [vmem:[%s1227_s0 + $0x10] sm:$0xff]  ;;  %v29_v1 = vld [vmem:[%s1227_s0 + $0x8] sm:$0xff]  ;;  %v28_v2 = vld [vmem:[%s1227_s0] sm:$0xff]  ;;  %662 = vrcp.f32 %v712_v16 }
   0x2   :  { %v43_v3 = vsel %vm36_vm0, %v30_v0, 0.0  ;;  %v40_v4 = vsel %vm36_vm0, %v29_v1, 0.0  ;;  %v37_v5 = vsel %vm36_vm0, %v28_v2, 0.0  ;;  %v34_v6 = vld [vmem:[%s1227_s0 + $0x30] sm:$0xff]  ;;  %v33_v7 = vld [vmem:[%s1227_s0 + $0x28] sm:$0xff]  ;;  %v32_v8 = vld [vmem:[%s1227_s0 + $0x20] sm:$0xff] }
   0x3   :  { %44 = vadd.xlane.f32.xlu1 %v43_v3  ;;  %41 = vadd.xlane.f32.xlu2 %v40_v4  ;;  %v55_v9 = vsel %vm36_vm0, %v34_v6, 0.0  ;;  %v52_v10 = vsel %vm36_vm0, %v33_v7, 0.0  ;;  %v49_v11 = vsel %vm36_vm0, %v32_v8, 0.0  ;;  %v35_v12 = vld [vmem:[%s1227_s0 + $0x38] sm:$0xff]  ;;  %v246_v4 = vld [vmem:[%s1231_s3 + $0x10] sm:$0xff] }
   0x4   :  { %38 = vadd.xlane.f32.xlu0 %v37_v5  ;;  %v31_v13 = vld [vmem:[%s1227_s0 + $0x18] sm:$0xff]  ;;  %v58_v14 = vsel %vm36_vm0, %v35_v12, 0.0  ;;  %v245_v5 = vld [vmem:[%s1231_s3 + $0x8] sm:$0xff] }
   0x5   :  { %v46_v15 = vsel %vm36_vm0, %v31_v13, 0.0  ;;  %v251_v63 = vld [vmem:[%s1231_s3 + $0x38] sm:$0xff] }
   0x6   :  { %288 = vmatpush.msra.mxu0 %v251_v63  ;;  %625 = vmatpush.msra.mxu1 %v251_v63  ;;  %v247_v3 = vld [vmem:[%s1231_s3 + $0x18] sm:$0xff] }
   0x7   :  { %v663_v17 = vpop.eup %662  ;;  %626 = vmatpush.msra.mxu2 %v251_v63  ;;  %627 = vmatpush.msra.mxu3 %v251_v63  ;;  %v919_v63 = vld [vmem:[%s1228_s1] ss:$0 sm:$0xff] }
   0x8   :  { %v62_v18 = vmul.f32 64.0, %v663_v17  ;;  %vm66_vm1 = vweird.f32 %v663_v17 }
   0xa   :  { %v63_v19 = vsub.f32 1.0, %v62_v18 }
   0xb   :  { %56 = vadd.xlane.f32.xlu1 %v55_v9  ;;  %53 = vadd.xlane.f32.xlu2 %v52_v10 }
   0xc   :  { %50 = vadd.xlane.f32.xlu0 %v49_v11  ;;  %v64_v20 = vmul.f32 %v663_v17, %v63_v19 }
   0xe   :  { %v65_v21 = vadd.f32 %v663_v17, %v64_v20 }
  0x10   :  { %v792_v22 = vsel %vm66_vm1, %v663_v17, %v65_v21  ;;  %v713_v21 = vmov 0  }
  0x11   :  { %656 = vset.pattern.permute.xlu0 %v713_v21  ;;  %657 = vset.pattern.permute.xlu1 %v713_v21 }
  0x12   :  { %658 = vset.pattern.permute.xlu2 %v713_v21 }
  0x13   :  { %59 = vadd.xlane.f32.xlu1 %v58_v14 }
  0x14   :  { %47 = vadd.xlane.f32.xlu0 %v46_v15 }
  0x76   :  { %v45_v23 = vpop.xlane.xlu1 %44  ;;  %v42_v24 = vpop.xlane.xlu2 %41 }
  0x77   :  { %v70_v25 = vmul.f32 %v792_v22, %v45_v23  ;;  %v39_v26 = vpop.xlane.xlu0 %38  ;;  %v69_v39 = vmul.f32 %v792_v22, %v42_v24  ;;  %v876_v23 = vld [vmem:[%s1232_s5] sm:$0xff] }
  0x78   :  { %v68_v27 = vmul.f32 %v792_v22, %v39_v26 }
  0x79   :  { %v796_v28 = vsub.f32 %v30_v0, %v70_v25  ;;  %v820_v46 = vsub.f32 %v29_v1, %v69_v39  ;;  %v250_v0 = vld [vmem:[%s1231_s3 + $0x30] sm:$0xff]  ;;  %v249_v1 = vld [vmem:[%s1231_s3 + $0x28] sm:$0xff] }
  0x7a   :  { %v798_v29 = vsub.f32 %v28_v2, %v68_v27  ;;  %289 = vmatpush.msra.mxu0 %v250_v0  ;;  %628 = vmatpush.msra.mxu1 %v250_v0  ;;  %v248_v2 = vld [vmem:[%s1231_s3 + $0x20] sm:$0xff] }
  0x7b   :  { %v86_v30 = vmul.f32 %v796_v28, %v796_v28  ;;  %v85_v55 = vmul.f32 %v820_v46, %v820_v46  ;;  %629 = vmatpush.msra.mxu2 %v250_v0  ;;  %630 = vmatpush.msra.mxu3 %v250_v0  ;;  %v924_v0 = vld [vmem:[%s1232_s5 + $0x20] sm:$0xff] }
  0x7c   :  { %v84_v31 = vmul.f32 %v798_v29, %v798_v29  ;;  %290 = vmatpush.msra.mxu0 %v249_v1  ;;  %631 = vmatpush.msra.mxu1 %v249_v1 }
  0x7d   :  { %v98_v32 = vsel %vm36_vm0, %v86_v30, 0.0  ;;  %v95_v58 = vsel %vm36_vm0, %v85_v55, 0.0  ;;  %632 = vmatpush.msra.mxu2 %v249_v1  ;;  %633 = vmatpush.msra.mxu3 %v249_v1 }
  0x7e   :  { %99 = vadd.xlane.f32.xlu1 %v98_v32  ;;  %v57_v33 = vpop.xlane.xlu1 %56  ;;  %v54_v34 = vpop.xlane.xlu2 %53  ;;  %v92_v35 = vsel %vm36_vm0, %v84_v31, 0.0  ;;  %291 = vmatpush.msra.mxu0 %v248_v2 }
  0x7f   :  { %v74_v36 = vmul.f32 %v792_v22, %v57_v33  ;;  %v73_v37 = vmul.f32 %v792_v22, %v54_v34  ;;  %93 = vadd.xlane.f32.xlu2 %v92_v35  ;;  %v51_v38 = vpop.xlane.xlu0 %50  ;;  %634 = vmatpush.msra.mxu1 %v248_v2  ;;  %v889_v34 = vld [vmem:[%s1232_s5 + $0x8] sm:$0xff] }
  0x80   :  { %v72_v40 = vmul.f32 %v792_v22, %v51_v38  ;;  %635 = vmatpush.msra.mxu2 %v248_v2  ;;  %636 = vmatpush.msra.mxu3 %v248_v2 }
  0x81   :  { %v810_v41 = vsub.f32 %v34_v6, %v74_v36  ;;  %v812_v42 = vsub.f32 %v33_v7, %v73_v37  ;;  %292 = vmatpush.msra.mxu0 %v247_v3  ;;  %637 = vmatpush.msra.mxu1 %v247_v3  ;;  %v244_v6 = vld [vmem:[%s1231_s3] sm:$0xff] }
  0x82   :  { %v814_v43 = vsub.f32 %v32_v8, %v72_v40  ;;  %638 = vmatpush.msra.mxu2 %v247_v3  ;;  %639 = vmatpush.msra.mxu3 %v247_v3  ;;  %v930_v3 = vld [vmem:[%s1232_s5 + $0x10] sm:$0xff] }
  0x83   :  { %v89_v44 = vmul.f32 %v812_v42, %v812_v42  ;;  %v90_v45 = vmul.f32 %v810_v41, %v810_v41  ;;  %293 = vmatpush.msra.mxu0 %v246_v4  ;;  %640 = vmatpush.msra.mxu1 %v246_v4 }
  0x84   :  { %v88_v47 = vmul.f32 %v814_v43, %v814_v43  ;;  %641 = vmatpush.msra.mxu2 %v246_v4  ;;  %642 = vmatpush.msra.mxu3 %v246_v4 }
  0x85   :  { %v107_v48 = vsel %vm36_vm0, %v89_v44, 0.0  ;;  %v110_v49 = vsel %vm36_vm0, %v90_v45, 0.0  ;;  %294 = vmatpush.msra.mxu0 %v245_v5  ;;  %643 = vmatpush.msra.mxu1 %v245_v5 }
  0x86   :  { %108 = vadd.xlane.f32.xlu1 %v107_v48  ;;  %v104_v50 = vsel %vm36_vm0, %v88_v47, 0.0  ;;  %v60_v51 = vpop.xlane.xlu1 %59  ;;  %644 = vmatpush.msra.mxu2 %v245_v5 }
  0x87   :  { %111 = vadd.xlane.f32.xlu2 %v110_v49  ;;  %105 = vadd.xlane.f32.xlu0 %v104_v50  ;;  %v48_v52 = vpop.xlane.xlu0 %47  ;;  %v75_v54 = vmul.f32 %v792_v22, %v60_v51 }
  0x88   :  { %v71_v53 = vmul.f32 %v792_v22, %v48_v52  ;;  %645 = vmatpush.msra.mxu3 %v245_v5  ;;  %295 = vmatpush.msra.mxu0 %v244_v6 }
  0x89   :  { %v833_v57 = vsub.f32 %v35_v12, %v75_v54  ;;  %646 = vmatpush.msra.mxu1 %v244_v6  ;;  %647 = vmatpush.msra.mxu2 %v244_v6 }
  0x8a   :  { %v831_v56 = vsub.f32 %v31_v13, %v71_v53  ;;  %648 = vmatpush.msra.mxu3 %v244_v6 }
  0x8b   :  { %v91_v61 = vmul.f32 %v833_v57, %v833_v57 }
  0x8c   :  { %v87_v59 = vmul.f32 %v831_v56, %v831_v56 }
  0x8d   :  { %v113_v62 = vsel %vm36_vm0, %v91_v61, 0.0 }
  0x8e   :  { %v101_v60 = vsel %vm36_vm0, %v87_v59, 0.0 }
  0x8f   :  { %96 = vadd.xlane.f32.xlu0 %v95_v58  ;;  %102 = vadd.xlane.f32.xlu2 %v101_v60 }
  0x97   :  { %114 = vadd.xlane.f32.xlu0 %v113_v62 }
  0x9f   :  { %431 = vperm.xlu1 %657, %v889_v34  }
  0xa7   :  { %440 = vperm.xlu1 %657, %v924_v0   ;;  %434 = vperm.xlu2 %658, %v930_v3  }
  0xab   :  { %428 = vperm.xlu0 %656, %v876_v23  }
  0xf1   :  { %v100_v7 = vpop.xlane.xlu1 %99 }
  0xf2   :  { %v118_v8 = vmul.f32 %v100_v7, %v792_v22  ;;  %v94_v9 = vpop.xlane.xlu2 %93  ;;  %v937_v7 = vld [vmem:[%s1229_s2] ss:$0 sm:$0xff] }
  0xf3   :  { %v116_v10 = vmul.f32 %v94_v9, %v792_v22 }
  0xf4   :  { %v126_v11 = vadd.f32 1e-05, %v118_v8 }
  0xf5   :  { %v124_v12 = vadd.f32 1e-05, %v116_v10 }
  0xf6   :  { %664 = vrsqrt.f32 %v126_v11  ;;  %vm158_vm4 = vweird.f32 %v126_v11 }
  0xf7   :  { %666 = vrsqrt.f32 %v124_v12  ;;  %vm138_vm6 = vweird.f32 %v124_v12 }
  0xf9   :  { %v109_v13 = vpop.xlane.xlu1 %108 }
  0xfa   :  { %v121_v14 = vmul.f32 %v109_v13, %v792_v22  ;;  %v112_v15 = vpop.xlane.xlu2 %111  ;;  %v106_v16 = vpop.xlane.xlu0 %105 }
  0xfb   :  { %v122_v17 = vmul.f32 %v112_v15, %v792_v22  ;;  %v120_v18 = vmul.f32 %v106_v16, %v792_v22 }
  0xfc   :  { %v665_v19 = vpop.eup %664  ;;  %v871_v20 = vadd.f32 1e-05, %v121_v14 }
  0xfd   :  { %v667_v24 = vpop.eup %666  ;;  %v153_v25 = vmul.f32 %v665_v19, %v126_v11  ;;  %v878_v26 = vadd.f32 1e-05, %v122_v17  ;;  %v880_v27 = vadd.f32 1e-05, %v120_v18  ;;  %vm159_vm2 = vweird.f32 %v665_v19 }
  0xfe   :  { %v133_v30 = vmul.f32 %v667_v24, %v124_v12  ;;  %668 = vrsqrt.f32 %v871_v20  ;;  %vm139_vm3 = vweird.f32 %v667_v24  ;;  %vm902_vm5 = vmor %vm158_vm4, %vm159_vm2  ;;  %vm188_vm8 = vweird.f32 %v871_v20 }
  0xff   :  { %v154_v31 = vmul.f32 %v665_v19, %v153_v25  ;;  %670 = vrsqrt.f32 %v878_v26  ;;  %vm140_vm7 = vmor %vm138_vm6, %vm139_vm3  ;;  %vm198_vm13 = vweird.f32 %v878_v26  ;;  %vm178_vm15 = vweird.f32 %v880_v27  ;;  %v965_v25 = vld [vmem:[%s1232_s5 + $0x18] sm:$0xff] }
 0x100   :  { %v134_v32 = vmul.f32 %v667_v24, %v133_v30  ;;  %672 = vrsqrt.f32 %v880_v27  ;;  %437 = vperm.xlu2 %658, %v965_v25  }
 0x101   :  { %v155_v33 = vmul.f32 0.5, %v154_v31 }
 0x102   :  { %v135_v35 = vmul.f32 0.5, %v134_v32  ;;  %v103_v36 = vpop.xlane.xlu2 %102  ;;  %v97_v37 = vpop.xlane.xlu0 %96 }
 0x103   :  { %v156_v38 = vsub.f32 1.5, %v155_v33  ;;  %v119_v39 = vmul.f32 %v103_v36, %v792_v22  ;;  %v117_v40 = vmul.f32 %v97_v37, %v792_v22 }
 0x104   :  { %v894_v44 = vpop.eup %668  ;;  %v136_v45 = vsub.f32 1.5, %v135_v35 }
 0x105   :  { %v896_v47 = vpop.eup %670  ;;  %v157_v48 = vmul.f32 %v665_v19, %v156_v38  ;;  %v183_v49 = vmul.f32 %v894_v44, %v871_v20  ;;  %v900_v50 = vadd.f32 1e-05, %v119_v39  ;;  %v908_v55 = vadd.f32 1e-05, %v117_v40 }
 0x106   :  { %v673_v51 = vpop.eup %672  ;;  %v137_v53 = vmul.f32 %v667_v24, %v136_v45  ;;  %v193_v54 = vmul.f32 %v896_v47, %v878_v26  ;;  %vm189_vm9 = vweird.f32 %v894_v44  ;;  %vm199_vm10 = vweird.f32 %v896_v47 }
 0x107   :  { %v161_v58 = vsel %vm902_vm5, %v665_v19, %v157_v48  ;;  %v184_v59 = vmul.f32 %v894_v44, %v183_v49  ;;  %v173_v60 = vmul.f32 %v673_v51, %v880_v27  ;;  %674 = vrsqrt.f32 %v900_v50  ;;  %vm951_vm12 = vmor %vm188_vm8, %vm189_vm9 }
 0x108   :  { %v141_v61 = vsel %vm140_vm7, %v667_v24, %v137_v53  ;;  %v194_v62 = vmul.f32 %v896_v47, %v193_v54  ;;  %676 = vrsqrt.f32 %v908_v55  ;;  %v214_v8 = vmul.f32 %v161_v58, %v796_v28  ;;  %vm200_vm14 = vmor %vm198_vm13, %vm199_vm10 }
 0x109   :  { %v185_v1 = vmul.f32 0.5, %v184_v59  ;;  %v174_v2 = vmul.f32 %v673_v51, %v173_v60  ;;  %v212_v6 = vmul.f32 %v141_v61, %v798_v29  ;;  %vm179_vm11 = vweird.f32 %v673_v51 }
 0x10a   :  { %v195_v4 = vmul.f32 0.5, %v194_v62  ;;  %v115_v5 = vpop.xlane.xlu0 %114  ;;  %v226_v13 = vmul.f32 %v919_v63, %v214_v8  ;;  %vm180_vm1 = vmor %vm178_vm15, %vm179_vm11  ;;  %vm168_vm2 = vweird.f32 %v900_v50  ;;  %vm148_vm6 = vweird.f32 %v908_v55 }
 0x10b   :  { %v186_v9 = vsub.f32 1.5, %v185_v1  ;;  %v175_v10 = vmul.f32 0.5, %v174_v2  ;;  %v123_v11 = vmul.f32 %v115_v5, %v792_v22  ;;  %v224_v29 = vmul.f32 %v919_v63, %v212_v6 }
 0x10c   :  { %v196_v12 = vsub.f32 1.5, %v195_v4  ;;  %v238_v18 = vadd.f32 %v937_v7, %v226_v13 }
 0x10d   :  { %v176_v14 = vsub.f32 1.5, %v175_v10  ;;  %v947_v28 = vadd.f32 1e-05, %v123_v11  ;;  %v675_v15 = vpop.eup %674  ;;  %v236_v17 = vadd.f32 %v937_v7, %v224_v29  ;;  %v187_v21 = vmul.f32 %v894_v44, %v186_v9  ;;  %v661_v9 = vld [vmem:[%s1230_s4] ss:$0 sm:$0xff] }
 0x10e   :  { %v197_v22 = vmul.f32 %v896_v47, %v196_v12  ;;  %v677_v19 = vpop.eup %676  ;;  %v163_v20 = vmul.f32 %v675_v15, %v900_v50  ;;  %611 = vmatmul.msk.f32.vlgmr.msra.gmra.mxu1 %vm36_vm0, %v238_v18  ;;  %vm169_vm3 = vweird.f32 %v675_v15 }
 0x10f   :  { %v177_v24 = vmul.f32 %v673_v51, %v176_v14  ;;  %v143_v30 = vmul.f32 %v677_v19, %v908_v55  ;;  %678 = vrsqrt.f32 %v947_v28  ;;  %609 = vmatmul.msk.f32.vlgmr.msra.gmra.mxu0 %vm36_vm0, %v236_v17  ;;  %v191_v36 = vsel %vm951_vm12, %v894_v44, %v187_v21  ;;  %vm170_vm5 = vmor %vm168_vm2, %vm169_vm3  ;;  %v1063_v21 = vld [vmem:[%s1232_s5 + $0x38] sm:$0xff] }
 0x110   :  { %v201_v26 = vsel %vm200_vm14, %v896_v47, %v197_v22  ;;  %v164_v31 = vmul.f32 %v675_v15, %v163_v20  ;;  %vm149_vm4 = vweird.f32 %v677_v19  ;;  %v217_v49 = vmul.f32 %v191_v36, %v812_v42  ;;  %v1075_v20 = vld [vmem:[%s1232_s5 + $0x28] sm:$0xff] }
 0x111   :  { %v181_v27 = vsel %vm180_vm1, %v673_v51, %v177_v24  ;;  %v218_v32 = vmul.f32 %v201_v26, %v810_v41  ;;  %v144_v33 = vmul.f32 %v677_v19, %v143_v30  ;;  %vm150_vm7 = vmor %vm148_vm6, %vm149_vm4  ;;  %vm208_vm9 = vweird.f32 %v947_v28  ;;  %v1069_v24 = vld [vmem:[%s1232_s5 + $0x30] sm:$0xff]  ;;  %v432_v26 = vpop.permute.xlu1 %431 }
 0x112   :  { %v216_v35 = vmul.f32 %v181_v27, %v814_v43  ;;  %v165_v37 = vmul.f32 0.5, %v164_v31  ;;  %v229_v59 = vmul.f32 %v919_v63, %v217_v49  ;;  %v1080_v31 = vpop.permute.xlu2 %434  ;;  %vm500_vm4 = vcmp.ne.s32.totalorder %v889_v34, 0  ;;  %v341_v34 = vld [vmem:[%s1234_s6 + $0x20] sm:$0xff] }
 0x113   :  { %v230_v38 = vmul.f32 %v919_v63, %v218_v32  ;;  %v145_v39 = vmul.f32 0.5, %v144_v33 }
 0x114   :  { %v228_v40 = vmul.f32 %v919_v63, %v216_v35  ;;  %v166_v45 = vsub.f32 1.5, %v165_v37  ;;  %v241_v2 = vadd.f32 %v937_v7, %v229_v59 }
 0x115   :  { %v242_v41 = vadd.f32 %v937_v7, %v230_v38  ;;  %v679_v47 = vpop.eup %678  ;;  %v146_v43 = vsub.f32 1.5, %v145_v39 }
 0x116   :  { %v240_v48 = vadd.f32 %v937_v7, %v228_v40  ;;  %v167_v44 = vmul.f32 %v675_v15, %v166_v45  ;;  %v203_v51 = vmul.f32 %v679_v47, %v947_v28  ;;  %vm209_vm8 = vweird.f32 %v679_v47 }
 0x117   :  { %615 = vmatmul.msk.f32.vlgmr.msra.gmra.mxu3 %vm36_vm0, %v242_v41  ;;  %v147_v52 = vmul.f32 %v677_v19, %v146_v43  ;;  %vm210_vm10 = vmor %vm208_vm9, %vm209_vm8  ;;  %v425_v40 = vlaneseq  ;;  %vm501_vm9 = vcmp.ne.s32.totalorder %v930_v3, 0 }
 0x118   :  { %613 = vmatmul.msk.f32.vlgmr.msra.gmra.mxu2 %vm36_vm0, %v240_v48  ;;  %v171_v50 = vsel %vm170_vm5, %v675_v15, %v167_v44  ;;  %v204_v53 = vmul.f32 %v679_v47, %v203_v51 }
 0x119   :  { %v151_v54 = vsel %vm150_vm7, %v677_v19, %v147_v52  ;;  %v215_v58 = vmul.f32 %v171_v50, %v831_v56  ;;  %v1078_v27 = vpop.permute.xlu1 %440  ;;  %v1093_v43 = vand.u32 127, %v425_v40  ;;  %vm499_vm7 = vcmp.ne.s32.totalorder %v876_v23, 0 }
 0x11a   :  { %v205_v42 = vmul.f32 0.5, %v204_v53  ;;  %v213_v60 = vmul.f32 %v151_v54, %v820_v46 }
 0x11b   :  { %v227_v61 = vmul.f32 %v919_v63, %v215_v58  ;;  %vm453_vm13 = vcmp.eq.s32.totalorder %v1080_v31, %v1093_v43  ;;  %vm455_vm14 = vcmp.eq.s32.totalorder %v1078_v27, %v1093_v43  ;;  %v343_v27 = vld [vmem:[%s1234_s6 + $0x30] sm:$0xff] }
 0x11c   :  { %v206_v62 = vsub.f32 1.5, %v205_v42  ;;  %v225_v1 = vmul.f32 %v919_v63, %v213_v60 }
 0x11d   :  { %v239_v55 = vadd.f32 %v937_v7, %v227_v61  ;;  %v429_v30 = vpop.permute.xlu0 %428 }
 0x11e   :  { %v207_v4 = vmul.f32 %v679_v47, %v206_v62  ;;  %v237_v56 = vadd.f32 %v937_v7, %v225_v1  ;;  %vm451_vm11 = vcmp.eq.s32.totalorder %v429_v30, %v1093_v43  ;;  %v342_v30 = vld [vmem:[%s1234_s6 + $0x28] sm:$0xff] }
 0x11f   :  { %612 = vmatmul.msk.f32.gmra.mxu1 %vm36_vm0, %v239_v55 }
 0x120   :  { %614 = vmatmul.msk.f32.gmra.mxu2 %vm36_vm0, %v241_v2  ;;  %v211_v46 = vsel %vm210_vm10, %v679_v47, %v207_v4  ;;  %610 = vmatmul.msk.f32.gmra.mxu0 %vm36_vm0, %v237_v56 }
 0x121   :  { %v219_v5 = vmul.f32 %v211_v46, %v833_v57 }
 0x123   :  { %v231_v6 = vmul.f32 %v919_v63, %v219_v5 }
 0x125   :  { %v243_v8 = vadd.f32 %v937_v7, %v231_v6 }
 0x127   :  { %616 = vmatmul.msk.f32.gmra.mxu3 %vm36_vm0, %v243_v8  ;;  %vm452_vm0 = vcmp.eq.s32.totalorder %v432_v26, %v1093_v43 }
 0x15a   :  { %v438_v39 = vpop.permute.xlu2 %437 }
 0x15b   :  { %vm454_vm12 = vcmp.eq.s32.totalorder %v438_v39, %v1093_v43 }
 0x18b   :  { %v303_v11 = vpop.f32.mrf.mxu1 }
 0x18c   :  { %v297_v10 = vpop.f32.mrf.mxu0  ;;  %v1010_v29 = vadd.f32 %v661_v9, %v303_v11 }
 0x18d   :  { %v1008_v12 = vadd.f32 %v661_v9, %v297_v10 }
 0x18e   :  { %349 = vmax.xlane.f32.xlu0 %v1010_v29  ;;  %323 = vst [vmem:[%s1233_s7 + $0x10] sm:$0xff] %v1010_v29 }
 0x18f   :  { %321 = vst [vmem:[%s1233_s7] sm:$0xff] %v1008_v12  ;;  %345 = vmax.xlane.f32.xlu1 %v1008_v12  ;;  %v459_v10 = vsel %vm451_vm11, %v1008_v12, 0.0 }
 0x19a   :  { %v315_v57 = vpop.f32.mrf.mxu3 }
 0x19b   :  { %v309_v63 = vpop.f32.mrf.mxu2  ;;  %v1022_v7 = vadd.f32 %v661_v9, %v315_v57  ;;  %v461_v57 = vsel %vm453_vm13, %v1010_v29, 0.0 }
 0x19c   :  { %v1024_v13 = vadd.f32 %v661_v9, %v309_v63  ;;  %v306_v14 = vpop.f32.mrf.mxu1 }
 0x19d   :  { %327 = vst [vmem:[%s1233_s7 + $0x30] sm:$0xff] %v1022_v7  ;;  %357 = vmax.xlane.f32.xlu1 %v1022_v7  ;;  %v300_v28 = vpop.f32.mrf.mxu0  ;;  %v1035_v15 = vadd.f32 %v661_v9, %v306_v14 }
 0x19e   :  { %325 = vst [vmem:[%s1233_s7 + $0x20] sm:$0xff] %v1024_v13  ;;  %353 = vmax.xlane.f32.xlu2 %v1024_v13  ;;  %v301_v16 = vadd.f32 %v661_v9, %v300_v28  ;;  %v463_v63 = vsel %vm455_vm14, %v1024_v13, 0.0  ;;  %vm495_vm14 = vcmp.eq.s32.totalorder %v341_v34, 1 }
 0x19f   :  { %324 = vst [vmem:[%s1233_s7 + $0x18] sm:$0xff] %v1035_v15  ;;  %v462_v11 = vsel %vm454_vm12, %v1035_v15, 0.0  ;;  %vm502_vm12 = vcmp.ne.s32.totalorder %v965_v25, 0 }
 0x1a0   :  { %322 = vst [vmem:[%s1233_s7 + $0x8] sm:$0xff] %v301_v16  ;;  %v460_v50 = vsel %vm452_vm0, %v301_v16, 0.0  ;;  %vm539_vm0 = vcmask 7168  }
 0x1a3   :  { %v312_v22 = vpop.f32.mrf.mxu2 }
 0x1a4   :  { %v1045_v17 = vadd.f32 %v661_v9, %v312_v22  ;;  %v337_v22 = vld [vmem:[%s1234_s6] sm:$0xff] }
 0x1a5   :  { %351 = vmax.xlane.f32.xlu1 %v1035_v15  ;;  %vm491_vm6 = vcmp.eq.s32.totalorder %v337_v22, 1 }
 0x1a6   :  { %326 = vst [vmem:[%s1233_s7 + $0x28] sm:$0xff] %v1045_v17  ;;  %355 = vmax.xlane.f32.xlu0 %v1045_v17  ;;  %347 = vmax.xlane.f32.xlu2 %v301_v16  ;;  %vm507_vm10 = vmand %vm491_vm6, %vm499_vm7  ;;  %vm505_vm6 = vcmp.ne.s32.totalorder %v1069_v24, 0 }
 0x1aa   :  { %v318_v18 = vpop.f32.mrf.mxu3 }
 0x1ab   :  { %v1053_v19 = vadd.f32 %v661_v9, %v318_v18  ;;  %v714_v18 = vmov 0.0  }
 0x1ac   :  { %v1160_v3 = vsel %vm507_vm10, 1.0, %v714_v18 }
 0x1ad   :  { %328 = vst [vmem:[%s1233_s7 + $0x38] sm:$0xff] %v1053_v19  ;;  %v564_v25 = vsel %vm539_vm0, %v1160_v3, 0.0 }
 0x1ae   :  { %359 = vmax.xlane.f32.xlu2 %v1053_v19 }
 0x1ba   :  { %449 = vperm.xlu0 %656, %v1063_v21  }
 0x1be   :  { %446 = vperm.xlu1 %657, %v1069_v24  }
 0x1c6   :  { %443 = vperm.xlu2 %658, %v1075_v20  }
 0x201   :  { %v1084_v33 = vpop.xlane.xlu0 %349 }
 0x202   :  { %v1082_v32 = vpop.xlane.xlu1 %345  ;;  %v363_v36 = vsub.f32 %v1010_v29, %v1084_v33 }
 0x203   :  { %v361_v35 = vsub.f32 %v1008_v12, %v1082_v32 }
 0x204   :  { %v373_v38 = vmul.f32 1.442695, %v363_v36 }
 0x205   :  { %v369_v37 = vmul.f32 1.442695, %v361_v35 }
 0x207   :  { %680 = vpow2.f32 %v369_v37 }
 0x208   :  { %682 = vpow2.f32 %v373_v38 }
 0x20d   :  { %v681_v45 = vpop.eup %680 }
 0x20e   :  { %v683_v41 = vpop.eup %682  ;;  %385 = vadd.xlane.f32.xlu2 %v681_v45 }
 0x20f   :  { %389 = vadd.xlane.f32.xlu0 %v683_v41 }
 0x210   :  { %v1090_v47 = vpop.xlane.xlu1 %357 }
 0x211   :  { %v367_v48 = vsub.f32 %v1022_v7, %v1090_v47  ;;  %v1097_v49 = vpop.xlane.xlu2 %353 }
 0x212   :  { %v365_v44 = vsub.f32 %v1024_v13, %v1097_v49  ;;  %v338_v13 = vld [vmem:[%s1234_s6 + $0x8] sm:$0xff] }
 0x213   :  { %v381_v51 = vmul.f32 1.442695, %v367_v48  ;;  %vm492_vm3 = vcmp.eq.s32.totalorder %v338_v13, 1 }
 0x214   :  { %v377_v52 = vmul.f32 1.442695, %v365_v44  ;;  %vm508_vm5 = vmand %vm492_vm3, %vm500_vm4  ;;  %vm504_vm3 = vcmp.ne.s32.totalorder %v1075_v20, 0 }
 0x215   :  { %684 = vpow2.f32 %v381_v51 }
 0x216   :  { %686 = vpow2.f32 %v377_v52  ;;  %469 = vadd.xlane.f32.xlu2 %v460_v50 }
 0x218   :  { %v1102_v53 = vpop.xlane.xlu1 %351 }
 0x219   :  { %v364_v54 = vsub.f32 %v1035_v15, %v1102_v53  ;;  %v1106_v58 = vpop.xlane.xlu2 %347  ;;  %v1109_v42 = vpop.xlane.xlu0 %355 }
 0x21a   :  { %v362_v59 = vsub.f32 %v301_v16, %v1106_v58  ;;  %v366_v55 = vsub.f32 %v1045_v17, %v1109_v42 }
 0x21b   :  { %v685_v60 = vpop.eup %684  ;;  %v375_v61 = vmul.f32 1.442695, %v364_v54 }
 0x21c   :  { %v687_v62 = vpop.eup %686  ;;  %v371_v1 = vmul.f32 1.442695, %v362_v59  ;;  %397 = vadd.xlane.f32.xlu0 %v685_v60  ;;  %v379_v2 = vmul.f32 1.442695, %v366_v55 }
 0x21d   :  { %688 = vpow2.f32 %v375_v61  ;;  %393 = vadd.xlane.f32.xlu1 %v687_v62 }
 0x21e   :  { %690 = vpow2.f32 %v371_v1 }
 0x21f   :  { %692 = vpow2.f32 %v379_v2 }
 0x221   :  { %v1113_v4 = vpop.xlane.xlu2 %359 }
 0x222   :  { %v368_v56 = vsub.f32 %v1053_v19, %v1113_v4 }
 0x223   :  { %v689_v46 = vpop.eup %688 }
 0x224   :  { %v691_v5 = vpop.eup %690  ;;  %v383_v6 = vmul.f32 1.442695, %v368_v56  ;;  %391 = vadd.xlane.f32.xlu2 %v689_v46 }
 0x225   :  { %387 = vadd.xlane.f32.xlu1 %v691_v5  ;;  %v693_v8 = vpop.eup %692 }
 0x226   :  { %694 = vpow2.f32 %v383_v6 }
 0x229   :  { %v444_v12 = vpop.permute.xlu2 %443 }
 0x22a   :  { %vm456_vm1 = vcmp.eq.s32.totalorder %v444_v12, %v1093_v43 }
 0x22b   :  { %v464_v15 = vsel %vm456_vm1, %v1045_v17, 0.0  ;;  %v340_v17 = vld [vmem:[%s1234_s6 + $0x18] sm:$0xff] }
 0x22c   :  { %v695_v9 = vpop.eup %694  ;;  %395 = vadd.xlane.f32.xlu2 %v693_v8  ;;  %v450_v28 = vpop.permute.xlu0 %449  ;;  %vm494_vm11 = vcmp.eq.s32.totalorder %v340_v17, 1 }
 0x22d   :  { %467 = vadd.xlane.f32.xlu1 %v459_v10  ;;  %399 = vadd.xlane.f32.xlu0 %v695_v9  ;;  %vm458_vm2 = vcmp.eq.s32.totalorder %v450_v28, %v1093_v43  ;;  %vm510_vm1 = vmand %vm494_vm11, %vm502_vm12  ;;  %vm591_vm12 = vcmp.eq.s32.totalorder %v1093_v43, 0 }
 0x22e   :  { %v466_v29 = vsel %vm458_vm2, %v1053_v19, 0.0  ;;  %v1147_v19 = vsel %vm508_vm5, 1.0, %v714_v18  ;;  %vm496_vm2 = vcmp.eq.s32.totalorder %v342_v30, 1  ;;  %vm497_vm5 = vcmp.eq.s32.totalorder %v343_v27, 1 }
 0x22f   :  { %v565_v26 = vsel %vm539_vm0, %v1147_v19, 0.0  ;;  %v1176_v38 = vsel %vm510_vm1, 1.0, %v714_v18  ;;  %vm512_vm7 = vmand %vm496_vm2, %vm504_vm3 }
 0x230   :  { %v447_v14 = vpop.permute.xlu1 %446  ;;  %v566_v31 = vadd.f32 %v565_v26, %v564_v25  ;;  %v569_v20 = vsel %vm539_vm0, %v1176_v38, 0.0  ;;  %vm513_vm10 = vmand %vm497_vm5, %vm505_vm6  ;;  %v1185_v24 = vsel %vm512_vm7, 1.0, %v714_v18 }
 0x231   :  { %vm457_vm15 = vcmp.eq.s32.totalorder %v447_v14, %v1093_v43  ;;  %v573_v50 = vsel %vm539_vm0, %v1185_v24, 0.0  ;;  %v1189_v54 = vsel %vm513_vm10, 1.0, %v714_v18 }
 0x232   :  { %v465_v16 = vsel %vm457_vm15, %v1022_v7, 0.0  ;;  %v339_v7 = vld [vmem:[%s1234_s6 + $0x10] sm:$0xff]  ;;  %vm503_vm15 = vcmp.ne.s32.totalorder %v924_v0, 0  ;;  %v344_v0 = vld [vmem:[%s1234_s6 + $0x38] sm:$0xff]  ;;  %v575_v59 = vsel %vm539_vm0, %v1189_v54, 0.0 }
 0x233   :  { %vm493_vm8 = vcmp.eq.s32.totalorder %v339_v7, 1  ;;  %vm511_vm4 = vmand %vm495_vm14, %vm503_vm15 }
 0x234   :  { %473 = vadd.xlane.f32.xlu2 %v462_v11  ;;  %vm509_vm13 = vmand %vm493_vm8, %vm501_vm9  ;;  %vm498_vm8 = vcmp.eq.s32.totalorder %v344_v0, 1  ;;  %vm506_vm9 = vcmp.ne.s32.totalorder %v1063_v21, 0  ;;  %v1181_v45 = vsel %vm511_vm4, 1.0, %v714_v18 }
 0x235   :  { %471 = vadd.xlane.f32.xlu1 %v461_v57  ;;  %475 = vadd.xlane.f32.xlu0 %v463_v63  ;;  %v1168_v35 = vsel %vm509_vm13, 1.0, %v714_v18  ;;  %v571_v41 = vsel %vm539_vm0, %v1181_v45, 0.0  ;;  %vm514_vm11 = vmand %vm498_vm8, %vm506_vm9  ;;  %vm595_vm13 = vcmp.eq.s32.totalorder %v1093_v43, 1 }
 0x236   :  { %v567_v36 = vsel %vm539_vm0, %v1168_v35, 0.0  ;;  %v1193_v60 = vsel %vm514_vm11, 1.0, %v714_v18 }
 0x237   :  { %v568_v37 = vadd.f32 %v567_v36, %v566_v31  ;;  %v577_v62 = vsel %vm539_vm0, %v1193_v60, 0.0 }
 0x239   :  { %v570_v39 = vadd.f32 %v569_v20, %v568_v37 }
 0x23b   :  { %v572_v44 = vadd.f32 %v571_v41, %v570_v39 }
 0x23c   :  { %479 = vadd.xlane.f32.xlu2 %v465_v16 }
 0x23d   :  { %477 = vadd.xlane.f32.xlu1 %v464_v15  ;;  %481 = vadd.xlane.f32.xlu0 %v466_v29  ;;  %v574_v21 = vadd.f32 %v573_v50, %v572_v44 }
 0x23f   :  { %v576_v61 = vadd.f32 %v575_v59, %v574_v21 }
 0x241   :  { %v578_v1 = vadd.f32 %v577_v62, %v576_v61 }
 0x244   :  { %579 = vadd.xlane.f32.xlu2 %v578_v1 }
 0x281   :  { %v386_v23 = vpop.xlane.xlu2 %385 }
 0x282   :  { %v390_v51 = vpop.xlane.xlu0 %389  ;;  %696 = vlog2.f32 %v386_v23 }
 0x283   :  { %698 = vlog2.f32 %v390_v51 }
 0x288   :  { %v697_v2 = vpop.eup %696 }
 0x289   :  { %v470_v48 = vpop.xlane.xlu2 %469  ;;  %v402_v5 = vmul.f32 0.6931472, %v697_v2  ;;  %v699_v6 = vpop.eup %698 }
 0x28a   :  { %v406_v29 = vmul.f32 0.6931472, %v699_v6 }
 0x28b   :  { %v417_v10 = vadd.f32 %v402_v5, %v1082_v32 }
 0x28c   :  { %v419_v23 = vadd.f32 %v406_v29, %v1084_v33 }
 0x28f   :  { %v398_v56 = vpop.xlane.xlu0 %397 }
 0x290   :  { %v394_v52 = vpop.xlane.xlu1 %393 }
 0x297   :  { %v392_v55 = vpop.xlane.xlu2 %391 }
 0x298   :  { %v388_v46 = vpop.xlane.xlu1 %387  ;;  %700 = vlog2.f32 %v392_v55 }
 0x299   :  { %702 = vlog2.f32 %v388_v46 }
 0x29a   :  { %704 = vlog2.f32 %v394_v52 }
 0x29b   :  { %706 = vlog2.f32 %v398_v56 }
 0x29e   :  { %v701_v8 = vpop.eup %700 }
 0x29f   :  { %v703_v9 = vpop.eup %702  ;;  %v396_v11 = vpop.xlane.xlu2 %395  ;;  %v408_v15 = vmul.f32 0.6931472, %v701_v8 }
 0x2a0   :  { %v705_v57 = vpop.eup %704  ;;  %v404_v63 = vmul.f32 0.6931472, %v703_v9  ;;  %v468_v14 = vpop.xlane.xlu1 %467  ;;  %708 = vlog2.f32 %v396_v11 }
 0x2a1   :  { %v400_v12 = vpop.xlane.xlu0 %399  ;;  %v483_v28 = vsub.f32 %v417_v10, %v468_v14  ;;  %v410_v13 = vmul.f32 0.6931472, %v705_v57  ;;  %v707_v17 = vpop.eup %706  ;;  %v420_v18 = vadd.f32 %v408_v15, %v1102_v53 }
 0x2a2   :  { %v418_v16 = vadd.f32 %v404_v63, %v1106_v58  ;;  %710 = vlog2.f32 %v400_v12 }
 0x2a3   :  { %v531_v7 = vmul.f32 %v1160_v3, %v483_v28  ;;  %v421_v30 = vadd.f32 %v410_v13, %v1097_v49 }
 0x2a4   :  { %v484_v22 = vsub.f32 %v418_v16, %v470_v48 }
 0x2a5   :  { %v540_v25 = vsel %vm539_vm0, %v531_v7, 0.0 }
 0x2a6   :  { %v532_v32 = vmul.f32 %v1147_v19, %v484_v22  ;;  %v709_v34 = vpop.eup %708  ;;  %v414_v19 = vmul.f32 0.6931472, %v707_v17  ;;  %v589_v22 = vshrl.u32 %v425_v40, 7 }
 0x2a7   :  { %v474_v26 = vpop.xlane.xlu2 %473  ;;  %v412_v39 = vmul.f32 0.6931472, %v709_v34 }
 0x2a8   :  { %v711_v27 = vpop.eup %710  ;;  %v541_v58 = vsel %vm539_vm0, %v532_v32, 0.0  ;;  %v472_v31 = vpop.xlane.xlu1 %471  ;;  %v486_v0 = vsub.f32 %v420_v18, %v474_v26  ;;  %v423_v51 = vadd.f32 %v414_v19, %v1090_v47 }
 0x2a9   :  { %v476_v36 = vpop.xlane.xlu0 %475  ;;  %v542_v3 = vadd.f32 %v541_v58, %v540_v25  ;;  %v485_v37 = vsub.f32 %v419_v23, %v472_v31  ;;  %v416_v53 = vmul.f32 0.6931472, %v711_v27  ;;  %v422_v50 = vadd.f32 %v412_v39, %v1109_v42 }
 0x2aa   :  { %v487_v20 = vsub.f32 %v421_v30, %v476_v36  ;;  %v534_v33 = vmul.f32 %v1176_v38, %v486_v0 }
 0x2ab   :  { %v533_v41 = vmul.f32 %v1168_v35, %v485_v37  ;;  %v424_v59 = vadd.f32 %v416_v53, %v1113_v4 }
 0x2ac   :  { %v535_v48 = vmul.f32 %v1181_v45, %v487_v20  ;;  %v545_v52 = vsel %vm539_vm0, %v534_v33, 0.0 }
 0x2ad   :  { %v543_v49 = vsel %vm539_vm0, %v533_v41, 0.0 }
 0x2ae   :  { %v544_v44 = vadd.f32 %v543_v49, %v542_v3  ;;  %v547_v38 = vsel %vm539_vm0, %v535_v48, 0.0 }
 0x2af   :  { %v480_v21 = vpop.xlane.xlu2 %479 }
 0x2b0   :  { %v546_v61 = vadd.f32 %v545_v52, %v544_v44  ;;  %v478_v62 = vpop.xlane.xlu1 %477  ;;  %v489_v1 = vsub.f32 %v423_v51, %v480_v21 }
 0x2b1   :  { %v482_v35 = vpop.xlane.xlu0 %481  ;;  %v488_v55 = vsub.f32 %v422_v50, %v478_v62 }
 0x2b2   :  { %v490_v2 = vsub.f32 %v424_v59, %v482_v35  ;;  %v548_v56 = vadd.f32 %v547_v38, %v546_v61  ;;  %v537_v47 = vmul.f32 %v1189_v54, %v489_v1 }
 0x2b3   :  { %v536_v45 = vmul.f32 %v1185_v24, %v488_v55 }
 0x2b4   :  { %v538_v42 = vmul.f32 %v1193_v60, %v490_v2  ;;  %v551_v4 = vsel %vm539_vm0, %v537_v47, 0.0 }
 0x2b5   :  { %v549_v46 = vsel %vm539_vm0, %v536_v45, 0.0 }
 0x2b6   :  { %v550_v5 = vadd.f32 %v549_v46, %v548_v56  ;;  %v553_v8 = vsel %vm539_vm0, %v538_v42, 0.0  ;;  %vm590_vm0 = vcmp.eq.s32.totalorder %v589_v22, 0 }
 0x2b7   :  { %v580_v10 = vpop.xlane.xlu2 %579  ;;  %vm592_vm14 = vmand %vm590_vm0, %vm591_vm12 }
 0x2b8   :  { %v552_v6 = vadd.f32 %v551_v4, %v550_v5  ;;  %v581_v11 = vrot.slane %v580_v10, 4  ;;  %vm596_vm15 = vmand %vm590_vm0, %vm595_vm13 }
 0x2ba   :  { %v554_v9 = vadd.f32 %v553_v8, %v552_v6  ;;  %v582_v57 = vadd.f32 %v581_v11, %v580_v10 }
 0x2bc   :  { %555 = vadd.xlane.f32.xlu1 %v554_v9  ;;  %v583_v63 = vrot.slane %v582_v57, 2 }
 0x2be   :  { %v584_v54 = vadd.f32 %v583_v63, %v582_v57 }
 0x2c0   :  { %v585_v15 = vrot.slane %v584_v54, 1 }
 0x2c2   :  { %v586_v13 = vadd.f32 %v585_v15, %v584_v54 }
 0x32f   :  { %v556_v14 = vpop.xlane.xlu1 %555 }
 0x330   :  { %v557_v24 = vrot.slane %v556_v14, 4 }
 0x332   :  { %v558_v12 = vadd.f32 %v557_v24, %v556_v14 }
 0x334   :  { %v559_v28 = vrot.slane %v558_v12, 2 }
 0x336   :  { %v560_v16 = vadd.f32 %v559_v28, %v558_v12 }
 0x338   :  { %v561_v60 = vrot.slane %v560_v16, 1 }
 0x33a   :  { %v562_v29 = vadd.f32 %v561_v60, %v560_v16 }
 0x33c   :  { %649 = vpush %v562_v29 }
 0x33d   :  { %651 = vpush %v586_v13 }
 0x36d   :  { %s650_s6 = spop %649 }
 0x36e   :  { %v593_v7 = vstv %s650_s6  ;;  %s652_s12 = spop %651 }
 0x36f   :  { %v594_v17 = vsel %vm592_vm14, %v593_v7, 0.0  ;;  %v597_v32 = vstv %s652_s12 }
 0x370   :  { %v598_v18 = vsel %vm596_vm15, %v597_v32, 0.0 }
 0x371   :  { %v599_v34 = vadd.f32 %v598_v18, %v594_v17 }
 0x373   :  { %600 = vst [vmem:[%s1235_s8] sm:$0xff] %v599_v34 }

</bundles_post_ra>
